<compile_context>
chip_gen: v7x
topology: tpu7x:2x2x1
jax: 0.10.0
libtpu: 0.0.40
codegen_flags: <defaults>
</compile_context>

<pallas_src>
import functools

import jax
import jax.numpy as jnp
from jax.experimental import pallas as pl
from jax.experimental.pallas import tpu as pltpu


# ----------------------------------------------------------------------------
# Fused kernel: attention code encoder + batched LSTM desc encoder + cosine
# similarity + margin ranking loss.  Single invocation, whole-array VMEM
# blocks (everything is a few hundred KB at most).
#
#   tok_emb  : [B, L, E]  bf16   gathered code-token embeddings
#   tok_mask : [B, L]     f32    1.0 for valid tokens
#   desc_emb : [2B, T, E] bf16   anchor(:B) + negative(B:) desc embeddings
#   desc_mask: [2B, T]    f32
#   att_w    : [E, H] bf16   att_b, att_a : [1, H] f32
#   wih      : [E, 4D] bf16  whh : [D, 4D] bf16   lstm_b : [1, 4D] f32
#   loss_ref : [1, 1] f32
# ----------------------------------------------------------------------------
def jointemb_kernel(tok_emb_ref, tok_mask_ref,
                    desc_emb_ref, desc_mask_ref,
                    att_w_ref, att_b_ref, att_a_ref,
                    wih_ref, whh_ref, lstm_b_ref,
                    loss_ref, *, margin, batch):
    # ---------------- attention-pooled code encoder ----------------
    B, L, E = tok_emb_ref.shape
    H = att_w_ref.shape[1]

    emb2d = tok_emb_ref[...].reshape(B * L, E)                    # bf16 [B*L, E]
    proj2d = jnp.tanh(
        jnp.dot(emb2d, att_w_ref[...], preferred_element_type=jnp.float32)
        + att_b_ref[...]                                          # f32 [B*L, H]
    )
    proj = proj2d.reshape(B, L, H)                                # f32 [B, L, H]

    a = att_a_ref[...]                                            # [1, H]
    scores = jnp.sum(proj * a[None, :, :], axis=-1)               # [B, L]
    mask = tok_mask_ref[...]                                      # [B, L]
    scores = jnp.where(mask > 0.0, scores, -1e9)

    m = jnp.max(scores, axis=-1, keepdims=True)
    e = jnp.exp(scores - m) * mask
    denom = jnp.sum(e, axis=-1, keepdims=True) + 1e-9             # eps: no NaN on empty rows
    alpha = e / denom                                             # [B, L]
    code_vec = jnp.sum(alpha[:, :, None] * proj, axis=1)          # [B, H]

    # ---------------- batched LSTM description encoder ----------------
    B2, T, _ = desc_emb_ref.shape                                 # B2 = 2B (anchor + neg)
    D = whh_ref.shape[0]

    # Hoist input projection out of the recurrence: one big MXU matmul.
    demb2d = desc_emb_ref[...].reshape(B2 * T, E)                 # bf16 [2B*T, E]
    x_proj = (jnp.dot(demb2d, wih_ref[...], preferred_element_type=jnp.float32)
              + lstm_b_ref[...]).reshape(B2, T, 4 * D)            # f32 [2B, T, 4D]

    whh = whh_ref[...]                                            # bf16 [D, 4D]
    dmask = desc_mask_ref[...]                                    # f32 [2B, T]

    h = jnp.zeros((B2, D), jnp.float32)
    c = jnp.zeros((B2, D), jnp.float32)
    for t in range(T):  # T is small & static; per review, fine to unroll
        gates = x_proj[:, t, :] + jnp.dot(
            h.astype(jnp.bfloat16), whh, preferred_element_type=jnp.float32)
        i_g = jax.nn.sigmoid(gates[:, 0 * D:1 * D])
        f_g = jax.nn.sigmoid(gates[:, 1 * D:2 * D])
        g_g = jnp.tanh(gates[:, 2 * D:3 * D])
        o_g = jax.nn.sigmoid(gates[:, 3 * D:4 * D])

        c_new = f_g * c + i_g * g_g
        h_new = o_g * jnp.tanh(c_new)

        m_t = dmask[:, t:t + 1]                                   # [2B, 1]
        h = m_t * h_new + (1.0 - m_t) * h
        c = m_t * c_new + (1.0 - m_t) * c

    anc = h[:batch]                                               # [B, D]
    neg = h[batch:]                                               # [B, D]

    # ---------------- cosine similarity + margin ranking loss ----------------
    eps = 1e-8
    c_norm = jnp.maximum(jnp.sqrt(jnp.sum(code_vec * code_vec, axis=-1, keepdims=True)), eps)
    a_norm = jnp.maximum(jnp.sqrt(jnp.sum(anc * anc, axis=-1, keepdims=True)), eps)
    n_norm = jnp.maximum(jnp.sqrt(jnp.sum(neg * neg, axis=-1, keepdims=True)), eps)

    sim_anchor = jnp.sum(code_vec * anc, axis=-1, keepdims=True) / (c_norm * a_norm)
    sim_neg = jnp.sum(code_vec * neg, axis=-1, keepdims=True) / (c_norm * n_norm)

    per_ex = jnp.maximum(margin - sim_anchor + sim_neg, 1e-6)     # [B, 1]
    loss_ref[...] = jnp.sum(per_ex, keepdims=True) * (1.0 / per_ex.shape[0])


# ----------------------------------------------------------------------------
# JointEmbeder forward (glue: embedding gather, masks, anchor/neg batching)
# ----------------------------------------------------------------------------
def init_params(key, n_words, emb_size, n_hidden, lstm_dims):
    ks = jax.random.split(key, 8)
    s = 0.1
    f32 = jnp.float32
    bf16 = jnp.bfloat16
    return {
        # code (tok) encoder
        "tok_emb": (s * jax.random.normal(ks[0], (n_words, emb_size), f32)).astype(bf16),
        "att_w": (s * jax.random.normal(ks[1], (emb_size, n_hidden), f32)).astype(bf16),
        "att_b": s * jax.random.normal(ks[2], (1, n_hidden), f32),
        "att_a": s * jax.random.normal(ks[3], (1, n_hidden), f32),
        # desc (seq) encoder
        "desc_emb": (s * jax.random.normal(ks[4], (n_words, emb_size), f32)).astype(bf16),
        "lstm_wih": (s * jax.random.normal(ks[5], (emb_size, 4 * lstm_dims), f32)).astype(bf16),
        "lstm_whh": (s * jax.random.normal(ks[6], (lstm_dims, 4 * lstm_dims), f32)).astype(bf16),
        "lstm_b": s * jax.random.normal(ks[7], (1, 4 * lstm_dims), f32),
    }


def length_mask(lengths, max_len):
    return (jnp.arange(max_len)[None, :] < lengths[:, None]).astype(jnp.float32)


@functools.partial(jax.jit, static_argnames=("margin",))
def joint_embeder_forward(params, tokens, tok_len,
                          desc_anchor, desc_anchor_len,
                          desc_neg, desc_neg_len, *, margin):
    B, L = tokens.shape
    T = desc_anchor.shape[1]

    # TODO(synk): embedding gathers stay in the JAX wrapper; an in-kernel
    # row-gather via PrefetchScalarGridSpec + pl.Element would need a per-row
    # grid which is not worth it at these sizes.
    tok_emb = jnp.take(params["tok_emb"], tokens, axis=0)             # [B, L, E] bf16
    tok_mask = length_mask(tok_len, L)                                # [B, L]  f32

    # anchor + negative descriptions batched through one LSTM pass
    desc_ids = jnp.concatenate([desc_anchor, desc_neg], axis=0)       # [2B, T]
    desc_lens = jnp.concatenate([desc_anchor_len, desc_neg_len], axis=0)
    desc_emb = jnp.take(params["desc_emb"], desc_ids, axis=0)         # [2B, T, E] bf16
    desc_mask = length_mask(desc_lens, T)                             # [2B, T]  f32

    kern = functools.partial(jointemb_kernel, margin=float(margin), batch=B)
    loss = pl.pallas_call(
        kern,
        out_shape=jax.ShapeDtypeStruct((1, 1), jnp.float32),
        in_specs=[pl.BlockSpec(memory_space=pltpu.MemorySpace.VMEM)] * 10,
        out_specs=pl.BlockSpec(memory_space=pltpu.MemorySpace.VMEM),
    )(tok_emb, tok_mask, desc_emb, desc_mask,
      params["att_w"], params["att_b"], params["att_a"],
      params["lstm_wih"], params["lstm_whh"], params["lstm_b"])
    return loss[0, 0]


if __name__ == "__main__":
    # config (lane-dense feature dims: E = H = D = 128)
    B = 2
    N_WORDS = 128
    EMB_SIZE = 128
    TOKENS_LEN = 16
    DESC_LEN = 8
    N_HIDDEN = 128
    LSTM_DIMS = 128      # must equal N_HIDDEN for the cosine similarity
    MARGIN = 0.6

    key = jax.random.PRNGKey(0)
    k_param, k_tok, k_da, k_dn, k_l1, k_l2, k_l3 = jax.random.split(key, 7)

    params = init_params(k_param, N_WORDS, EMB_SIZE, N_HIDDEN, LSTM_DIMS)

    tokens = jax.random.randint(k_tok, (B, TOKENS_LEN), 1, N_WORDS, dtype=jnp.int32)
    desc_anchor = jax.random.randint(k_da, (B, DESC_LEN), 1, N_WORDS, dtype=jnp.int32)
    desc_neg = jax.random.randint(k_dn, (B, DESC_LEN), 1, N_WORDS, dtype=jnp.int32)
    tok_len = jax.random.randint(k_l1, (B,), 1, TOKENS_LEN + 1, dtype=jnp.int32)
    desc_anchor_len = jax.random.randint(k_l2, (B,), 1, DESC_LEN + 1, dtype=jnp.int32)
    desc_neg_len = jax.random.randint(k_l3, (B,), 1, DESC_LEN + 1, dtype=jnp.int32)

    loss = joint_embeder_forward(params, tokens, tok_len,
                                 desc_anchor, desc_anchor_len,
                                 desc_neg, desc_neg_len, margin=MARGIN)
    loss = jax.block_until_ready(loss)
    assert jnp.isfinite(loss), "loss is not finite"
    print("KERNEL_OK")
</pallas_src>

<mosaic_0001>
module attributes {stable_mosaic.version = 11 : i64} {
  func.func @jointemb_kernel(%arg0: memref<2x16x128xbf16, #tpu.memory_space<vmem>>, %arg1: memref<2x16xf32, #tpu.memory_space<vmem>>, %arg2: memref<4x8x128xbf16, #tpu.memory_space<vmem>>, %arg3: memref<4x8xf32, #tpu.memory_space<vmem>>, %arg4: memref<128x128xbf16, #tpu.memory_space<vmem>>, %arg5: memref<1x128xf32, #tpu.memory_space<vmem>>, %arg6: memref<1x128xf32, #tpu.memory_space<vmem>>, %arg7: memref<128x512xbf16, #tpu.memory_space<vmem>>, %arg8: memref<128x512xbf16, #tpu.memory_space<vmem>>, %arg9: memref<1x512xf32, #tpu.memory_space<vmem>>, %arg10: memref<1x1xf32, #tpu.memory_space<vmem>>) attributes {dimension_semantics = [], scalar_prefetch = 0 : i64, scratch_operands = 0 : i64, tpu.core_type = #tpu.core_type<tc>} {
    %c0 = arith.constant 0 : index
    %c0_0 = arith.constant 0 : index
    %c0_1 = arith.constant 0 : index
    %0 = vector.load %arg0[%c0, %c0_0, %c0_1] : memref<2x16x128xbf16, #tpu.memory_space<vmem>>, vector<2x16x128xbf16>
    %1 = vector.shape_cast %0 : vector<2x16x128xbf16> to vector<32x128xbf16>
    %c0_2 = arith.constant 0 : index
    %c0_3 = arith.constant 0 : index
    %2 = vector.load %arg4[%c0_2, %c0_3] : memref<128x128xbf16, #tpu.memory_space<vmem>>, vector<128x128xbf16>
    %cst = arith.constant dense<0.000000e+00> : vector<32x128xf32>
    %3 = tpu.matmul %1, %2, %cst {dimension_numbers = #tpu.dot_dimension_numbers<[1], [0], [0], [1], [0, 0, 1, 1], [], []>} : vector<32x128xbf16>, vector<128x128xbf16>, vector<32x128xf32> -> vector<32x128xf32>
    %c0_4 = arith.constant 0 : index
    %c0_5 = arith.constant 0 : index
    %4 = vector.load %arg5[%c0_4, %c0_5] : memref<1x128xf32, #tpu.memory_space<vmem>>, vector<1x128xf32>
    %5 = vector.broadcast %4 : vector<1x128xf32> to vector<32x128xf32>
    %6 = arith.addf %3, %5 : vector<32x128xf32>
    %7 = math.tanh %6 : vector<32x128xf32>
    %8 = vector.shape_cast %7 : vector<32x128xf32> to vector<2x16x128xf32>
    %c0_6 = arith.constant 0 : index
    %c0_7 = arith.constant 0 : index
    %9 = vector.load %arg6[%c0_6, %c0_7] : memref<1x128xf32, #tpu.memory_space<vmem>>, vector<1x128xf32>
    %10 = vector.shape_cast %9 : vector<1x128xf32> to vector<1x1x128xf32>
    %11 = vector.broadcast %10 : vector<1x1x128xf32> to vector<2x16x128xf32>
    %12 = arith.mulf %8, %11 : vector<2x16x128xf32>
    %cst_8 = arith.constant dense<0.000000e+00> : vector<2x16xf32>
    %13 = vector.multi_reduction <add>, %12, %cst_8 [2] : vector<2x16x128xf32> to vector<2x16xf32>
    %c0_9 = arith.constant 0 : index
    %c0_10 = arith.constant 0 : index
    %14 = vector.load %arg1[%c0_9, %c0_10] : memref<2x16xf32, #tpu.memory_space<vmem>>, vector<2x16xf32>
    %cst_11 = arith.constant 0.000000e+00 : f32
    %15 = vector.broadcast %cst_11 : f32 to vector<2x16xf32>
    %16 = arith.cmpf ogt, %14, %15 : vector<2x16xf32>
    %cst_12 = arith.constant -1.000000e+09 : f32
    %17 = vector.broadcast %cst_12 : f32 to vector<2x16xf32>
    %18 = arith.select %16, %13, %17 : vector<2x16xi1>, vector<2x16xf32>
    %cst_13 = arith.constant dense<0xFF800000> : vector<2xf32>
    %19 = vector.multi_reduction <maximumf>, %18, %cst_13 [1] : vector<2x16xf32> to vector<2xf32>
    %20 = vector.shape_cast %19 : vector<2xf32> to vector<2x1xf32>
    %21 = vector.broadcast %20 : vector<2x1xf32> to vector<2x16xf32>
    %22 = arith.subf %18, %21 : vector<2x16xf32>
    %23 = math.exp %22 : vector<2x16xf32>
    %24 = arith.mulf %23, %14 : vector<2x16xf32>
    %cst_14 = arith.constant dense<0.000000e+00> : vector<2xf32>
    %25 = vector.multi_reduction <add>, %24, %cst_14 [1] : vector<2x16xf32> to vector<2xf32>
    %26 = vector.shape_cast %25 : vector<2xf32> to vector<2x1xf32>
    %cst_15 = arith.constant 9.99999971E-10 : f32
    %27 = vector.broadcast %cst_15 : f32 to vector<2x1xf32>
    %28 = arith.addf %26, %27 : vector<2x1xf32>
    %29 = vector.broadcast %28 : vector<2x1xf32> to vector<2x16xf32>
    %30 = arith.divf %24, %29 : vector<2x16xf32>
    %31 = vector.shape_cast %30 : vector<2x16xf32> to vector<2x16x1xf32>
    %32 = vector.broadcast %31 : vector<2x16x1xf32> to vector<2x16x128xf32>
    %33 = arith.mulf %32, %8 : vector<2x16x128xf32>
    %cst_16 = arith.constant dense<0.000000e+00> : vector<2x128xf32>
    %34 = vector.multi_reduction <add>, %33, %cst_16 [1] : vector<2x16x128xf32> to vector<2x128xf32>
    %c0_17 = arith.constant 0 : index
    %c0_18 = arith.constant 0 : index
    %c0_19 = arith.constant 0 : index
    %35 = vector.load %arg2[%c0_17, %c0_18, %c0_19] : memref<4x8x128xbf16, #tpu.memory_space<vmem>>, vector<4x8x128xbf16>
    %36 = vector.shape_cast %35 : vector<4x8x128xbf16> to vector<32x128xbf16>
    %c0_20 = arith.constant 0 : index
    %c0_21 = arith.constant 0 : index
    %37 = vector.load %arg7[%c0_20, %c0_21] : memref<128x512xbf16, #tpu.memory_space<vmem>>, vector<128x512xbf16>
    %cst_22 = arith.constant dense<0.000000e+00> : vector<32x512xf32>
    %38 = tpu.matmul %36, %37, %cst_22 {dimension_numbers = #tpu.dot_dimension_numbers<[1], [0], [0], [1], [0, 0, 1, 1], [], []>} : vector<32x128xbf16>, vector<128x512xbf16>, vector<32x512xf32> -> vector<32x512xf32>
    %c0_23 = arith.constant 0 : index
    %c0_24 = arith.constant 0 : index
    %39 = vector.load %arg9[%c0_23, %c0_24] : memref<1x512xf32, #tpu.memory_space<vmem>>, vector<1x512xf32>
    %40 = vector.broadcast %39 : vector<1x512xf32> to vector<32x512xf32>
    %41 = arith.addf %38, %40 : vector<32x512xf32>
    %42 = vector.shape_cast %41 : vector<32x512xf32> to vector<4x8x512xf32>
    %c0_25 = arith.constant 0 : index
    %c0_26 = arith.constant 0 : index
    %43 = vector.load %arg8[%c0_25, %c0_26] : memref<128x512xbf16, #tpu.memory_space<vmem>>, vector<128x512xbf16>
    %c0_27 = arith.constant 0 : index
    %c0_28 = arith.constant 0 : index
    %44 = vector.load %arg3[%c0_27, %c0_28] : memref<4x8xf32, #tpu.memory_space<vmem>>, vector<4x8xf32>
    %cst_29 = arith.constant 0.000000e+00 : f32
    %45 = vector.broadcast %cst_29 : f32 to vector<4x128xf32>
    %cst_30 = arith.constant 0.000000e+00 : f32
    %46 = vector.broadcast %cst_30 : f32 to vector<4x128xf32>
    %47 = vector.extract_strided_slice %42 {offsets = [0, 0, 0], sizes = [4, 1, 512], strides = [1, 1, 1]} : vector<4x8x512xf32> to vector<4x1x512xf32>
    %48 = vector.shape_cast %47 : vector<4x1x512xf32> to vector<4x512xf32>
    %49 = arith.truncf %45 : vector<4x128xf32> to vector<4x128xbf16>
    %cst_31 = arith.constant dense<0.000000e+00> : vector<4x512xf32>
    %50 = tpu.matmul %49, %43, %cst_31 {dimension_numbers = #tpu.dot_dimension_numbers<[1], [0], [0], [1], [0, 0, 1, 1], [], []>} : vector<4x128xbf16>, vector<128x512xbf16>, vector<4x512xf32> -> vector<4x512xf32>
    %51 = arith.addf %48, %50 : vector<4x512xf32>
    %52 = vector.extract_strided_slice %51 {offsets = [0, 0], sizes = [4, 128], strides = [1, 1]} : vector<4x512xf32> to vector<4x128xf32>
    %53 = arith.negf %52 : vector<4x128xf32>
    %54 = math.exp %53 : vector<4x128xf32>
    %cst_32 = arith.constant 1.000000e+00 : f32
    %55 = vector.broadcast %cst_32 : f32 to vector<4x128xf32>
    %56 = arith.addf %55, %54 : vector<4x128xf32>
    %57 = arith.divf %55, %56 : vector<4x128xf32>
    %58 = vector.extract_strided_slice %51 {offsets = [0, 128], sizes = [4, 128], strides = [1, 1]} : vector<4x512xf32> to vector<4x128xf32>
    %59 = arith.negf %58 : vector<4x128xf32>
    %60 = math.exp %59 : vector<4x128xf32>
    %cst_33 = arith.constant 1.000000e+00 : f32
    %61 = vector.broadcast %cst_33 : f32 to vector<4x128xf32>
    %62 = arith.addf %61, %60 : vector<4x128xf32>
    %63 = arith.divf %61, %62 : vector<4x128xf32>
    %64 = vector.extract_strided_slice %51 {offsets = [0, 256], sizes = [4, 128], strides = [1, 1]} : vector<4x512xf32> to vector<4x128xf32>
    %65 = math.tanh %64 : vector<4x128xf32>
    %66 = vector.extract_strided_slice %51 {offsets = [0, 384], sizes = [4, 128], strides = [1, 1]} : vector<4x512xf32> to vector<4x128xf32>
    %67 = arith.negf %66 : vector<4x128xf32>
    %68 = math.exp %67 : vector<4x128xf32>
    %cst_34 = arith.constant 1.000000e+00 : f32
    %69 = vector.broadcast %cst_34 : f32 to vector<4x128xf32>
    %70 = arith.addf %69, %68 : vector<4x128xf32>
    %71 = arith.divf %69, %70 : vector<4x128xf32>
    %72 = arith.mulf %63, %46 : vector<4x128xf32>
    %73 = arith.mulf %57, %65 : vector<4x128xf32>
    %74 = arith.addf %72, %73 : vector<4x128xf32>
    %75 = math.tanh %74 : vector<4x128xf32>
    %76 = arith.mulf %71, %75 : vector<4x128xf32>
    %77 = vector.extract_strided_slice %44 {offsets = [0, 0], sizes = [4, 1], strides = [1, 1]} : vector<4x8xf32> to vector<4x1xf32>
    %78 = vector.broadcast %77 : vector<4x1xf32> to vector<4x128xf32>
    %79 = arith.mulf %78, %76 : vector<4x128xf32>
    %cst_35 = arith.constant 1.000000e+00 : f32
    %80 = vector.broadcast %cst_35 : f32 to vector<4x1xf32>
    %81 = arith.subf %80, %77 : vector<4x1xf32>
    %82 = vector.broadcast %81 : vector<4x1xf32> to vector<4x128xf32>
    %83 = arith.mulf %82, %45 : vector<4x128xf32>
    %84 = arith.addf %79, %83 : vector<4x128xf32>
    %85 = vector.broadcast %77 : vector<4x1xf32> to vector<4x128xf32>
    %86 = arith.mulf %85, %74 : vector<4x128xf32>
    %cst_36 = arith.constant 1.000000e+00 : f32
    %87 = vector.broadcast %cst_36 : f32 to vector<4x1xf32>
    %88 = arith.subf %87, %77 : vector<4x1xf32>
    %89 = vector.broadcast %88 : vector<4x1xf32> to vector<4x128xf32>
    %90 = arith.mulf %89, %46 : vector<4x128xf32>
    %91 = arith.addf %86, %90 : vector<4x128xf32>
    %92 = vector.extract_strided_slice %42 {offsets = [0, 1, 0], sizes = [4, 1, 512], strides = [1, 1, 1]} : vector<4x8x512xf32> to vector<4x1x512xf32>
    %93 = vector.shape_cast %92 : vector<4x1x512xf32> to vector<4x512xf32>
    %94 = arith.truncf %84 : vector<4x128xf32> to vector<4x128xbf16>
    %cst_37 = arith.constant dense<0.000000e+00> : vector<4x512xf32>
    %95 = tpu.matmul %94, %43, %cst_37 {dimension_numbers = #tpu.dot_dimension_numbers<[1], [0], [0], [1], [0, 0, 1, 1], [], []>} : vector<4x128xbf16>, vector<128x512xbf16>, vector<4x512xf32> -> vector<4x512xf32>
    %96 = arith.addf %93, %95 : vector<4x512xf32>
    %97 = vector.extract_strided_slice %96 {offsets = [0, 0], sizes = [4, 128], strides = [1, 1]} : vector<4x512xf32> to vector<4x128xf32>
    %98 = arith.negf %97 : vector<4x128xf32>
    %99 = math.exp %98 : vector<4x128xf32>
    %cst_38 = arith.constant 1.000000e+00 : f32
    %100 = vector.broadcast %cst_38 : f32 to vector<4x128xf32>
    %101 = arith.addf %100, %99 : vector<4x128xf32>
    %102 = arith.divf %100, %101 : vector<4x128xf32>
    %103 = vector.extract_strided_slice %96 {offsets = [0, 128], sizes = [4, 128], strides = [1, 1]} : vector<4x512xf32> to vector<4x128xf32>
    %104 = arith.negf %103 : vector<4x128xf32>
    %105 = math.exp %104 : vector<4x128xf32>
    %cst_39 = arith.constant 1.000000e+00 : f32
    %106 = vector.broadcast %cst_39 : f32 to vector<4x128xf32>
    %107 = arith.addf %106, %105 : vector<4x128xf32>
    %108 = arith.divf %106, %107 : vector<4x128xf32>
    %109 = vector.extract_strided_slice %96 {offsets = [0, 256], sizes = [4, 128], strides = [1, 1]} : vector<4x512xf32> to vector<4x128xf32>
    %110 = math.tanh %109 : vector<4x128xf32>
    %111 = vector.extract_strided_slice %96 {offsets = [0, 384], sizes = [4, 128], strides = [1, 1]} : vector<4x512xf32> to vector<4x128xf32>
    %112 = arith.negf %111 : vector<4x128xf32>
    %113 = math.exp %112 : vector<4x128xf32>
    %cst_40 = arith.constant 1.000000e+00 : f32
    %114 = vector.broadcast %cst_40 : f32 to vector<4x128xf32>
    %115 = arith.addf %114, %113 : vector<4x128xf32>
    %116 = arith.divf %114, %115 : vector<4x128xf32>
    %117 = arith.mulf %108, %91 : vector<4x128xf32>
    %118 = arith.mulf %102, %110 : vector<4x128xf32>
    %119 = arith.addf %117, %118 : vector<4x128xf32>
    %120 = math.tanh %119 : vector<4x128xf32>
    %121 = arith.mulf %116, %120 : vector<4x128xf32>
    %122 = vector.extract_strided_slice %44 {offsets = [0, 1], sizes = [4, 1], strides = [1, 1]} : vector<4x8xf32> to vector<4x1xf32>
    %123 = vector.broadcast %122 : vector<4x1xf32> to vector<4x128xf32>
    %124 = arith.mulf %123, %121 : vector<4x128xf32>
    %cst_41 = arith.constant 1.000000e+00 : f32
    %125 = vector.broadcast %cst_41 : f32 to vector<4x1xf32>
    %126 = arith.subf %125, %122 : vector<4x1xf32>
    %127 = vector.broadcast %126 : vector<4x1xf32> to vector<4x128xf32>
    %128 = arith.mulf %127, %84 : vector<4x128xf32>
    %129 = arith.addf %124, %128 : vector<4x128xf32>
    %130 = vector.broadcast %122 : vector<4x1xf32> to vector<4x128xf32>
    %131 = arith.mulf %130, %119 : vector<4x128xf32>
    %cst_42 = arith.constant 1.000000e+00 : f32
    %132 = vector.broadcast %cst_42 : f32 to vector<4x1xf32>
    %133 = arith.subf %132, %122 : vector<4x1xf32>
    %134 = vector.broadcast %133 : vector<4x1xf32> to vector<4x128xf32>
    %135 = arith.mulf %134, %91 : vector<4x128xf32>
    %136 = arith.addf %131, %135 : vector<4x128xf32>
    %137 = vector.extract_strided_slice %42 {offsets = [0, 2, 0], sizes = [4, 1, 512], strides = [1, 1, 1]} : vector<4x8x512xf32> to vector<4x1x512xf32>
    %138 = vector.shape_cast %137 : vector<4x1x512xf32> to vector<4x512xf32>
    %139 = arith.truncf %129 : vector<4x128xf32> to vector<4x128xbf16>
    %cst_43 = arith.constant dense<0.000000e+00> : vector<4x512xf32>
    %140 = tpu.matmul %139, %43, %cst_43 {dimension_numbers = #tpu.dot_dimension_numbers<[1], [0], [0], [1], [0, 0, 1, 1], [], []>} : vector<4x128xbf16>, vector<128x512xbf16>, vector<4x512xf32> -> vector<4x512xf32>
    %141 = arith.addf %138, %140 : vector<4x512xf32>
    %142 = vector.extract_strided_slice %141 {offsets = [0, 0], sizes = [4, 128], strides = [1, 1]} : vector<4x512xf32> to vector<4x128xf32>
    %143 = arith.negf %142 : vector<4x128xf32>
    %144 = math.exp %143 : vector<4x128xf32>
    %cst_44 = arith.constant 1.000000e+00 : f32
    %145 = vector.broadcast %cst_44 : f32 to vector<4x128xf32>
    %146 = arith.addf %145, %144 : vector<4x128xf32>
    %147 = arith.divf %145, %146 : vector<4x128xf32>
    %148 = vector.extract_strided_slice %141 {offsets = [0, 128], sizes = [4, 128], strides = [1, 1]} : vector<4x512xf32> to vector<4x128xf32>
    %149 = arith.negf %148 : vector<4x128xf32>
    %150 = math.exp %149 : vector<4x128xf32>
    %cst_45 = arith.constant 1.000000e+00 : f32
    %151 = vector.broadcast %cst_45 : f32 to vector<4x128xf32>
    %152 = arith.addf %151, %150 : vector<4x128xf32>
    %153 = arith.divf %151, %152 : vector<4x128xf32>
    %154 = vector.extract_strided_slice %141 {offsets = [0, 256], sizes = [4, 128], strides = [1, 1]} : vector<4x512xf32> to vector<4x128xf32>
    %155 = math.tanh %154 : vector<4x128xf32>
    %156 = vector.extract_strided_slice %141 {offsets = [0, 384], sizes = [4, 128], strides = [1, 1]} : vector<4x512xf32> to vector<4x128xf32>
    %157 = arith.negf %156 : vector<4x128xf32>
    %158 = math.exp %157 : vector<4x128xf32>
    %cst_46 = arith.constant 1.000000e+00 : f32
    %159 = vector.broadcast %cst_46 : f32 to vector<4x128xf32>
    %160 = arith.addf %159, %158 : vector<4x128xf32>
    %161 = arith.divf %159, %160 : vector<4x128xf32>
    %162 = arith.mulf %153, %136 : vector<4x128xf32>
    %163 = arith.mulf %147, %155 : vector<4x128xf32>
    %164 = arith.addf %162, %163 : vector<4x128xf32>
    %165 = math.tanh %164 : vector<4x128xf32>
    %166 = arith.mulf %161, %165 : vector<4x128xf32>
    %167 = vector.extract_strided_slice %44 {offsets = [0, 2], sizes = [4, 1], strides = [1, 1]} : vector<4x8xf32> to vector<4x1xf32>
    %168 = vector.broadcast %167 : vector<4x1xf32> to vector<4x128xf32>
    %169 = arith.mulf %168, %166 : vector<4x128xf32>
    %cst_47 = arith.constant 1.000000e+00 : f32
    %170 = vector.broadcast %cst_47 : f32 to vector<4x1xf32>
    %171 = arith.subf %170, %167 : vector<4x1xf32>
    %172 = vector.broadcast %171 : vector<4x1xf32> to vector<4x128xf32>
    %173 = arith.mulf %172, %129 : vector<4x128xf32>
    %174 = arith.addf %169, %173 : vector<4x128xf32>
    %175 = vector.broadcast %167 : vector<4x1xf32> to vector<4x128xf32>
    %176 = arith.mulf %175, %164 : vector<4x128xf32>
    %cst_48 = arith.constant 1.000000e+00 : f32
    %177 = vector.broadcast %cst_48 : f32 to vector<4x1xf32>
    %178 = arith.subf %177, %167 : vector<4x1xf32>
    %179 = vector.broadcast %178 : vector<4x1xf32> to vector<4x128xf32>
    %180 = arith.mulf %179, %136 : vector<4x128xf32>
    %181 = arith.addf %176, %180 : vector<4x128xf32>
    %182 = vector.extract_strided_slice %42 {offsets = [0, 3, 0], sizes = [4, 1, 512], strides = [1, 1, 1]} : vector<4x8x512xf32> to vector<4x1x512xf32>
    %183 = vector.shape_cast %182 : vector<4x1x512xf32> to vector<4x512xf32>
    %184 = arith.truncf %174 : vector<4x128xf32> to vector<4x128xbf16>
    %cst_49 = arith.constant dense<0.000000e+00> : vector<4x512xf32>
    %185 = tpu.matmul %184, %43, %cst_49 {dimension_numbers = #tpu.dot_dimension_numbers<[1], [0], [0], [1], [0, 0, 1, 1], [], []>} : vector<4x128xbf16>, vector<128x512xbf16>, vector<4x512xf32> -> vector<4x512xf32>
    %186 = arith.addf %183, %185 : vector<4x512xf32>
    %187 = vector.extract_strided_slice %186 {offsets = [0, 0], sizes = [4, 128], strides = [1, 1]} : vector<4x512xf32> to vector<4x128xf32>
    %188 = arith.negf %187 : vector<4x128xf32>
    %189 = math.exp %188 : vector<4x128xf32>
    %cst_50 = arith.constant 1.000000e+00 : f32
    %190 = vector.broadcast %cst_50 : f32 to vector<4x128xf32>
    %191 = arith.addf %190, %189 : vector<4x128xf32>
    %192 = arith.divf %190, %191 : vector<4x128xf32>
    %193 = vector.extract_strided_slice %186 {offsets = [0, 128], sizes = [4, 128], strides = [1, 1]} : vector<4x512xf32> to vector<4x128xf32>
    %194 = arith.negf %193 : vector<4x128xf32>
    %195 = math.exp %194 : vector<4x128xf32>
    %cst_51 = arith.constant 1.000000e+00 : f32
    %196 = vector.broadcast %cst_51 : f32 to vector<4x128xf32>
    %197 = arith.addf %196, %195 : vector<4x128xf32>
    %198 = arith.divf %196, %197 : vector<4x128xf32>
    %199 = vector.extract_strided_slice %186 {offsets = [0, 256], sizes = [4, 128], strides = [1, 1]} : vector<4x512xf32> to vector<4x128xf32>
    %200 = math.tanh %199 : vector<4x128xf32>
    %201 = vector.extract_strided_slice %186 {offsets = [0, 384], sizes = [4, 128], strides = [1, 1]} : vector<4x512xf32> to vector<4x128xf32>
    %202 = arith.negf %201 : vector<4x128xf32>
    %203 = math.exp %202 : vector<4x128xf32>
    %cst_52 = arith.constant 1.000000e+00 : f32
    %204 = vector.broadcast %cst_52 : f32 to vector<4x128xf32>
    %205 = arith.addf %204, %203 : vector<4x128xf32>
    %206 = arith.divf %204, %205 : vector<4x128xf32>
    %207 = arith.mulf %198, %181 : vector<4x128xf32>
    %208 = arith.mulf %192, %200 : vector<4x128xf32>
    %209 = arith.addf %207, %208 : vector<4x128xf32>
    %210 = math.tanh %209 : vector<4x128xf32>
    %211 = arith.mulf %206, %210 : vector<4x128xf32>
    %212 = vector.extract_strided_slice %44 {offsets = [0, 3], sizes = [4, 1], strides = [1, 1]} : vector<4x8xf32> to vector<4x1xf32>
    %213 = vector.broadcast %212 : vector<4x1xf32> to vector<4x128xf32>
    %214 = arith.mulf %213, %211 : vector<4x128xf32>
    %cst_53 = arith.constant 1.000000e+00 : f32
    %215 = vector.broadcast %cst_53 : f32 to vector<4x1xf32>
    %216 = arith.subf %215, %212 : vector<4x1xf32>
    %217 = vector.broadcast %216 : vector<4x1xf32> to vector<4x128xf32>
    %218 = arith.mulf %217, %174 : vector<4x128xf32>
    %219 = arith.addf %214, %218 : vector<4x128xf32>
    %220 = vector.broadcast %212 : vector<4x1xf32> to vector<4x128xf32>
    %221 = arith.mulf %220, %209 : vector<4x128xf32>
    %cst_54 = arith.constant 1.000000e+00 : f32
    %222 = vector.broadcast %cst_54 : f32 to vector<4x1xf32>
    %223 = arith.subf %222, %212 : vector<4x1xf32>
    %224 = vector.broadcast %223 : vector<4x1xf32> to vector<4x128xf32>
    %225 = arith.mulf %224, %181 : vector<4x128xf32>
    %226 = arith.addf %221, %225 : vector<4x128xf32>
    %227 = vector.extract_strided_slice %42 {offsets = [0, 4, 0], sizes = [4, 1, 512], strides = [1, 1, 1]} : vector<4x8x512xf32> to vector<4x1x512xf32>
    %228 = vector.shape_cast %227 : vector<4x1x512xf32> to vector<4x512xf32>
    %229 = arith.truncf %219 : vector<4x128xf32> to vector<4x128xbf16>
    %cst_55 = arith.constant dense<0.000000e+00> : vector<4x512xf32>
    %230 = tpu.matmul %229, %43, %cst_55 {dimension_numbers = #tpu.dot_dimension_numbers<[1], [0], [0], [1], [0, 0, 1, 1], [], []>} : vector<4x128xbf16>, vector<128x512xbf16>, vector<4x512xf32> -> vector<4x512xf32>
    %231 = arith.addf %228, %230 : vector<4x512xf32>
    %232 = vector.extract_strided_slice %231 {offsets = [0, 0], sizes = [4, 128], strides = [1, 1]} : vector<4x512xf32> to vector<4x128xf32>
    %233 = arith.negf %232 : vector<4x128xf32>
    %234 = math.exp %233 : vector<4x128xf32>
    %cst_56 = arith.constant 1.000000e+00 : f32
    %235 = vector.broadcast %cst_56 : f32 to vector<4x128xf32>
    %236 = arith.addf %235, %234 : vector<4x128xf32>
    %237 = arith.divf %235, %236 : vector<4x128xf32>
    %238 = vector.extract_strided_slice %231 {offsets = [0, 128], sizes = [4, 128], strides = [1, 1]} : vector<4x512xf32> to vector<4x128xf32>
    %239 = arith.negf %238 : vector<4x128xf32>
    %240 = math.exp %239 : vector<4x128xf32>
    %cst_57 = arith.constant 1.000000e+00 : f32
    %241 = vector.broadcast %cst_57 : f32 to vector<4x128xf32>
    %242 = arith.addf %241, %240 : vector<4x128xf32>
    %243 = arith.divf %241, %242 : vector<4x128xf32>
    %244 = vector.extract_strided_slice %231 {offsets = [0, 256], sizes = [4, 128], strides = [1, 1]} : vector<4x512xf32> to vector<4x128xf32>
    %245 = math.tanh %244 : vector<4x128xf32>
    %246 = vector.extract_strided_slice %231 {offsets = [0, 384], sizes = [4, 128], strides = [1, 1]} : vector<4x512xf32> to vector<4x128xf32>
    %247 = arith.negf %246 : vector<4x128xf32>
    %248 = math.exp %247 : vector<4x128xf32>
    %cst_58 = arith.constant 1.000000e+00 : f32
    %249 = vector.broadcast %cst_58 : f32 to vector<4x128xf32>
    %250 = arith.addf %249, %248 : vector<4x128xf32>
    %251 = arith.divf %249, %250 : vector<4x128xf32>
    %252 = arith.mulf %243, %226 : vector<4x128xf32>
    %253 = arith.mulf %237, %245 : vector<4x128xf32>
    %254 = arith.addf %252, %253 : vector<4x128xf32>
    %255 = math.tanh %254 : vector<4x128xf32>
    %256 = arith.mulf %251, %255 : vector<4x128xf32>
    %257 = vector.extract_strided_slice %44 {offsets = [0, 4], sizes = [4, 1], strides = [1, 1]} : vector<4x8xf32> to vector<4x1xf32>
    %258 = vector.broadcast %257 : vector<4x1xf32> to vector<4x128xf32>
    %259 = arith.mulf %258, %256 : vector<4x128xf32>
    %cst_59 = arith.constant 1.000000e+00 : f32
    %260 = vector.broadcast %cst_59 : f32 to vector<4x1xf32>
    %261 = arith.subf %260, %257 : vector<4x1xf32>
    %262 = vector.broadcast %261 : vector<4x1xf32> to vector<4x128xf32>
    %263 = arith.mulf %262, %219 : vector<4x128xf32>
    %264 = arith.addf %259, %263 : vector<4x128xf32>
    %265 = vector.broadcast %257 : vector<4x1xf32> to vector<4x128xf32>
    %266 = arith.mulf %265, %254 : vector<4x128xf32>
    %cst_60 = arith.constant 1.000000e+00 : f32
    %267 = vector.broadcast %cst_60 : f32 to vector<4x1xf32>
    %268 = arith.subf %267, %257 : vector<4x1xf32>
    %269 = vector.broadcast %268 : vector<4x1xf32> to vector<4x128xf32>
    %270 = arith.mulf %269, %226 : vector<4x128xf32>
    %271 = arith.addf %266, %270 : vector<4x128xf32>
    %272 = vector.extract_strided_slice %42 {offsets = [0, 5, 0], sizes = [4, 1, 512], strides = [1, 1, 1]} : vector<4x8x512xf32> to vector<4x1x512xf32>
    %273 = vector.shape_cast %272 : vector<4x1x512xf32> to vector<4x512xf32>
    %274 = arith.truncf %264 : vector<4x128xf32> to vector<4x128xbf16>
    %cst_61 = arith.constant dense<0.000000e+00> : vector<4x512xf32>
    %275 = tpu.matmul %274, %43, %cst_61 {dimension_numbers = #tpu.dot_dimension_numbers<[1], [0], [0], [1], [0, 0, 1, 1], [], []>} : vector<4x128xbf16>, vector<128x512xbf16>, vector<4x512xf32> -> vector<4x512xf32>
    %276 = arith.addf %273, %275 : vector<4x512xf32>
    %277 = vector.extract_strided_slice %276 {offsets = [0, 0], sizes = [4, 128], strides = [1, 1]} : vector<4x512xf32> to vector<4x128xf32>
    %278 = arith.negf %277 : vector<4x128xf32>
    %279 = math.exp %278 : vector<4x128xf32>
    %cst_62 = arith.constant 1.000000e+00 : f32
    %280 = vector.broadcast %cst_62 : f32 to vector<4x128xf32>
    %281 = arith.addf %280, %279 : vector<4x128xf32>
    %282 = arith.divf %280, %281 : vector<4x128xf32>
    %283 = vector.extract_strided_slice %276 {offsets = [0, 128], sizes = [4, 128], strides = [1, 1]} : vector<4x512xf32> to vector<4x128xf32>
    %284 = arith.negf %283 : vector<4x128xf32>
    %285 = math.exp %284 : vector<4x128xf32>
    %cst_63 = arith.constant 1.000000e+00 : f32
    %286 = vector.broadcast %cst_63 : f32 to vector<4x128xf32>
    %287 = arith.addf %286, %285 : vector<4x128xf32>
    %288 = arith.divf %286, %287 : vector<4x128xf32>
    %289 = vector.extract_strided_slice %276 {offsets = [0, 256], sizes = [4, 128], strides = [1, 1]} : vector<4x512xf32> to vector<4x128xf32>
    %290 = math.tanh %289 : vector<4x128xf32>
    %291 = vector.extract_strided_slice %276 {offsets = [0, 384], sizes = [4, 128], strides = [1, 1]} : vector<4x512xf32> to vector<4x128xf32>
    %292 = arith.negf %291 : vector<4x128xf32>
    %293 = math.exp %292 : vector<4x128xf32>
    %cst_64 = arith.constant 1.000000e+00 : f32
    %294 = vector.broadcast %cst_64 : f32 to vector<4x128xf32>
    %295 = arith.addf %294, %293 : vector<4x128xf32>
    %296 = arith.divf %294, %295 : vector<4x128xf32>
    %297 = arith.mulf %288, %271 : vector<4x128xf32>
    %298 = arith.mulf %282, %290 : vector<4x128xf32>
    %299 = arith.addf %297, %298 : vector<4x128xf32>
    %300 = math.tanh %299 : vector<4x128xf32>
    %301 = arith.mulf %296, %300 : vector<4x128xf32>
    %302 = vector.extract_strided_slice %44 {offsets = [0, 5], sizes = [4, 1], strides = [1, 1]} : vector<4x8xf32> to vector<4x1xf32>
    %303 = vector.broadcast %302 : vector<4x1xf32> to vector<4x128xf32>
    %304 = arith.mulf %303, %301 : vector<4x128xf32>
    %cst_65 = arith.constant 1.000000e+00 : f32
    %305 = vector.broadcast %cst_65 : f32 to vector<4x1xf32>
    %306 = arith.subf %305, %302 : vector<4x1xf32>
    %307 = vector.broadcast %306 : vector<4x1xf32> to vector<4x128xf32>
    %308 = arith.mulf %307, %264 : vector<4x128xf32>
    %309 = arith.addf %304, %308 : vector<4x128xf32>
    %310 = vector.broadcast %302 : vector<4x1xf32> to vector<4x128xf32>
    %311 = arith.mulf %310, %299 : vector<4x128xf32>
    %cst_66 = arith.constant 1.000000e+00 : f32
    %312 = vector.broadcast %cst_66 : f32 to vector<4x1xf32>
    %313 = arith.subf %312, %302 : vector<4x1xf32>
    %314 = vector.broadcast %313 : vector<4x1xf32> to vector<4x128xf32>
    %315 = arith.mulf %314, %271 : vector<4x128xf32>
    %316 = arith.addf %311, %315 : vector<4x128xf32>
    %317 = vector.extract_strided_slice %42 {offsets = [0, 6, 0], sizes = [4, 1, 512], strides = [1, 1, 1]} : vector<4x8x512xf32> to vector<4x1x512xf32>
    %318 = vector.shape_cast %317 : vector<4x1x512xf32> to vector<4x512xf32>
    %319 = arith.truncf %309 : vector<4x128xf32> to vector<4x128xbf16>
    %cst_67 = arith.constant dense<0.000000e+00> : vector<4x512xf32>
    %320 = tpu.matmul %319, %43, %cst_67 {dimension_numbers = #tpu.dot_dimension_numbers<[1], [0], [0], [1], [0, 0, 1, 1], [], []>} : vector<4x128xbf16>, vector<128x512xbf16>, vector<4x512xf32> -> vector<4x512xf32>
    %321 = arith.addf %318, %320 : vector<4x512xf32>
    %322 = vector.extract_strided_slice %321 {offsets = [0, 0], sizes = [4, 128], strides = [1, 1]} : vector<4x512xf32> to vector<4x128xf32>
    %323 = arith.negf %322 : vector<4x128xf32>
    %324 = math.exp %323 : vector<4x128xf32>
    %cst_68 = arith.constant 1.000000e+00 : f32
    %325 = vector.broadcast %cst_68 : f32 to vector<4x128xf32>
    %326 = arith.addf %325, %324 : vector<4x128xf32>
    %327 = arith.divf %325, %326 : vector<4x128xf32>
    %328 = vector.extract_strided_slice %321 {offsets = [0, 128], sizes = [4, 128], strides = [1, 1]} : vector<4x512xf32> to vector<4x128xf32>
    %329 = arith.negf %328 : vector<4x128xf32>
    %330 = math.exp %329 : vector<4x128xf32>
    %cst_69 = arith.constant 1.000000e+00 : f32
    %331 = vector.broadcast %cst_69 : f32 to vector<4x128xf32>
    %332 = arith.addf %331, %330 : vector<4x128xf32>
    %333 = arith.divf %331, %332 : vector<4x128xf32>
    %334 = vector.extract_strided_slice %321 {offsets = [0, 256], sizes = [4, 128], strides = [1, 1]} : vector<4x512xf32> to vector<4x128xf32>
    %335 = math.tanh %334 : vector<4x128xf32>
    %336 = vector.extract_strided_slice %321 {offsets = [0, 384], sizes = [4, 128], strides = [1, 1]} : vector<4x512xf32> to vector<4x128xf32>
    %337 = arith.negf %336 : vector<4x128xf32>
    %338 = math.exp %337 : vector<4x128xf32>
    %cst_70 = arith.constant 1.000000e+00 : f32
    %339 = vector.broadcast %cst_70 : f32 to vector<4x128xf32>
    %340 = arith.addf %339, %338 : vector<4x128xf32>
    %341 = arith.divf %339, %340 : vector<4x128xf32>
    %342 = arith.mulf %333, %316 : vector<4x128xf32>
    %343 = arith.mulf %327, %335 : vector<4x128xf32>
    %344 = arith.addf %342, %343 : vector<4x128xf32>
    %345 = math.tanh %344 : vector<4x128xf32>
    %346 = arith.mulf %341, %345 : vector<4x128xf32>
    %347 = vector.extract_strided_slice %44 {offsets = [0, 6], sizes = [4, 1], strides = [1, 1]} : vector<4x8xf32> to vector<4x1xf32>
    %348 = vector.broadcast %347 : vector<4x1xf32> to vector<4x128xf32>
    %349 = arith.mulf %348, %346 : vector<4x128xf32>
    %cst_71 = arith.constant 1.000000e+00 : f32
    %350 = vector.broadcast %cst_71 : f32 to vector<4x1xf32>
    %351 = arith.subf %350, %347 : vector<4x1xf32>
    %352 = vector.broadcast %351 : vector<4x1xf32> to vector<4x128xf32>
    %353 = arith.mulf %352, %309 : vector<4x128xf32>
    %354 = arith.addf %349, %353 : vector<4x128xf32>
    %355 = vector.broadcast %347 : vector<4x1xf32> to vector<4x128xf32>
    %356 = arith.mulf %355, %344 : vector<4x128xf32>
    %cst_72 = arith.constant 1.000000e+00 : f32
    %357 = vector.broadcast %cst_72 : f32 to vector<4x1xf32>
    %358 = arith.subf %357, %347 : vector<4x1xf32>
    %359 = vector.broadcast %358 : vector<4x1xf32> to vector<4x128xf32>
    %360 = arith.mulf %359, %316 : vector<4x128xf32>
    %361 = arith.addf %356, %360 : vector<4x128xf32>
    %362 = vector.extract_strided_slice %42 {offsets = [0, 7, 0], sizes = [4, 1, 512], strides = [1, 1, 1]} : vector<4x8x512xf32> to vector<4x1x512xf32>
    %363 = vector.shape_cast %362 : vector<4x1x512xf32> to vector<4x512xf32>
    %364 = arith.truncf %354 : vector<4x128xf32> to vector<4x128xbf16>
    %cst_73 = arith.constant dense<0.000000e+00> : vector<4x512xf32>
    %365 = tpu.matmul %364, %43, %cst_73 {dimension_numbers = #tpu.dot_dimension_numbers<[1], [0], [0], [1], [0, 0, 1, 1], [], []>} : vector<4x128xbf16>, vector<128x512xbf16>, vector<4x512xf32> -> vector<4x512xf32>
    %366 = arith.addf %363, %365 : vector<4x512xf32>
    %367 = vector.extract_strided_slice %366 {offsets = [0, 0], sizes = [4, 128], strides = [1, 1]} : vector<4x512xf32> to vector<4x128xf32>
    %368 = arith.negf %367 : vector<4x128xf32>
    %369 = math.exp %368 : vector<4x128xf32>
    %cst_74 = arith.constant 1.000000e+00 : f32
    %370 = vector.broadcast %cst_74 : f32 to vector<4x128xf32>
    %371 = arith.addf %370, %369 : vector<4x128xf32>
    %372 = arith.divf %370, %371 : vector<4x128xf32>
    %373 = vector.extract_strided_slice %366 {offsets = [0, 128], sizes = [4, 128], strides = [1, 1]} : vector<4x512xf32> to vector<4x128xf32>
    %374 = arith.negf %373 : vector<4x128xf32>
    %375 = math.exp %374 : vector<4x128xf32>
    %cst_75 = arith.constant 1.000000e+00 : f32
    %376 = vector.broadcast %cst_75 : f32 to vector<4x128xf32>
    %377 = arith.addf %376, %375 : vector<4x128xf32>
    %378 = arith.divf %376, %377 : vector<4x128xf32>
    %379 = vector.extract_strided_slice %366 {offsets = [0, 256], sizes = [4, 128], strides = [1, 1]} : vector<4x512xf32> to vector<4x128xf32>
    %380 = math.tanh %379 : vector<4x128xf32>
    %381 = vector.extract_strided_slice %366 {offsets = [0, 384], sizes = [4, 128], strides = [1, 1]} : vector<4x512xf32> to vector<4x128xf32>
    %382 = arith.negf %381 : vector<4x128xf32>
    %383 = math.exp %382 : vector<4x128xf32>
    %cst_76 = arith.constant 1.000000e+00 : f32
    %384 = vector.broadcast %cst_76 : f32 to vector<4x128xf32>
    %385 = arith.addf %384, %383 : vector<4x128xf32>
    %386 = arith.divf %384, %385 : vector<4x128xf32>
    %387 = arith.mulf %378, %361 : vector<4x128xf32>
    %388 = arith.mulf %372, %380 : vector<4x128xf32>
    %389 = arith.addf %387, %388 : vector<4x128xf32>
    %390 = math.tanh %389 : vector<4x128xf32>
    %391 = arith.mulf %386, %390 : vector<4x128xf32>
    %392 = vector.extract_strided_slice %44 {offsets = [0, 7], sizes = [4, 1], strides = [1, 1]} : vector<4x8xf32> to vector<4x1xf32>
    %393 = vector.broadcast %392 : vector<4x1xf32> to vector<4x128xf32>
    %394 = arith.mulf %393, %391 : vector<4x128xf32>
    %cst_77 = arith.constant 1.000000e+00 : f32
    %395 = vector.broadcast %cst_77 : f32 to vector<4x1xf32>
    %396 = arith.subf %395, %392 : vector<4x1xf32>
    %397 = vector.broadcast %396 : vector<4x1xf32> to vector<4x128xf32>
    %398 = arith.mulf %397, %354 : vector<4x128xf32>
    %399 = arith.addf %394, %398 : vector<4x128xf32>
    %400 = vector.extract_strided_slice %399 {offsets = [0, 0], sizes = [2, 128], strides = [1, 1]} : vector<4x128xf32> to vector<2x128xf32>
    %401 = vector.extract_strided_slice %399 {offsets = [2, 0], sizes = [2, 128], strides = [1, 1]} : vector<4x128xf32> to vector<2x128xf32>
    %402 = arith.mulf %34, %34 : vector<2x128xf32>
    %cst_78 = arith.constant dense<0.000000e+00> : vector<2xf32>
    %403 = vector.multi_reduction <add>, %402, %cst_78 [1] : vector<2x128xf32> to vector<2xf32>
    %404 = vector.shape_cast %403 : vector<2xf32> to vector<2x1xf32>
    %405 = math.sqrt %404 : vector<2x1xf32>
    %cst_79 = arith.constant 9.99999993E-9 : f32
    %406 = vector.broadcast %cst_79 : f32 to vector<2x1xf32>
    %407 = arith.maximumf %405, %406 : vector<2x1xf32>
    %408 = arith.mulf %400, %400 : vector<2x128xf32>
    %cst_80 = arith.constant dense<0.000000e+00> : vector<2xf32>
    %409 = vector.multi_reduction <add>, %408, %cst_80 [1] : vector<2x128xf32> to vector<2xf32>
    %410 = vector.shape_cast %409 : vector<2xf32> to vector<2x1xf32>
    %411 = math.sqrt %410 : vector<2x1xf32>
    %cst_81 = arith.constant 9.99999993E-9 : f32
    %412 = vector.broadcast %cst_81 : f32 to vector<2x1xf32>
    %413 = arith.maximumf %411, %412 : vector<2x1xf32>
    %414 = arith.mulf %401, %401 : vector<2x128xf32>
    %cst_82 = arith.constant dense<0.000000e+00> : vector<2xf32>
    %415 = vector.multi_reduction <add>, %414, %cst_82 [1] : vector<2x128xf32> to vector<2xf32>
    %416 = vector.shape_cast %415 : vector<2xf32> to vector<2x1xf32>
    %417 = math.sqrt %416 : vector<2x1xf32>
    %cst_83 = arith.constant 9.99999993E-9 : f32
    %418 = vector.broadcast %cst_83 : f32 to vector<2x1xf32>
    %419 = arith.maximumf %417, %418 : vector<2x1xf32>
    %420 = arith.mulf %34, %400 : vector<2x128xf32>
    %cst_84 = arith.constant dense<0.000000e+00> : vector<2xf32>
    %421 = vector.multi_reduction <add>, %420, %cst_84 [1] : vector<2x128xf32> to vector<2xf32>
    %422 = vector.shape_cast %421 : vector<2xf32> to vector<2x1xf32>
    %423 = arith.mulf %407, %413 : vector<2x1xf32>
    %424 = arith.divf %422, %423 : vector<2x1xf32>
    %425 = arith.mulf %34, %401 : vector<2x128xf32>
    %cst_85 = arith.constant dense<0.000000e+00> : vector<2xf32>
    %426 = vector.multi_reduction <add>, %425, %cst_85 [1] : vector<2x128xf32> to vector<2xf32>
    %427 = vector.shape_cast %426 : vector<2xf32> to vector<2x1xf32>
    %428 = arith.mulf %407, %419 : vector<2x1xf32>
    %429 = arith.divf %427, %428 : vector<2x1xf32>
    %cst_86 = arith.constant 6.000000e-01 : f32
    %430 = vector.broadcast %cst_86 : f32 to vector<2x1xf32>
    %431 = arith.subf %430, %424 : vector<2x1xf32>
    %432 = arith.addf %431, %429 : vector<2x1xf32>
    %cst_87 = arith.constant 9.99999997E-7 : f32
    %433 = vector.broadcast %cst_87 : f32 to vector<2x1xf32>
    %434 = arith.maximumf %432, %433 : vector<2x1xf32>
    %435 = vector.shape_cast %434 : vector<2x1xf32> to vector<1x2x1xf32>
    %cst_88 = arith.constant dense<0.000000e+00> : vector<1xf32>
    %436 = vector.multi_reduction <add>, %435, %cst_88 [1, 2] : vector<1x2x1xf32> to vector<1xf32>
    %437 = vector.shape_cast %436 : vector<1xf32> to vector<1x1x1xf32>
    %438 = vector.extract %437[0, 0, 0] : f32 from vector<1x1x1xf32>
    %439 = vector.broadcast %438 : f32 to vector<1x1xf32>
    %cst_89 = arith.constant 5.000000e-01 : f32
    %440 = vector.broadcast %cst_89 : f32 to vector<1x1xf32>
    %441 = arith.mulf %439, %440 : vector<1x1xf32>
    %c0_90 = arith.constant 0 : index
    %c0_91 = arith.constant 0 : index
    %442 = vector.load %arg10[%c0_90, %c0_91] : memref<1x1xf32, #tpu.memory_space<vmem>>, vector<1x1xf32>
    tpu.vector_store %arg10[%c0_90, %c0_91], %441 {strides = array<i32>} : memref<1x1xf32, #tpu.memory_space<vmem>>, vector<1x1xf32>,
    return
  }
}

</mosaic_0001>

<bundles_post_ra>
// kernel: joint_embeder_forward.1
= control target key start
LH: loop header
LB: loop body
LE: loop exit
PB: predicated region body
PF: predicated region fallthrough
CT: control target
= control target key end

     0   :  { %15 = vsyncpa [#allocation3], 0  ;;  %s5254_s0 = inlined_call_operand.vmem [shape: bf16[2,16,128], index: 0, kind: input, shape index: {}]   ;;  %s5255_s1 = inlined_call_operand.vmem [shape: f32[2,16], index: 1, kind: input, shape index: {}]   ;;  %s5256_s2 = inlined_call_operand.vmem [shape: bf16[4,8,128], index: 2, kind: input, shape index: {}]   ;;  %s5257_s3 = inlined_call_operand.vmem [shape: f32[4,8], index: 3, kind: input, shape index: {}]   ;;  %s5258_s4 = inlined_call_operand.vmem [shape: bf16[128,128], index: 4, kind: input, shape index: {}]   ;;  %s5259_s5 = inlined_call_operand.vmem [shape: f32[1,128], index: 5, kind: input, shape index: {}]   ;;  %s5260_s6 = inlined_call_operand.vmem [shape: f32[1,128], index: 6, kind: input, shape index: {}]   ;;  %s5261_s7 = inlined_call_operand.vmem [shape: bf16[128,512], index: 7, kind: input, shape index: {}]   ;;  %s5262_s8 = inlined_call_operand.hbm [shape: bf16[128,512], index: 8, kind: input, shape index: {}]   ;;  %s5263_s9 = inlined_call_operand.vmem [shape: f32[1,512], index: 9, kind: input, shape index: {}]   ;;  %s5264_s10 = inlined_call_operand.hbm [shape: f32[1,1], index: 10, kind: output, shape index: {}]  }
   0x1   :  { %16 = vsyncpa [#allocation4], 0  ;;  %s4099_s13 = smov [#allocation2]   ;;  %s4051_s17 = scalar_lea.hbm %s5262_s8, 4096 }
   0x2   :  { %s38_s14 = sshll.u32 %s4099_s13, 4  ;;  %p4052_p0 = scmp.ne.s32.totalorder %s5262_s8, %s4051_s17  ;;  %s39_s14 = int_to_ptr.vmem [resolvable:$true] %s38_s14 }
   0x3   :  { %p4055_p1 = scmp.lt.u32.totalorder %s4051_s17, %s5262_s8 }
   0x5   :  { %p4057_p2 = pnand %p4055_p1, %p4052_p0 }
   0x7   :  { %4060 = shalt.err (!%p4057_p2)
}
   0x8   :  { %s4061_s22 = scalar_lea.vmem %s39_s14, 4096  ;;  %p4066_p4 = scmp.lt.s32.totalorder %s39_s14, %s39_s14 }
   0x9   :  { %p4062_p3 = scmp.ne.s32.totalorder %s39_s14, %s4061_s22  ;;  %p4067_p5 = scmp.lt.s32.totalorder %s4061_s22, %s4061_s22 }
   0xb   :  { %p4068_p6 = por %p4067_p5, %p4066_p4 }
   0xd   :  { %p4069_p7 = pnand %p4068_p6, %p4062_p3 }
   0xf   :  { %4072 = shalt.err (!%p4069_p7)
}
  0x10   :  { %s4100_s23 = smov 256   ;;  %s4101_s24 = smov 16  }
  0x11   :  { %44 = dma.hbm_to_vmem [thread:$0]  %s5262_s8, 4096, %s39_s14, [#allocation3], %s4100_s23, %s4100_s23, %s4101_s24  }
  0x12   :  { %4095 = dma.done.wait [#allocation3], 4096  }
  0x13   :  { %4096 = vsyncadd [#allocation3], 4294963200  ;;  %v5268_v0 = vmov 0   ;;  %v4103_v1 = vmov 1   ;;  %v3344_v2 = vld [vmem:[%s5258_s4] sm:$0xff]   ;;  %v3348_v5 = vld [vmem:[%s5258_s4 + $0x8] sm:$0xff]  }
  0x14   :  { %558 = vmatprep.mubr.bf16.mxu1 %v5268_v0  ;;  %3332 = vset.pattern.permute.xlu1 %v4103_v1  ;;  %v3345_v3 = vld [vmem:[%s5261_s7 + $0x4] ss:$16 sps:$4 sm:$0xff]   ;;  %v3347_v4 = vld [vmem:[%s5261_s7] ss:$16 sps:$4 sm:$0xff]   ;;  %v3356_v11 = vld [vmem:[%s5258_s4 + $0x18] sm:$0xff]   ;;  %vm238_vm0 = vcmask 1041409  }
  0x15   :  { %3331 = vset.pattern.permute.xlu0 %v5268_v0  ;;  %3297 = vmatprep.subr.bf16.mxu0 %v3344_v2  ;;  %v3349_v6 = vld [vmem:[%s5261_s7 + $0x24] ss:$16 sps:$4 sm:$0xff]   ;;  %v3351_v7 = vld [vmem:[%s5261_s7 + $0x20] ss:$16 sps:$4 sm:$0xff]   ;;  %v3364_v17 = vld [vmem:[%s5258_s4 + $0x28] sm:$0xff]   ;;  %vm1063_vm1 = vcmask 1042434  }
  0x16   :  { %526 = vmatprep.subr.bf16.mxu1 %v3345_v3  ;;  %3298 = vmatpush3.bf16.msra.mxu0 %v3344_v2  ;;  %v3352_v8 = vld [vmem:[%s5258_s4 + $0x10] sm:$0xff]   ;;  %v3360_v14 = vld [vmem:[%s5258_s4 + $0x20] sm:$0xff]   ;;  %v3372_v24 = vld [vmem:[%s5258_s4 + $0x38] sm:$0xff]   ;;  %v4104_v3 = vmov 2   ;;  %vm1066_vm2 = vcmask 1043459   ;;  %vm227_vm3 = vcmask 130112  }
  0x17   :  { %527 = vmatpush1.bf16.msra.mxu1 %v3347_v4  ;;  %3299 = vmatprep.subr.bf16.mxu0 %v3348_v5  ;;  %v3353_v9 = vld [vmem:[%s5261_s7 + $0x44] ss:$16 sps:$4 sm:$0xff]   ;;  %v3355_v10 = vld [vmem:[%s5261_s7 + $0x40] ss:$16 sps:$4 sm:$0xff]   ;;  %v3380_v27 = vld [vmem:[%s5261_s7 + $0xc] ss:$16 sps:$4 sm:$0xff]  }
  0x18   :  { %528 = vmatprep.subr.bf16.mxu1 %v3349_v6  ;;  %v3357_v12 = vld [vmem:[%s5261_s7 + $0x64] ss:$16 sps:$4 sm:$0xff]   ;;  %v3359_v13 = vld [vmem:[%s5261_s7 + $0x60] ss:$16 sps:$4 sm:$0xff]   ;;  %v3377_v28 = vld [vmem:[%s5254_s0 + $0x8] sm:$0xff]   ;;  %vm242_vm5 = vcmask 123904  }
  0x19   :  { %v3361_v15 = vld [vmem:[%s5261_s7 + $0x84] ss:$16 sps:$4 sm:$0xff]   ;;  %v3363_v16 = vld [vmem:[%s5261_s7 + $0x80] ss:$16 sps:$4 sm:$0xff]   ;;  %v3378_v30 = vld [vmem:[%s5261_s7 + $0x8] ss:$16 sps:$4 sm:$0xff]  }
  0x1a   :  { %3300 = vmatpush3.bf16.msra.mxu0 %v3348_v5  ;;  %v3365_v18 = vld [vmem:[%s5261_s7 + $0xa4] ss:$16 sps:$4 sm:$0xff]   ;;  %v3367_v19 = vld [vmem:[%s5261_s7 + $0xa0] ss:$16 sps:$4 sm:$0xff]   ;;  %v3387_v33 = vld [vmem:[%s5261_s7 + $0x2c] ss:$16 sps:$4 sm:$0xff]  }
  0x1b   :  { %529 = vmatpush1.bf16.msra.mxu1 %v3351_v7  ;;  %3301 = vmatprep.subr.bf16.mxu0 %v3352_v8  ;;  %v3376_v20 = vld [vmem:[%s5254_s0] sm:$0xff]   ;;  %v3368_v21 = vld [vmem:[%s5258_s4 + $0x30] sm:$0xff]   ;;  %v3385_v35 = vld [vmem:[%s5261_s7 + $0x28] ss:$16 sps:$4 sm:$0xff]   ;;  %v4105_v7 = vmov 3   ;;  %vm3007_vm6 = vcmask 1041408  }
  0x1c   :  { %530 = vmatprep.subr.bf16.mxu1 %v3353_v9  ;;  %v3369_v22 = vld [vmem:[%s5261_s7 + $0xc4] ss:$16 sps:$4 sm:$0xff]   ;;  %3313 = vmatprep.mubr.bf16.mxu0 %v3376_v20  ;;  %v3371_v23 = vld [vmem:[%s5261_s7 + $0xc0] ss:$16 sps:$4 sm:$0xff]   ;;  %v3393_v37 = vld [vmem:[%s5261_s7 + $0x4c] ss:$16 sps:$4 sm:$0xff]  }
  0x1d   :  { %v3373_v25 = vld [vmem:[%s5261_s7 + $0xe4] ss:$16 sps:$4 sm:$0xff]   ;;  %v3375_v26 = vld [vmem:[%s5261_s7 + $0xe0] ss:$16 sps:$4 sm:$0xff]   ;;  %v3391_v39 = vld [vmem:[%s5261_s7 + $0x48] ss:$16 sps:$4 sm:$0xff]  }
  0x1e   :  { %3302 = vmatpush3.bf16.msra.mxu0 %v3352_v8  ;;  %v4261_v29 = vld [vmem:[#allocation2 + $0x4] ss:$16 sps:$4 sm:$0xff]   ;;  %v4271_v32 = vld [vmem:[#allocation2] ss:$16 sps:$4 sm:$0xff]   ;;  %v4302_v41 = vld [vmem:[%s5256_s2 + $0x8] sm:$0xff]   ;;  %vm3031_vm7 = vcmask 1043458  }
  0x1f   :  { %531 = vmatpush1.bf16.msra.mxu1 %v3355_v10  ;;  %3303 = vmatprep.subr.bf16.mxu0 %v3356_v11  ;;  %5357 = vst [vmem:[#allocation8_spill] sm:$0xff] %v4261_v29  ;;  %v4269_v31 = vld [vmem:[%s5256_s2] sm:$0xff]   ;;  %v3399_v42 = vld [vmem:[%s5261_s7 + $0x6c] ss:$16 sps:$4 sm:$0xff]   ;;  %v3397_v44 = vld [vmem:[%s5261_s7 + $0x68] ss:$16 sps:$4 sm:$0xff]  }
  0x20   :  { %532 = vmatprep.subr.bf16.mxu1 %v3357_v12  ;;  %v4277_v34 = vld [vmem:[#allocation2 + $0x24] ss:$16 sps:$4 sm:$0xff]   ;;  %v4283_v36 = vld [vmem:[#allocation2 + $0x20] ss:$16 sps:$4 sm:$0xff]   ;;  %v3405_v46 = vld [vmem:[%s5261_s7 + $0x8c] ss:$16 sps:$4 sm:$0xff]  }
  0x21   :  { %v4290_v38 = vld [vmem:[#allocation2 + $0x44] ss:$16 sps:$4 sm:$0xff]   ;;  %v4297_v40 = vld [vmem:[#allocation2 + $0x40] ss:$16 sps:$4 sm:$0xff]   ;;  %v3403_v48 = vld [vmem:[%s5261_s7 + $0x88] ss:$16 sps:$4 sm:$0xff]  }
  0x22   :  { %3304 = vmatpush3.bf16.msra.mxu0 %v3356_v11  ;;  %v4309_v43 = vld [vmem:[#allocation2 + $0x64] ss:$16 sps:$4 sm:$0xff]   ;;  %v4314_v45 = vld [vmem:[#allocation2 + $0x60] ss:$16 sps:$4 sm:$0xff]   ;;  %v3411_v50 = vld [vmem:[%s5261_s7 + $0xac] ss:$16 sps:$4 sm:$0xff]  }
  0x23   :  { %533 = vmatpush1.bf16.msra.mxu1 %v3359_v13  ;;  %3305 = vmatprep.subr.bf16.mxu0 %v3360_v14  ;;  %v4322_v47 = vld [vmem:[#allocation2 + $0x84] ss:$16 sps:$4 sm:$0xff]   ;;  %v4328_v49 = vld [vmem:[#allocation2 + $0x80] ss:$16 sps:$4 sm:$0xff]   ;;  %v3409_v52 = vld [vmem:[%s5261_s7 + $0xa8] ss:$16 sps:$4 sm:$0xff]  }
  0x24   :  { %534 = vmatprep.subr.bf16.mxu1 %v3361_v15  ;;  %v4335_v51 = vld [vmem:[#allocation2 + $0xa4] ss:$16 sps:$4 sm:$0xff]   ;;  %v4340_v53 = vld [vmem:[#allocation2 + $0xa0] ss:$16 sps:$4 sm:$0xff]   ;;  %v3418_v54 = vld [vmem:[%s5261_s7 + $0xcc] ss:$16 sps:$4 sm:$0xff]  }
  0x25   :  { %v4347_v55 = vld [vmem:[#allocation2 + $0xc4] ss:$16 sps:$4 sm:$0xff]   ;;  %v4352_v56 = vld [vmem:[%s5257_s3] sm:$0xf]  ;;  %v3416_v57 = vld [vmem:[%s5261_s7 + $0xc8] ss:$16 sps:$4 sm:$0xff]  }
  0x26   :  { %3306 = vmatpush3.bf16.msra.mxu0 %v3360_v14  ;;  %1327 = vperm.xlu1 %3332, %v4352_v56   ;;  %v4359_v58 = vsub.f32 1.0, %v4352_v56  ;;  %v4362_v59 = vld [vmem:[#allocation2 + $0xc0] ss:$16 sps:$4 sm:$0xff]   ;;  %v3424_v60 = vld [vmem:[%s5261_s7 + $0xec] ss:$16 sps:$4 sm:$0xff]   ;;  %v4106_v10 = vmov 4  }
  0x27   :  { %535 = vmatpush1.bf16.msra.mxu1 %v3363_v16  ;;  %3307 = vmatprep.subr.bf16.mxu0 %v3364_v17  ;;  %v4368_v61 = vld [vmem:[#allocation2 + $0xe4] ss:$16 sps:$4 sm:$0xff]   ;;  %v3422_v62 = vld [vmem:[%s5261_s7 + $0xe8] ss:$16 sps:$4 sm:$0xff]   ;;  %v4376_v63 = vld [vmem:[#allocation2 + $0xe0] ss:$16 sps:$4 sm:$0xff]  }
  0x28   :  { %536 = vmatprep.subr.bf16.mxu1 %v3365_v18  ;;  %5358 = vst [vmem:[#allocation9_spill] sm:$0xff] %v4359_v58  ;;  %1053 = vperm.xlu0 %3331, %v4352_v56   ;;  %v4378_v1 = vld [vmem:[#allocation2 + $0xc] ss:$16 sps:$4 sm:$0xff]   ;;  %v4382_v2 = vld [vmem:[#allocation2 + $0x8] ss:$16 sps:$4 sm:$0xff]   ;;  %v4107_v13 = vmov 5  }
  0x29   :  { %5359 = vst [vmem:[#allocation10_spill] sm:$0xff] %v4378_v1  ;;  %v4386_v4 = vld [vmem:[#allocation2 + $0x2c] ss:$16 sps:$4 sm:$0xff]   ;;  %v4393_v5 = vld [vmem:[#allocation2 + $0x28] ss:$16 sps:$4 sm:$0xff]   ;;  %v4108_v16 = vmov 6  }
  0x2a   :  { %3308 = vmatpush3.bf16.msra.mxu0 %v3364_v17  ;;  %1343 = vperm.xlu1 %3332, %v4359_v58   ;;  %v4396_v6 = vld [vmem:[#allocation2 + $0x4c] ss:$16 sps:$4 sm:$0xff]   ;;  %v4402_v8 = vld [vmem:[#allocation2 + $0x48] ss:$16 sps:$4 sm:$0xff]   ;;  %vm3083_vm14 = vcmask 1024   ;;  %vm3096_vm15 = vcmask 0  }
  0x2b   :  { %537 = vmatpush1.bf16.msra.mxu1 %v3367_v19  ;;  %3309 = vmatprep.subr.bf16.mxu0 %v3368_v21  ;;  %v4406_v9 = vld [vmem:[#allocation2 + $0x6c] ss:$16 sps:$4 sm:$0xff]   ;;  %v4413_v11 = vld [vmem:[#allocation2 + $0x68] ss:$16 sps:$4 sm:$0xff]  }
  0x2c   :  { %538 = vmatprep.subr.bf16.mxu1 %v3369_v22  ;;  %1073 = vperm.xlu0 %3331, %v4359_v58   ;;  %v4417_v12 = vld [vmem:[#allocation2 + $0x8c] ss:$16 sps:$4 sm:$0xff]   ;;  %v4424_v14 = vld [vmem:[#allocation2 + $0x88] ss:$16 sps:$4 sm:$0xff]   ;;  %v3113_v22 = vld [vmem:[%s5259_s5] ss:$0 sm:$0xff] }
  0x2d   :  { %v4427_v15 = vld [vmem:[#allocation2 + $0xac] ss:$16 sps:$4 sm:$0xff]   ;;  %v4433_v17 = vld [vmem:[#allocation2 + $0xa8] ss:$16 sps:$4 sm:$0xff]  }
  0x2e   :  { %3310 = vmatpush3.bf16.msra.mxu0 %v3368_v21  ;;  %3334 = vset.pattern.permute.xlu1 %v4104_v3  ;;  %v4437_v18 = vld [vmem:[#allocation2 + $0xcc] ss:$16 sps:$4 sm:$0xff]   ;;  %v4443_v19 = vld [vmem:[#allocation2 + $0xc8] ss:$16 sps:$4 sm:$0xff]  }
  0x2f   :  { %539 = vmatpush1.bf16.msra.mxu1 %v3371_v23  ;;  %3311 = vmatprep.subr.bf16.mxu0 %v3372_v24  ;;  %v4446_v20 = vld [vmem:[#allocation2 + $0xec] ss:$16 sps:$4 sm:$0xff]   ;;  %v4452_v21 = vld [vmem:[#allocation2 + $0xe8] ss:$16 sps:$4 sm:$0xff]  }
  0x30   :  { %540 = vmatprep.subr.bf16.mxu1 %v3373_v25  ;;  %1614 = vperm.xlu1 %3334, %v4359_v58   ;;  %5360 = vst [vmem:[#allocation11_spill] sm:$0xff] %v4452_v21 }
  0x31   :  { %3333 = vset.pattern.permute.xlu0 %v4104_v3 }
  0x32   :  { %3312 = vmatpush3.bf16.msra.mxu0 %v3372_v24  ;;  %1598 = vperm.xlu0 %3333, %v4352_v56  }
  0x33   :  { %541 = vmatpush1.bf16.msra.mxu1 %v3375_v26  ;;  %579 = vmatprep.subr.bf16.mxu0 %v3380_v27 }
  0x34   :  { %825 = vmatprep.subr.bf16.mxu1 %v4261_v29  ;;  %3335 = vset.pattern.permute.xlu1 %v4105_v7 }
  0x35   :  { %3314 = vmatmul.mubr.bf16.vlgmr.msra.gmra.mrb[0].mxu0 %v3377_v28  ;;  %1869 = vperm.xlu1 %3335, %v4352_v56  }
  0x36   :  { %559 = vmatmul.mubr.bf16.vlgmr.msra.gmra.mrb[0].mxu1 %v4269_v31  ;;  %580 = vmatpush1.bf16.msra.mxu0 %v3378_v30 }
  0x37   :  { %826 = vmatpush1.bf16.msra.mxu1 %v4271_v32  ;;  %581 = vmatprep.subr.bf16.mxu0 %v3387_v33 }
  0x38   :  { %827 = vmatprep.subr.bf16.mxu1 %v4277_v34  ;;  %568 = vmatprep.mubr.bf16.mxu1 %v5268_v0 }
  0x39   :  { %611 = vmatprep.mubr.bf16.mxu0 %v5268_v0  ;;  %3336 = vset.pattern.permute.xlu0 %v4105_v7 }
  0x3a   :  { %582 = vmatpush1.bf16.msra.mxu0 %v3385_v35  ;;  %1885 = vperm.xlu0 %3336, %v4359_v58  }
  0x3b   :  { %828 = vmatpush1.bf16.msra.mxu1 %v4283_v36  ;;  %583 = vmatprep.subr.bf16.mxu0 %v3393_v37 }
  0x3c   :  { %829 = vmatprep.subr.bf16.mxu1 %v4290_v38  ;;  %3337 = vset.pattern.permute.xlu1 %v4106_v10 }
  0x3d   :  { %2145 = vperm.xlu1 %3337, %v4352_v56  }
  0x3e   :  { %584 = vmatpush1.bf16.msra.mxu0 %v3391_v39  ;;  %569 = vmatmul.mubr.bf16.gmra.mrb[4].mxu1 %v4302_v41 }
  0x3f   :  { %830 = vmatpush1.bf16.msra.mxu1 %v4297_v40  ;;  %585 = vmatprep.subr.bf16.mxu0 %v3399_v42 }
  0x40   :  { %831 = vmatprep.subr.bf16.mxu1 %v4309_v43  ;;  %857 = vmatprep.mubr.bf16.mxu1 %v5268_v0 }
  0x41   :  { %3338 = vset.pattern.permute.xlu0 %v4107_v13  ;;  %2162 = vperm.xlu1 %3337, %v4359_v58  }
  0x42   :  { %586 = vmatpush1.bf16.msra.mxu0 %v3397_v44  ;;  %2423 = vperm.xlu0 %3338, %v4352_v56  }
  0x43   :  { %832 = vmatpush1.bf16.msra.mxu1 %v4314_v45  ;;  %587 = vmatprep.subr.bf16.mxu0 %v3405_v46  ;;  %v3124_v46 = vld [vmem:[%s5260_s6] ss:$0 sm:$0xff] }
  0x44   :  { %833 = vmatprep.subr.bf16.mxu1 %v4322_v47 }
  0x45   :  { %3339 = vset.pattern.permute.xlu1 %v4107_v13 }
  0x46   :  { %588 = vmatpush1.bf16.msra.mxu0 %v3403_v48  ;;  %3341 = vset.pattern.permute.xlu0 %v4108_v16 }
  0x47   :  { %834 = vmatpush1.bf16.msra.mxu1 %v4328_v49  ;;  %589 = vmatprep.subr.bf16.mxu0 %v3411_v50 }
  0x48   :  { %835 = vmatprep.subr.bf16.mxu1 %v4335_v51  ;;  %2718 = vperm.xlu0 %3341, %v4359_v58  }
  0x49   :  { %2440 = vperm.xlu1 %3339, %v4359_v58  }
  0x4a   :  { %590 = vmatpush1.bf16.msra.mxu0 %v3409_v52 }
  0x4b   :  { %836 = vmatpush1.bf16.msra.mxu1 %v4340_v53  ;;  %591 = vmatprep.subr.bf16.mxu0 %v3418_v54 }
  0x4c   :  { %837 = vmatprep.subr.bf16.mxu1 %v4347_v55 }
  0x4d   :  { %3340 = vset.pattern.permute.xlu1 %v4108_v16  ;;  %v4506_v16 = vld [vmem:[%s5263_s9] sm:$0xf] }
  0x4e   :  { %592 = vmatpush1.bf16.msra.mxu0 %v3416_v57  ;;  %2701 = vperm.xlu1 %3340, %v4352_v56   ;;  %v5267_v57 = vlaneseq }
  0x4f   :  { %838 = vmatpush1.bf16.msra.mxu1 %v4362_v59  ;;  %593 = vmatprep.subr.bf16.mxu0 %v3424_v60 }
  0x50   :  { %839 = vmatprep.subr.bf16.mxu1 %v4368_v61  ;;  %v4499_v7 = vshrl.u32 %v5267_v57, 7 }
  0x52   :  { %594 = vmatpush1.bf16.msra.mxu0 %v3422_v62  ;;  %v5265_v13 = vsub.s32 0, %v4499_v7 }
  0x53   :  { %840 = vmatpush1.bf16.msra.mxu1 %v4376_v63  ;;  %866 = vmatprep.subr.bf16.mxu0 %v4378_v1 }
  0x54   :  { %1092 = vmatprep.subr.bf16.mxu1 %v4261_v29 }
  0x55   :  { %612 = vmatmul.mubr.bf16.vlgmr.msra.gmra.mrb[4].mxu0 %v4269_v31 }
  0x56   :  { %858 = vmatmul.mubr.bf16.vlgmr.msra.gmra.mrb[8].mxu1 %v5268_v0  ;;  %867 = vmatpush1.bf16.msra.mxu0 %v4382_v2 }
  0x57   :  { %868 = vmatprep.subr.bf16.mxu0 %v4386_v4  ;;  %621 = vmatprep.mubr.bf16.mxu0 %v5268_v0 }
  0x58   :  { %1093 = vmatpush1.bf16.msra.mxu1 %v4271_v32  ;;  %1124 = vmatprep.mubr.bf16.mxu1 %v5268_v0 }
  0x59   :  { %1094 = vmatprep.subr.bf16.mxu1 %v4277_v34 }
  0x5a   :  { %869 = vmatpush1.bf16.msra.mxu0 %v4393_v5 }
  0x5b   :  { %870 = vmatprep.subr.bf16.mxu0 %v4396_v6 }
  0x5c   :  { %1095 = vmatpush1.bf16.msra.mxu1 %v4283_v36 }
  0x5d   :  { %622 = vmatmul.mubr.bf16.gmra.mrb[8].mxu0 %v4302_v41  ;;  %1096 = vmatprep.subr.bf16.mxu1 %v4290_v38 }
  0x5e   :  { %871 = vmatpush1.bf16.msra.mxu0 %v4402_v8  ;;  %898 = vmatprep.mubr.bf16.mxu0 %v5268_v0 }
  0x5f   :  { %872 = vmatprep.subr.bf16.mxu0 %v4406_v9 }
  0x60   :  { %1097 = vmatpush1.bf16.msra.mxu1 %v4297_v40 }
  0x61   :  { %1098 = vmatprep.subr.bf16.mxu1 %v4309_v43 }
  0x62   :  { %873 = vmatpush1.bf16.msra.mxu0 %v4413_v11 }
  0x63   :  { %874 = vmatprep.subr.bf16.mxu0 %v4417_v12 }
  0x64   :  { %1099 = vmatpush1.bf16.msra.mxu1 %v4314_v45 }
  0x65   :  { %1100 = vmatprep.subr.bf16.mxu1 %v4322_v47 }
  0x66   :  { %875 = vmatpush1.bf16.msra.mxu0 %v4424_v14 }
  0x67   :  { %876 = vmatprep.subr.bf16.mxu0 %v4427_v15 }
  0x68   :  { %1101 = vmatpush1.bf16.msra.mxu1 %v4328_v49 }
  0x69   :  { %1102 = vmatprep.subr.bf16.mxu1 %v4335_v51 }
  0x6a   :  { %877 = vmatpush1.bf16.msra.mxu0 %v4433_v17 }
  0x6b   :  { %878 = vmatprep.subr.bf16.mxu0 %v4437_v18 }
  0x6c   :  { %1103 = vmatpush1.bf16.msra.mxu1 %v4340_v53 }
  0x6d   :  { %1104 = vmatprep.subr.bf16.mxu1 %v4347_v55 }
  0x6e   :  { %879 = vmatpush1.bf16.msra.mxu0 %v4443_v19 }
  0x6f   :  { %880 = vmatprep.subr.bf16.mxu0 %v4446_v20 }
  0x70   :  { %1105 = vmatpush1.bf16.msra.mxu1 %v4362_v59 }
  0x71   :  { %1106 = vmatprep.subr.bf16.mxu1 %v4368_v61 }
  0x72   :  { %881 = vmatpush1.bf16.msra.mxu0 %v4452_v21 }
  0x73   :  { %1133 = vmatprep.subr.bf16.mxu0 %v4378_v1 }
  0x74   :  { %1107 = vmatpush1.bf16.msra.mxu1 %v4376_v63 }
  0x75   :  { %899 = vmatmul.mubr.bf16.vlgmr.msra.gmra.mrb[12].mxu0 %v5268_v0  ;;  %1363 = vmatprep.subr.bf16.mxu1 %v4261_v29 }
  0x76   :  { %1134 = vmatpush1.bf16.msra.mxu0 %v4382_v2  ;;  %1165 = vmatprep.mubr.bf16.mxu0 %v5268_v0 }
  0x77   :  { %1135 = vmatprep.subr.bf16.mxu0 %v4386_v4 }
  0x7a   :  { %1136 = vmatpush1.bf16.msra.mxu0 %v4393_v5 }
  0x7b   :  { %1137 = vmatprep.subr.bf16.mxu0 %v4396_v6 }
  0x7e   :  { %1138 = vmatpush1.bf16.msra.mxu0 %v4402_v8 }
  0x7f   :  { %1139 = vmatprep.subr.bf16.mxu0 %v4406_v9 }
  0x82   :  { %1140 = vmatpush1.bf16.msra.mxu0 %v4413_v11 }
  0x83   :  { %1141 = vmatprep.subr.bf16.mxu0 %v4417_v12 }
  0x86   :  { %1142 = vmatpush1.bf16.msra.mxu0 %v4424_v14 }
  0x87   :  { %1143 = vmatprep.subr.bf16.mxu0 %v4427_v15 }
  0x8a   :  { %1144 = vmatpush1.bf16.msra.mxu0 %v4433_v17 }
  0x8b   :  { %1145 = vmatprep.subr.bf16.mxu0 %v4437_v18 }
  0x8e   :  { %1146 = vmatpush1.bf16.msra.mxu0 %v4443_v19 }
  0x8f   :  { %1147 = vmatprep.subr.bf16.mxu0 %v4446_v20 }
  0x92   :  { %1148 = vmatpush1.bf16.msra.mxu0 %v4452_v21 }
  0x93   :  { %1404 = vmatprep.subr.bf16.mxu0 %v4378_v1 }
 0x108   :  { %v3315_v23 = vpop.f32.mrb[0].mxu0 }
 0x109   :  { %v181_v24 = vadd.f32 %v3315_v23, %v3113_v22  ;;  %v172_v25 = vpop.f32.mrb[1].mxu0  ;;  %v560_v26 = vpop.f32.mrb[0].mxu1  ;;  %v337_v23 = vrot.slane %v4506_v16, %v5265_v13 }
 0x10a   :  { %v173_v27 = vadd.f32 %v3113_v22, %v172_v25  ;;  %v3316_v28 = vpop.f32.mrb[2].mxu0  ;;  %v562_v30 = vpop.f32.mrb[1].mxu1 }
 0x10b   :  { %v175_v31 = vpop.f32.mrb[3].mxu0  ;;  %v564_v33 = vpop.f32.mrb[2].mxu1  ;;  %v184_v35 = vadd.f32 %v3316_v28, %v3113_v22  ;;  %v4515_v25 = vadd.f32 %v560_v26, %v337_v23 }
 0x10c   :  { %3452 = vtanh.f32 %v173_v27  ;;  %v176_v37 = vadd.f32 %v3113_v22, %v175_v31  ;;  %v566_v39 = vpop.f32.mrb[3].mxu1  ;;  %v5266_v22 = vsub.s32 1, %v4499_v7 }
 0x10d   :  { %3454 = vtanh.f32 %v181_v24  ;;  %5365 = vst [vmem:[#allocation16_spill] sm:$0xff] %v4515_v25 }
 0x10e   :  { %3456 = vtanh.f32 %v176_v37  ;;  %v341_v24 = vrot.slane %v4506_v16, %v5266_v22 }
 0x10f   :  { %3458 = vtanh.f32 %v184_v35  ;;  %v4523_v35 = vadd.f32 %v564_v33, %v337_v23 }
 0x110   :  { %v4530_v26 = vadd.f32 %v562_v30, %v341_v24 }
 0x111   :  { %v570_v41 = vpop.f32.mrb[4].mxu1 }
 0x112   :  { %v572_v42 = vpop.f32.mrb[5].mxu1  ;;  %v4517_v27 = vadd.f32 %v570_v41, %v337_v23  ;;  %5368 = vst [vmem:[#allocation19_spill] sm:$0xff] %v4530_v26 }
 0x113   :  { %v574_v44 = vpop.f32.mrb[6].mxu1  ;;  %v4532_v41 = vadd.f32 %v572_v42, %v341_v24 }
 0x114   :  { %v576_v48 = vpop.f32.mrb[7].mxu1  ;;  %5366 = vst [vmem:[#allocation17_spill] sm:$0xff] %v4517_v27  ;;  %v4519_v28 = vadd.f32 %v574_v44, %v337_v23  ;;  %v4534_v23 = vadd.f32 %v566_v39, %v341_v24 }
 0x115   :  { %5369 = vst [vmem:[#allocation20_spill] sm:$0xff] %v4532_v41  ;;  %v4540_v30 = vadd.f32 %v576_v48, %v341_v24 }
 0x116   :  { %v4487_v50 = vpop.eup %3452  ;;  %5367 = vst [vmem:[#allocation18_spill] sm:$0xff] %v4519_v28  ;;  %5370 = vst [vmem:[#allocation21_spill] sm:$0xff] %v4534_v23 }
 0x117   :  { %5361 = vst [vmem:[#allocation12_spill] sm:$0xff] %v4487_v50  ;;  %v4489_v52 = vpop.eup %3454  ;;  %v198_v54 = vmul.f32 %v4487_v50, %v3124_v46  ;;  %5371 = vst [vmem:[#allocation22_spill] sm:$0xff] %v4540_v30 }
 0x118   :  { %5362 = vst [vmem:[#allocation13_spill] sm:$0xff] %v4489_v52  ;;  %v4492_v56 = vpop.eup %3456  ;;  %v200_v3 = vmul.f32 %v4489_v52, %v3124_v46 }
 0x119   :  { %5363 = vst [vmem:[#allocation14_spill] sm:$0xff] %v4492_v56  ;;  %202 = vadd.xlane.f32.xlu1 %v198_v54  ;;  %v199_v60 = vmul.f32 %v4492_v56, %v3124_v46  ;;  %v4495_v62 = vpop.eup %3458 }
 0x11a   :  { %5364 = vst [vmem:[#allocation15_spill] sm:$0xff] %v4495_v62  ;;  %v201_v10 = vmul.f32 %v4495_v62, %v3124_v46 }
 0x11b   :  { %204 = vadd.xlane.f32.xlu0 %v199_v60 }
 0x11d   :  { %206 = vadd.xlane.f32.xlu1 %v200_v3 }
 0x11f   :  { %208 = vadd.xlane.f32.xlu0 %v201_v10 }
 0x128   :  { %v4521_v31 = vpop.f32.mrb[4].mxu0 }
 0x129   :  { %v859_v37 = vpop.f32.mrb[8].mxu1  ;;  %v4525_v46 = vpop.f32.mrb[5].mxu0 }
 0x12a   :  { %v911_v54 = vrot.slane %v859_v37, 1  ;;  %v915_v60 = vrot.slane %v859_v37, 2  ;;  %v919_v3 = vrot.slane %v859_v37, 3  ;;  %v939_v10 = vadd.f32 %v859_v37, %v4515_v25  ;;  %v861_v13 = vpop.f32.mrb[9].mxu1  ;;  %v4528_v22 = vpop.f32.mrb[6].mxu0 }
 0x12b   :  { %v912_v44 = vrot.slane %v861_v13, 1  ;;  %v916_v57 = vrot.slane %v861_v13, 2  ;;  %v619_v0 = vpop.f32.mrb[7].mxu0  ;;  %v863_v33 = vpop.f32.mrb[10].mxu1  ;;  %v940_v58 = vadd.f32 %v861_v13, %v4530_v26  ;;  %v920_v25 = vrot.slane %v861_v13, 3 }
 0x12c   :  { %v943_v62 = vadd.f32 %v911_v54, %v4523_v35  ;;  %v947_v52 = vadd.f32 %v915_v60, %v4517_v27  ;;  %v951_v50 = vadd.f32 %v919_v3, %v4519_v28  ;;  %v864_v37 = vpop.f32.mrb[11].mxu1  ;;  %v3191_v56 = vmul.f32 -1.442695, %v939_v10 }
 0x12d   :  { %v944_v1 = vadd.f32 %v912_v44, %v4534_v23  ;;  %v948_v39 = vadd.f32 %v916_v57, %v4532_v41  ;;  %v3195_v54 = vmul.f32 -1.442695, %v940_v58  ;;  %v952_v3 = vadd.f32 %v920_v25, %v4540_v30 }
 0x12e   :  { %v3192_v42 = vmul.f32 -1.442695, %v943_v62  ;;  %v3193_v29 = vmul.f32 -1.442695, %v947_v52  ;;  %v3194_v33 = vmul.f32 -1.442695, %v951_v50  ;;  %3460 = vpow2.f32 %v3191_v56 }
 0x12f   :  { %v3196_v10 = vmul.f32 -1.442695, %v944_v1  ;;  %v3197_v48 = vmul.f32 -1.442695, %v948_v39  ;;  %v3198_v62 = vmul.f32 -1.442695, %v952_v3 }
 0x130   :  { %v623_v21 = vpop.f32.mrb[8].mxu0  ;;  %3462 = vpow2.f32 %v3192_v42  ;;  %v344_v58 = vsub.s32 2, %v4499_v7  ;;  %v348_v25 = vsub.s32 3, %v4499_v7 }
 0x131   :  { %v625_v60 = vpop.f32.mrb[9].mxu0  ;;  %3464 = vpow2.f32 %v3193_v29 }
 0x132   :  { %v627_v37 = vpop.f32.mrb[10].mxu0  ;;  %3466 = vpow2.f32 %v3194_v33  ;;  %v349_v3 = vrot.slane %v4506_v16, %v348_v25 }
 0x133   :  { %v629_v24 = vpop.f32.mrb[11].mxu0  ;;  %3468 = vpow2.f32 %v3195_v54  ;;  %v345_v54 = vrot.slane %v4506_v16, %v344_v58 }
 0x134   :  { %3470 = vpow2.f32 %v3196_v10  ;;  %v4558_v16 = vadd.f32 %v619_v0, %v349_v3 }
 0x135   :  { %3472 = vpow2.f32 %v3197_v48  ;;  %v4560_v58 = vadd.f32 %v623_v21, %v345_v54  ;;  %v4564_v25 = vadd.f32 %v627_v37, %v345_v54 }
 0x136   :  { %3474 = vpow2.f32 %v3198_v62  ;;  %5373 = vst [vmem:[#allocation24_spill] sm:$0xff] %v4558_v16 }
 0x137   :  { %5375 = vst [vmem:[#allocation26_spill] sm:$0xff] %v4564_v25 }
 0x138   :  { %v3461_v52 = vpop.eup %3460 }
 0x139   :  { %v967_v13 = vadd.f32 1.0, %v3461_v52  ;;  %v4550_v52 = vadd.f32 %v4521_v31, %v345_v54  ;;  %v4566_v31 = vadd.f32 %v629_v24, %v349_v3 }
 0x13a   :  { %v3463_v50 = vpop.eup %3462 }
 0x13b   :  { %v3465_v57 = vpop.eup %3464  ;;  %v968_v44 = vadd.f32 1.0, %v3463_v50  ;;  %3476 = vrcp.f32 %v967_v13  ;;  %v4553_v50 = vadd.f32 %v4525_v46, %v349_v3  ;;  %v4562_v13 = vadd.f32 %v625_v60, %v349_v3  ;;  %5376 = vst [vmem:[#allocation27_spill] sm:$0xff] %v4566_v31 }
 0x13c   :  { %v3467_v56 = vpop.eup %3466  ;;  %v969_v42 = vadd.f32 1.0, %v3465_v57  ;;  %v4556_v57 = vadd.f32 %v4528_v22, %v345_v54 }
 0x13d   :  { %v3469_v1 = vpop.eup %3468  ;;  %v970_v33 = vadd.f32 1.0, %v3467_v56  ;;  %3478 = vrcp.f32 %v968_v44  ;;  %5372 = vst [vmem:[#allocation23_spill] sm:$0xff] %v4553_v50  ;;  %5374 = vst [vmem:[#allocation25_spill] sm:$0xff] %v4562_v13 }
 0x13e   :  { %v3471_v29 = vpop.eup %3470  ;;  %v991_v10 = vadd.f32 1.0, %v3469_v1  ;;  %3480 = vrcp.f32 %v969_v42 }
 0x13f   :  { %v3473_v39 = vpop.eup %3472  ;;  %v992_v48 = vadd.f32 1.0, %v3471_v29  ;;  %3482 = vrcp.f32 %v970_v33 }
 0x140   :  { %v3475_v62 = vpop.eup %3474  ;;  %v993_v30 = vadd.f32 1.0, %v3473_v39  ;;  %3484 = vrcp.f32 %v991_v10 }
 0x141   :  { %v994_v56 = vadd.f32 1.0, %v3475_v62  ;;  %3486 = vrcp.f32 %v992_v48 }
 0x142   :  { %3488 = vrcp.f32 %v993_v30 }
 0x143   :  { %3490 = vrcp.f32 %v994_v56 }
 0x145   :  { %v3477_v54 = vpop.eup %3476 }
 0x147   :  { %v3479_v62 = vpop.eup %3478 }
 0x148   :  { %v900_v1 = vpop.f32.mrb[12].mxu0 }
 0x149   :  { %v913_v46 = vrot.slane %v900_v1, 1  ;;  %v917_v44 = vrot.slane %v900_v1, 2  ;;  %v921_v29 = vrot.slane %v900_v1, 3  ;;  %v941_v22 = vadd.f32 %v900_v1, %v4550_v52  ;;  %v902_v42 = vpop.f32.mrb[13].mxu0 }
 0x14a   :  { %v914_v39 = vrot.slane %v902_v42, 1  ;;  %v918_v33 = vrot.slane %v902_v42, 2  ;;  %v922_v0 = vrot.slane %v902_v42, 3  ;;  %v942_v21 = vadd.f32 %v902_v42, %v4553_v50  ;;  %v904_v10 = vpop.f32.mrb[14].mxu0 }
 0x14b   :  { %v945_v30 = vadd.f32 %v913_v46, %v4556_v57  ;;  %v949_v60 = vadd.f32 %v917_v44, %v4560_v58  ;;  %v953_v37 = vadd.f32 %v921_v29, %v4564_v25  ;;  %v905_v24 = vpop.f32.mrb[15].mxu0  ;;  %3492 = vtanh.f32 %v941_v22  ;;  %v3481_v10 = vpop.eup %3480 }
 0x14c   :  { %v946_v3 = vadd.f32 %v914_v39, %v4558_v16  ;;  %v950_v48 = vadd.f32 %v918_v33, %v4562_v13  ;;  %v954_v1 = vadd.f32 %v922_v0, %v4566_v31  ;;  %v3199_v42 = vmul.f32 -1.442695, %v942_v21  ;;  %v3483_v50 = vpop.eup %3482 }
 0x14d   :  { %3494 = vtanh.f32 %v945_v30  ;;  %v3485_v29 = vpop.eup %3484  ;;  %v4576_v30 = vpop.permute.xlu0 %1053 }
 0x14e   :  { %3496 = vtanh.f32 %v949_v60  ;;  %v3200_v56 = vmul.f32 -1.442695, %v946_v3  ;;  %v3201_v46 = vmul.f32 -1.442695, %v950_v48  ;;  %v3202_v44 = vmul.f32 -1.442695, %v954_v1  ;;  %v3487_v24 = vpop.eup %3486 }
 0x14f   :  { %3498 = vtanh.f32 %v953_v37  ;;  %v3489_v22 = vpop.eup %3488  ;;  %v1031_v21 = vmul.f32 0.0, %v3485_v29  ;;  %v1032_v3 = vmul.f32 0.0, %v3487_v24 }
 0x150   :  { %3500 = vpow2.f32 %v3199_v42  ;;  %v3491_v39 = vpop.eup %3490  ;;  %v1033_v37 = vmul.f32 0.0, %v3489_v22 }
 0x151   :  { %3502 = vpow2.f32 %v3200_v56  ;;  %v1034_v56 = vmul.f32 0.0, %v3491_v39 }
 0x152   :  { %3504 = vpow2.f32 %v3201_v46 }
 0x153   :  { %3506 = vpow2.f32 %v3202_v44 }
 0x155   :  { %v3493_v33 = vpop.eup %3492 }
 0x156   :  { %v1035_v31 = vmul.f32 %v3493_v33, %v3477_v54 }
 0x157   :  { %v3495_v0 = vpop.eup %3494 }
 0x158   :  { %v3497_v60 = vpop.eup %3496  ;;  %v1036_v48 = vmul.f32 %v3495_v0, %v3479_v62  ;;  %v1039_v16 = vadd.f32 %v1035_v31, %v1031_v21  ;;  %v1074_v62 = vpop.permute.xlu0 %1073 }
 0x159   :  { %v3499_v13 = vpop.eup %3498  ;;  %v1037_v1 = vmul.f32 %v3497_v60, %v3481_v10  ;;  %v1076_v0 = vmul.f32 0.0, %v1074_v62 }
 0x15a   :  { %v3501_v42 = vpop.eup %3500  ;;  %v1038_v41 = vmul.f32 %v3499_v13, %v3483_v50  ;;  %v1040_v46 = vadd.f32 %v1036_v48, %v1032_v3  ;;  %3508 = vtanh.f32 %v1039_v16 }
 0x15b   :  { %v3503_v44 = vpop.eup %3502  ;;  %v1019_v26 = vadd.f32 1.0, %v3501_v42  ;;  %v1041_v23 = vadd.f32 %v1037_v1, %v1033_v37 }
 0x15c   :  { %v3505_v25 = vpop.eup %3504  ;;  %v1020_v29 = vadd.f32 1.0, %v3503_v44  ;;  %v1042_v54 = vadd.f32 %v1038_v41, %v1034_v56  ;;  %3510 = vtanh.f32 %v1040_v46  ;;  %v1082_v24 = vrot.slane %v1040_v46, 7 }
 0x15d   :  { %v3507_v33 = vpop.eup %3506  ;;  %v1021_v22 = vadd.f32 1.0, %v3505_v25  ;;  %3512 = vrcp.f32 %v1019_v26  ;;  %v1084_v31 = vrot.slane %v1041_v23, 6 }
 0x15e   :  { %v1022_v10 = vadd.f32 1.0, %v3507_v33  ;;  %3514 = vrcp.f32 %v1020_v29  ;;  %v1083_v50 = vsel %vm238_vm0, %v1082_v24, %v1039_v16  ;;  %v1086_v13 = vrot.slane %v1042_v54, 5 }
 0x15f   :  { %3516 = vrcp.f32 %v1021_v22  ;;  %v1085_v39 = vsel %vm1063_vm1, %v1084_v31, %v1083_v50 }
 0x160   :  { %3518 = vrcp.f32 %v1022_v10  ;;  %v1087_v41 = vsel %vm1066_vm2, %v1086_v13, %v1085_v39  ;;  %v4592_v13 = vpop.permute.xlu1 %1327  ;;  %v5377_v39 = vmov 0  }
 0x161   :  { %3520 = vtanh.f32 %v1041_v23  ;;  %v1089_v21 = vmul.f32 %v1087_v41, %v4576_v30 }
 0x162   :  { %3522 = vtanh.f32 %v1042_v54 }
 0x163   :  { %v4582_v25 = vadd.f32 %v1089_v21, %v1076_v0 }
 0x164   :  { %v3509_v26 = vpop.eup %3508 }
 0x166   :  { %v3511_v60 = vpop.eup %3510 }
 0x167   :  { %v3513_v3 = vpop.eup %3512 }
 0x168   :  { %v3515_v48 = vpop.eup %3514  ;;  %v1047_v37 = vmul.f32 %v3513_v3, %v3509_v26 }
 0x169   :  { %v3517_v16 = vpop.eup %3516  ;;  %v1048_v1 = vmul.f32 %v3515_v48, %v3511_v60 }
 0x16a   :  { %v3519_v42 = vpop.eup %3518 }
 0x16b   :  { %v3521_v56 = vpop.eup %3520  ;;  %v1060_v46 = vrot.slane %v1048_v1, 7 }
 0x16c   :  { %v3523_v44 = vpop.eup %3522  ;;  %v1049_v29 = vmul.f32 %v3521_v56, %v3517_v16 }
 0x16d   :  { %v1050_v24 = vmul.f32 %v3523_v44, %v3519_v42  ;;  %v1061_v23 = vsel %vm238_vm0, %v1060_v46, %v1047_v37 }
 0x16e   :  { %v1062_v62 = vrot.slane %v1049_v29, 6 }
 0x16f   :  { %v1065_v33 = vrot.slane %v1050_v24, 5 }
 0x170   :  { %v1064_v54 = vsel %vm1063_vm1, %v1062_v62, %v1061_v23 }
 0x171   :  { %v1067_v22 = vsel %vm1066_vm2, %v1065_v33, %v1064_v54 }
 0x172   :  { %v1069_v31 = vmul.f32 %v1067_v22, %v4576_v30  ;;  %v4602_v30 = vpop.permute.xlu1 %1343  ;;  %v5390_v22 = vld [vmem:[#allocation16_spill] sm:$0xff] }
 0x174   :  { %v4588_v10 = vadd.f32 %v1076_v0, %v1069_v31 }
 0x176   :  { %v1091_v50 = vpack.c.bf16 %v4588_v10, %v4588_v10 }
 0x178   :  { %1125 = vmatmul.mubr.bf16.vlgmr.msra.gmra.mrb[12].mxu1 %v1091_v50  ;;  %1166 = vmatmul.mubr.bf16.vlgmr.msra.gmra.mrb[16].mxu0 %v1091_v50 }
 0x179   :  { %1364 = vmatpush1.bf16.msra.mxu1 %v4271_v32  ;;  %1405 = vmatpush1.bf16.msra.mxu0 %v4382_v2  ;;  %v4608_v32 = vpop.permute.xlu1 %1614 }
 0x17a   :  { %1365 = vmatprep.subr.bf16.mxu1 %v4277_v34  ;;  %1406 = vmatprep.subr.bf16.mxu0 %v4386_v4 }
 0x17b   :  { %1395 = vmatprep.mubr.bf16.mxu1 %v5377_v39  ;;  %1436 = vmatprep.mubr.bf16.mxu0 %v5377_v39 }
 0x17d   :  { %1366 = vmatpush1.bf16.msra.mxu1 %v4283_v36  ;;  %1407 = vmatpush1.bf16.msra.mxu0 %v4393_v5  ;;  %v4616_v34 = vpop.permute.xlu1 %1869 }
 0x17e   :  { %1367 = vmatprep.subr.bf16.mxu1 %v4290_v38  ;;  %1408 = vmatprep.subr.bf16.mxu0 %v4396_v6  ;;  %5378 = vst [vmem:[#allocation28_spill] sm:$0xff] %v4616_v34  ;;  %v4628_v38 = vpop.permute.xlu0 %1598  ;;  %v5414_v34 = vsub.s32 0, %v4499_v7 }
 0x181   :  { %1368 = vmatpush1.bf16.msra.mxu1 %v4297_v40  ;;  %1409 = vmatpush1.bf16.msra.mxu0 %v4402_v8  ;;  %v4624_v36 = vpop.permute.xlu1 %2145 }
 0x182   :  { %1369 = vmatprep.subr.bf16.mxu1 %v4309_v43  ;;  %1410 = vmatprep.subr.bf16.mxu0 %v4406_v9  ;;  %5379 = vst [vmem:[#allocation29_spill] sm:$0xff] %v4624_v36  ;;  %v5381_v43 = vld [vmem:[#allocation11_spill] sm:$0xff] }
 0x185   :  { %1370 = vmatpush1.bf16.msra.mxu1 %v4314_v45  ;;  %1411 = vmatpush1.bf16.msra.mxu0 %v4413_v11  ;;  %v4634_v40 = vpop.permute.xlu1 %2162  ;;  %v4638_v45 = vpop.permute.xlu0 %1885 }
 0x186   :  { %1371 = vmatprep.subr.bf16.mxu1 %v4322_v47  ;;  %1412 = vmatprep.subr.bf16.mxu0 %v4417_v12  ;;  %5380 = vst [vmem:[#allocation30_spill] sm:$0xff] %v4634_v40  ;;  %5382 = vst [vmem:[#allocation11_spill] sm:$0xff] %v4638_v45  ;;  %v5383_v47 = vld [vmem:[#allocation8_spill] sm:$0xff]  ;;  %v4656_v12 = vld [vmem:[%s5255_s1] sm:$0x3]  ;;  %v4109_v40 = vmov 7  }
 0x187   :  { %vm211_vm4 = vcmp.gt.f32.partialorder %v4656_v12, 0.0  ;;  %3343 = vset.pattern.permute.xlu1 %v4109_v40  ;;  %3342 = vset.pattern.permute.xlu0 %v4109_v40 }
 0x189   :  { %1372 = vmatpush1.bf16.msra.mxu1 %v4328_v49  ;;  %1413 = vmatpush1.bf16.msra.mxu0 %v4424_v14  ;;  %v5384_v49 = vld [vmem:[#allocation10_spill] sm:$0xff] }
 0x18a   :  { %1373 = vmatprep.subr.bf16.mxu1 %v4335_v51  ;;  %1414 = vmatprep.subr.bf16.mxu0 %v4427_v15  ;;  %v4642_v51 = vpop.permute.xlu1 %2440 }
 0x18b   :  { %5385 = vst [vmem:[#allocation8_spill] sm:$0xff] %v4642_v51 }
 0x18d   :  { %1374 = vmatpush1.bf16.msra.mxu1 %v4340_v53  ;;  %1415 = vmatpush1.bf16.msra.mxu0 %v4433_v17  ;;  %v4644_v53 = vpop.permute.xlu0 %2423 }
 0x18e   :  { %1375 = vmatprep.subr.bf16.mxu1 %v4347_v55  ;;  %1416 = vmatprep.subr.bf16.mxu0 %v4437_v18  ;;  %5386 = vst [vmem:[#allocation10_spill] sm:$0xff] %v4644_v53  ;;  %v5387_v55 = vlaneseq }
 0x191   :  { %1376 = vmatpush1.bf16.msra.mxu1 %v4362_v59  ;;  %1417 = vmatpush1.bf16.msra.mxu0 %v4443_v19  ;;  %v217_v59 = vand.u32 127, %v5387_v55  ;;  %v4649_v2 = vpop.permute.xlu0 %2718 }
 0x192   :  { %1377 = vmatprep.subr.bf16.mxu1 %v4368_v61  ;;  %1418 = vmatprep.subr.bf16.mxu0 %v4446_v20  ;;  %v4647_v61 = vpop.permute.xlu1 %2701  ;;  %5389 = vst [vmem:[#allocation32_spill] sm:$0xff] %v4649_v2  ;;  %v4793_v2 = vld [vmem:[#allocation2 + $0x4] ss:$16 sps:$4 sm:$0xff]  }
 0x193   :  { %5388 = vst [vmem:[#allocation31_spill] sm:$0xff] %v4647_v61  ;;  %v222_v4 = vadd.s32 4294967288, %v217_v59  ;;  %v220_v8 = vsub.s32 %v217_v59, %v4499_v7  ;;  %5412 = vst [vmem:[#allocation39_spill] sm:$0xff] %v4793_v2  ;;  %v4796_v61 = vld [vmem:[#allocation2 + $0xc] ss:$16 sps:$4 sm:$0xff]  }
 0x194   :  { %5413 = vst [vmem:[#allocation40_spill] sm:$0xff] %v4796_v61 }
 0x195   :  { %1378 = vmatpush1.bf16.msra.mxu1 %v4376_v63  ;;  %1419 = vmatpush1.bf16.msra.mxu0 %v5381_v43  ;;  %v225_v5 = vsub.s32 %v222_v4, %v4499_v7 }
 0x196   :  { %1634 = vmatprep.subr.bf16.mxu1 %v5383_v47  ;;  %1675 = vmatprep.subr.bf16.mxu0 %v5384_v49 }
 0x1a6   :  { %v203_v63 = vpop.xlane.xlu1 %202 }
 0x1a7   :  { %v221_v15 = vrot.slane %v203_v63, %v220_v8  ;;  %v5391_v63 = vld [vmem:[#allocation26_spill] sm:$0xff] }
 0x1a8   :  { %v205_v6 = vpop.xlane.xlu0 %204 }
 0x1a9   :  { %v226_v11 = vrot.slane %v205_v6, %v225_v5 }
 0x1aa   :  { %v207_v9 = vpop.xlane.xlu1 %206 }
 0x1ab   :  { %v232_v17 = vrot.slane %v207_v9, %v220_v8  ;;  %v228_v19 = vsel %vm227_vm3, %v226_v11, %v221_v15 }
 0x1ac   :  { %v209_v14 = vpop.xlane.xlu0 %208 }
 0x1ad   :  { %v236_v18 = vrot.slane %v209_v14, %v225_v5 }
 0x1af   :  { %v237_v20 = vsel %vm227_vm3, %v236_v18, %v232_v17  ;;  %v5392_v17 = vld [vmem:[#allocation21_spill] sm:$0xff] }
 0x1b0   :  { %v239_v0 = vsel %vm238_vm0, %v237_v20, %v228_v19 }
 0x1b1   :  { %v241_v41 = vsel %vm211_vm4, %v239_v0, -1e+09  ;;  %v5393_v0 = vld [vmem:[#allocation19_spill] sm:$0xff] }
 0x1b2   :  { %v243_v21 = vsel %vm242_vm5, %v241_v41, -inf }
 0x1b3   :  { %244 = vmax.xlane.f32.xlu1 %v243_v21  ;;  %v5394_v21 = vld [vmem:[#allocation20_spill] sm:$0xff] }
 0x240   :  { %v245_v26 = vpop.xlane.xlu1 %244 }
 0x241   :  { %v246_v60 = vsub.f32 %v241_v41, %v245_v26 }
 0x243   :  { %v247_v3 = vmul.f32 1.442695, %v246_v60  ;;  %v5395_v60 = vld [vmem:[#allocation22_spill] sm:$0xff] }
 0x245   :  { %3524 = vpow2.f32 %v247_v3 }
 0x24b   :  { %v1126_v48 = vpop.f32.mrb[12].mxu1  ;;  %v1167_v37 = vpop.f32.mrb[16].mxu0 }
 0x24c   :  { %v1178_v16 = vrot.slane %v1126_v48, 7  ;;  %v1182_v1 = vrot.slane %v1126_v48, 1  ;;  %v1186_v42 = vrot.slane %v1126_v48, 2  ;;  %v1210_v56 = vadd.f32 %v1126_v48, %v4523_v35  ;;  %v1128_v46 = vpop.f32.mrb[13].mxu1  ;;  %v1169_v44 = vpop.f32.mrb[17].mxu0 }
 0x24d   :  { %v1180_v29 = vrot.slane %v1167_v37, 7  ;;  %v1184_v24 = vrot.slane %v1167_v37, 1  ;;  %v1188_v23 = vrot.slane %v1167_v37, 2  ;;  %v1212_v62 = vadd.f32 %v1167_v37, %v4556_v57  ;;  %v1130_v33 = vpop.f32.mrb[14].mxu1  ;;  %v1171_v54 = vpop.f32.mrb[18].mxu0 }
 0x24e   :  { %v1206_v31 = vadd.f32 %v1178_v16, %v5390_v22  ;;  %v1214_v50 = vadd.f32 %v1182_v1, %v4517_v27  ;;  %v1218_v43 = vadd.f32 %v1186_v42, %v4519_v28  ;;  %v3204_v47 = vmul.f32 -1.442695, %v1210_v56  ;;  %v1131_v49 = vpop.f32.mrb[15].mxu1  ;;  %v1172_v55 = vpop.f32.mrb[19].mxu0  ;;  %v5396_v16 = vld [vmem:[#allocation23_spill] sm:$0xff] }
 0x24f   :  { %v1208_v59 = vadd.f32 %v1180_v29, %v4550_v52  ;;  %v1216_v4 = vadd.f32 %v1184_v24, %v4560_v58  ;;  %v1220_v5 = vadd.f32 %v1188_v23, %v5391_v63  ;;  %3526 = vtanh.f32 %v1212_v62  ;;  %v3525_v48 = vpop.eup %3524  ;;  %v5397_v24 = vld [vmem:[#allocation24_spill] sm:$0xff]  ;;  %v5398_v62 = vld [vmem:[#allocation25_spill] sm:$0xff]  ;;  %v5399_v55 = vld [vmem:[#allocation27_spill] sm:$0xff] }
 0x250   :  { %v3203_v6 = vmul.f32 -1.442695, %v1206_v31  ;;  %3528 = vpow2.f32 %v3204_v47  ;;  %v3205_v8 = vmul.f32 -1.442695, %v1214_v50  ;;  %v3206_v9 = vmul.f32 -1.442695, %v1218_v43 }
 0x251   :  { %3530 = vtanh.f32 %v1208_v59  ;;  %v1179_v11 = vrot.slane %v1128_v46, 7  ;;  %v1183_v14 = vrot.slane %v1128_v46, 1  ;;  %v1187_v15 = vrot.slane %v1128_v46, 2 }
 0x252   :  { %3532 = vpow2.f32 %v3203_v6  ;;  %v1211_v18 = vadd.f32 %v1128_v46, %v5392_v17  ;;  %v1181_v19 = vrot.slane %v1169_v44, 7  ;;  %v1185_v20 = vrot.slane %v1169_v44, 1 }
 0x253   :  { %3534 = vpow2.f32 %v3205_v8  ;;  %v1207_v41 = vadd.f32 %v1179_v11, %v5393_v0  ;;  %v1215_v26 = vadd.f32 %v1183_v14, %v5394_v21  ;;  %v1219_v3 = vadd.f32 %v1187_v15, %v5395_v60 }
 0x254   :  { %3536 = vpow2.f32 %v3206_v9  ;;  %v3208_v37 = vmul.f32 -1.442695, %v1211_v18  ;;  %v1209_v1 = vadd.f32 %v1181_v19, %v5396_v16  ;;  %v1189_v29 = vrot.slane %v1169_v44, 2 }
 0x255   :  { %3538 = vtanh.f32 %v1216_v4  ;;  %v3207_v42 = vmul.f32 -1.442695, %v1207_v41  ;;  %v3209_v56 = vmul.f32 -1.442695, %v1215_v26  ;;  %v3210_v46 = vmul.f32 -1.442695, %v1219_v3 }
 0x256   :  { %3540 = vtanh.f32 %v1220_v5  ;;  %v1213_v23 = vadd.f32 %v1169_v44, %v5397_v24  ;;  %v1217_v33 = vadd.f32 %v1185_v20, %v5398_v62  ;;  %v3211_v54 = vmul.f32 -1.442695, %v1209_v1 }
 0x257   :  { %3542 = vpow2.f32 %v3207_v42  ;;  %v4677_v31 = vmul.f32 %v3525_v48, %v4656_v12  ;;  %v1221_v59 = vadd.f32 %v1189_v29, %v5399_v55 }
 0x258   :  { %3544 = vpow2.f32 %v3208_v37  ;;  %v3212_v50 = vmul.f32 -1.442695, %v1213_v23  ;;  %v3213_v4 = vmul.f32 -1.442695, %v1217_v33 }
 0x259   :  { %v3527_v43 = vpop.eup %3526  ;;  %3546 = vpow2.f32 %v3209_v56  ;;  %v250_v47 = vsel %vm242_vm5, %v4677_v31, 0.0  ;;  %v3214_v14 = vmul.f32 -1.442695, %v1221_v59 }
 0x25a   :  { %v3529_v49 = vpop.eup %3528  ;;  %3548 = vpow2.f32 %v3210_v46  ;;  %251 = vadd.xlane.f32.xlu0 %v250_v47 }
 0x25b   :  { %v3531_v44 = vpop.eup %3530  ;;  %v1235_v5 = vadd.f32 1.0, %v3529_v49  ;;  %3550 = vpow2.f32 %v3211_v54 }
 0x25c   :  { %v3533_v6 = vpop.eup %3532  ;;  %3552 = vpow2.f32 %v3212_v50 }
 0x25d   :  { %v3535_v12 = vpop.eup %3534  ;;  %v1234_v8 = vadd.f32 1.0, %v3533_v6  ;;  %3554 = vrcp.f32 %v1235_v5 }
 0x25e   :  { %v3537_v9 = vpop.eup %3536  ;;  %v1236_v11 = vadd.f32 1.0, %v3535_v12  ;;  %3556 = vpow2.f32 %v3213_v4 }
 0x25f   :  { %v3539_v15 = vpop.eup %3538  ;;  %v1237_v18 = vadd.f32 1.0, %v3537_v9  ;;  %3558 = vrcp.f32 %v1234_v8  ;;  %v1299_v8 = vrot.slane %v4582_v25, 7 }
 0x260   :  { %v3541_v19 = vpop.eup %3540  ;;  %3560 = vrcp.f32 %v1236_v11 }
 0x261   :  { %v3543_v20 = vpop.eup %3542  ;;  %3562 = vrcp.f32 %v1237_v18 }
 0x262   :  { %v3545_v41 = vpop.eup %3544  ;;  %v1258_v26 = vadd.f32 1.0, %v3543_v20  ;;  %3564 = vpow2.f32 %v3214_v14  ;;  %v1300_v20 = vrot.slane %v4582_v25, 1 }
 0x263   :  { %v3547_v3 = vpop.eup %3546  ;;  %v1259_v48 = vadd.f32 1.0, %v3545_v41 }
 0x264   :  { %v3549_v37 = vpop.eup %3548  ;;  %v1260_v1 = vadd.f32 1.0, %v3547_v3  ;;  %3566 = vrcp.f32 %v1258_v26  ;;  %v1301_v26 = vrot.slane %v4582_v25, 2 }
 0x265   :  { %v3551_v42 = vpop.eup %3550  ;;  %v1261_v56 = vadd.f32 1.0, %v3549_v37  ;;  %3568 = vrcp.f32 %v1259_v48 }
 0x266   :  { %v3553_v29 = vpop.eup %3552  ;;  %3570 = vrcp.f32 %v1260_v1  ;;  %v1286_v4 = vadd.f32 1.0, %v3551_v42 }
 0x267   :  { %v3555_v46 = vpop.eup %3554  ;;  %3572 = vrcp.f32 %v1261_v56  ;;  %v1287_v12 = vadd.f32 1.0, %v3553_v29 }
 0x268   :  { %v3557_v23 = vpop.eup %3556  ;;  %v1311_v33 = vmul.f32 %v3555_v46, %v3527_v43  ;;  %3574 = vrcp.f32 %v1286_v4 }
 0x269   :  { %v3559_v54 = vpop.eup %3558  ;;  %v1288_v9 = vadd.f32 1.0, %v3557_v23  ;;  %3576 = vrcp.f32 %v1287_v12 }
 0x26a   :  { %v3561_v50 = vpop.eup %3560  ;;  %v1310_v47 = vmul.f32 %v3559_v54, %v3531_v44 }
 0x26b   :  { %v3563_v49 = vpop.eup %3562  ;;  %v1312_v59 = vmul.f32 %v3561_v50, %v3539_v15  ;;  %3578 = vrcp.f32 %v1288_v9 }
 0x26c   :  { %v3565_v5 = vpop.eup %3564  ;;  %v1313_v6 = vmul.f32 %v3563_v49, %v3541_v19 }
 0x26d   :  { %v1289_v14 = vadd.f32 1.0, %v3565_v5 }
 0x26e   :  { %v3567_v11 = vpop.eup %3566 }
 0x26f   :  { %v3569_v18 = vpop.eup %3568  ;;  %v1306_v41 = vmul.f32 %v3567_v11, %v1299_v8  ;;  %3580 = vrcp.f32 %v1289_v14 }
 0x270   :  { %v3571_v43 = vpop.eup %3570  ;;  %v1307_v44 = vmul.f32 %v3569_v18, %v4582_v25 }
 0x271   :  { %v3573_v15 = vpop.eup %3572  ;;  %v1308_v3 = vmul.f32 %v3571_v43, %v1300_v20  ;;  %v1314_v19 = vadd.f32 %v1310_v47, %v1306_v41 }
 0x272   :  { %v1309_v48 = vmul.f32 %v3573_v15, %v1301_v26  ;;  %v1315_v37 = vadd.f32 %v1311_v33, %v1307_v44  ;;  %v3575_v47 = vpop.eup %3574  ;;  %v1346_v15 = vmul.f32 %v4602_v30, %v4588_v10  ;;  %v4710_v10 = vld [vmem:[#allocation2 + $0x2c] ss:$16 sps:$4 sm:$0xff]  }
 0x273   :  { %v1316_v1 = vadd.f32 %v1312_v59, %v1308_v3  ;;  %3582 = vtanh.f32 %v1314_v19  ;;  %v1352_v42 = vrot.slane %v1314_v19, 1  ;;  %v3577_v49 = vpop.eup %3576 }
 0x274   :  { %v1317_v56 = vadd.f32 %v1313_v6, %v1309_v48  ;;  %3584 = vtanh.f32 %v1315_v37 }
 0x275   :  { %3586 = vtanh.f32 %v1316_v1  ;;  %v1353_v29 = vsel %vm238_vm0, %v1315_v37, %v1352_v42  ;;  %v1354_v46 = vrot.slane %v1316_v1, 7  ;;  %v3579_v33 = vpop.eup %3578  ;;  %v4701_v37 = vld [vmem:[#allocation2] ss:$16 sps:$4 sm:$0xff]   ;;  %v4704_v1 = vld [vmem:[#allocation2 + $0x8] ss:$16 sps:$4 sm:$0xff]  }
 0x276   :  { %3588 = vtanh.f32 %v1317_v56  ;;  %v1356_v23 = vrot.slane %v1317_v56, 6  ;;  %v4707_v42 = vld [vmem:[#allocation2 + $0x24] ss:$16 sps:$4 sm:$0xff]   ;;  %v4715_v56 = vld [vmem:[#allocation2 + $0x20] ss:$16 sps:$4 sm:$0xff]  }
 0x277   :  { %v1355_v54 = vsel %vm1063_vm1, %v1354_v46, %v1353_v29  ;;  %v4718_v29 = vld [vmem:[#allocation2 + $0x28] ss:$16 sps:$4 sm:$0xff]   ;;  %v4721_v46 = vld [vmem:[#allocation2 + $0x44] ss:$16 sps:$4 sm:$0xff]  }
 0x278   :  { %v4689_v50 = vsel %vm1066_vm2, %v1356_v23, %v1355_v54  ;;  %v4724_v23 = vld [vmem:[#allocation2 + $0x4c] ss:$16 sps:$4 sm:$0xff]   ;;  %v4727_v54 = vld [vmem:[#allocation2 + $0x40] ss:$16 sps:$4 sm:$0xff]  }
 0x279   :  { %v3581_v4 = vpop.eup %3580 }
 0x27d   :  { %v3583_v59 = vpop.eup %3582 }
 0x27e   :  { %v3585_v5 = vpop.eup %3584  ;;  %v1322_v12 = vmul.f32 %v3583_v59, %v3575_v47  ;;  %v4730_v47 = vld [vmem:[#allocation2 + $0x48] ss:$16 sps:$4 sm:$0xff]  }
 0x27f   :  { %v3587_v6 = vpop.eup %3586  ;;  %v1323_v8 = vmul.f32 %v3585_v5, %v3577_v49  ;;  %v4733_v49 = vld [vmem:[#allocation2 + $0x64] ss:$16 sps:$4 sm:$0xff]   ;;  %v4742_v59 = vld [vmem:[#allocation2 + $0x68] ss:$16 sps:$4 sm:$0xff]  }
 0x280   :  { %v3589_v9 = vpop.eup %3588  ;;  %v1324_v11 = vmul.f32 %v3587_v6, %v3579_v33  ;;  %v1334_v14 = vrot.slane %v1322_v12, 1  ;;  %v4736_v33 = vld [vmem:[#allocation2 + $0x6c] ss:$16 sps:$4 sm:$0xff]   ;;  %v4745_v5 = vld [vmem:[#allocation2 + $0x84] ss:$16 sps:$4 sm:$0xff]  }
 0x281   :  { %v1325_v18 = vmul.f32 %v3589_v9, %v3581_v4  ;;  %v4739_v4 = vld [vmem:[#allocation2 + $0x60] ss:$16 sps:$4 sm:$0xff]   ;;  %v4748_v12 = vld [vmem:[#allocation2 + $0x8c] ss:$16 sps:$4 sm:$0xff]   ;;  %v4757_v9 = vld [vmem:[#allocation2 + $0xa4] ss:$16 sps:$4 sm:$0xff]  }
 0x282   :  { %v1335_v20 = vsel %vm238_vm0, %v1323_v8, %v1334_v14  ;;  %v1336_v41 = vrot.slane %v1324_v11, 7  ;;  %v4751_v6 = vld [vmem:[#allocation2 + $0x80] ss:$16 sps:$4 sm:$0xff]   ;;  %v4754_v8 = vld [vmem:[#allocation2 + $0x88] ss:$16 sps:$4 sm:$0xff]   ;;  %5400 = vst [vmem:[#allocation16_spill] sm:$0xff] %v4757_v9 }
 0x283   :  { %v1338_v43 = vrot.slane %v1325_v18, 6  ;;  %v4760_v11 = vld [vmem:[#allocation2 + $0xac] ss:$16 sps:$4 sm:$0xff]   ;;  %v4763_v14 = vld [vmem:[#allocation2 + $0xa0] ss:$16 sps:$4 sm:$0xff]  }
 0x284   :  { %v1337_v26 = vsel %vm1063_vm1, %v1336_v41, %v1335_v20  ;;  %5401 = vst [vmem:[#allocation26_spill] sm:$0xff] %v4760_v11  ;;  %5402 = vst [vmem:[#allocation21_spill] sm:$0xff] %v4763_v14  ;;  %v4766_v18 = vld [vmem:[#allocation2 + $0xa8] ss:$16 sps:$4 sm:$0xff]   ;;  %v4769_v20 = vld [vmem:[#allocation2 + $0xc4] ss:$16 sps:$4 sm:$0xff]  }
 0x285   :  { %v1339_v44 = vsel %vm1066_vm2, %v1338_v43, %v1337_v26  ;;  %5403 = vst [vmem:[#allocation19_spill] sm:$0xff] %v4766_v18  ;;  %5404 = vst [vmem:[#allocation20_spill] sm:$0xff] %v4769_v20  ;;  %v4772_v41 = vld [vmem:[#allocation2 + $0xcc] ss:$16 sps:$4 sm:$0xff]   ;;  %v4775_v43 = vld [vmem:[#allocation2 + $0xc0] ss:$16 sps:$4 sm:$0xff]  }
 0x286   :  { %v1341_v3 = vmul.f32 %v1339_v44, %v4592_v13  ;;  %5405 = vst [vmem:[#allocation23_spill] sm:$0xff] %v4772_v41  ;;  %5406 = vst [vmem:[#allocation33_spill] sm:$0xff] %v4775_v43  ;;  %v4778_v26 = vld [vmem:[#allocation2 + $0xc8] ss:$16 sps:$4 sm:$0xff]   ;;  %v4781_v44 = vld [vmem:[#allocation2 + $0xe4] ss:$16 sps:$4 sm:$0xff]  }
 0x287   :  { %5407 = vst [vmem:[#allocation34_spill] sm:$0xff] %v4778_v26  ;;  %5408 = vst [vmem:[#allocation35_spill] sm:$0xff] %v4781_v44 }
 0x288   :  { %v4697_v19 = vadd.f32 %v1346_v15, %v1341_v3  ;;  %v4784_v15 = vld [vmem:[#allocation2 + $0xec] ss:$16 sps:$4 sm:$0xff]   ;;  %v4787_v3 = vld [vmem:[#allocation2 + $0xe0] ss:$16 sps:$4 sm:$0xff]  }
 0x289   :  { %5409 = vst [vmem:[#allocation36_spill] sm:$0xff] %v4784_v15  ;;  %5410 = vst [vmem:[#allocation37_spill] sm:$0xff] %v4787_v3 }
 0x28a   :  { %v1362_v48 = vpack.c.bf16 %v4697_v19, %v4697_v19 }
 0x28c   :  { %1396 = vmatmul.mubr.bf16.vlgmr.msra.gmra.mrb[16].mxu1 %v1362_v48  ;;  %1437 = vmatmul.mubr.bf16.vlgmr.msra.gmra.mrb[20].mxu0 %v1362_v48  ;;  %v4790_v48 = vld [vmem:[#allocation2 + $0xe8] ss:$16 sps:$4 sm:$0xff]  }
 0x28d   :  { %1635 = vmatpush1.bf16.msra.mxu1 %v4701_v37  ;;  %1676 = vmatpush1.bf16.msra.mxu0 %v4704_v1  ;;  %5411 = vst [vmem:[#allocation38_spill] sm:$0xff] %v4790_v48 }
 0x28e   :  { %1636 = vmatprep.subr.bf16.mxu1 %v4707_v42  ;;  %1677 = vmatprep.subr.bf16.mxu0 %v4710_v10 }
 0x28f   :  { %1666 = vmatprep.mubr.bf16.mxu1 %v5377_v39  ;;  %1707 = vmatprep.mubr.bf16.mxu0 %v5377_v39 }
 0x291   :  { %1637 = vmatpush1.bf16.msra.mxu1 %v4715_v56  ;;  %1678 = vmatpush1.bf16.msra.mxu0 %v4718_v29 }
 0x292   :  { %1638 = vmatprep.subr.bf16.mxu1 %v4721_v46  ;;  %1679 = vmatprep.subr.bf16.mxu0 %v4724_v23 }
 0x295   :  { %1639 = vmatpush1.bf16.msra.mxu1 %v4727_v54  ;;  %1680 = vmatpush1.bf16.msra.mxu0 %v4730_v47 }
 0x296   :  { %1640 = vmatprep.subr.bf16.mxu1 %v4733_v49  ;;  %1681 = vmatprep.subr.bf16.mxu0 %v4736_v33 }
 0x299   :  { %1641 = vmatpush1.bf16.msra.mxu1 %v4739_v4  ;;  %1682 = vmatpush1.bf16.msra.mxu0 %v4742_v59 }
 0x29a   :  { %1642 = vmatprep.subr.bf16.mxu1 %v4745_v5  ;;  %1683 = vmatprep.subr.bf16.mxu0 %v4748_v12 }
 0x29d   :  { %1643 = vmatpush1.bf16.msra.mxu1 %v4751_v6  ;;  %1684 = vmatpush1.bf16.msra.mxu0 %v4754_v8 }
 0x29e   :  { %1644 = vmatprep.subr.bf16.mxu1 %v4757_v9  ;;  %1685 = vmatprep.subr.bf16.mxu0 %v4760_v11 }
 0x2a1   :  { %1645 = vmatpush1.bf16.msra.mxu1 %v4763_v14  ;;  %1686 = vmatpush1.bf16.msra.mxu0 %v4766_v18 }
 0x2a2   :  { %1646 = vmatprep.subr.bf16.mxu1 %v4769_v20  ;;  %1687 = vmatprep.subr.bf16.mxu0 %v4772_v41 }
 0x2a5   :  { %1647 = vmatpush1.bf16.msra.mxu1 %v4775_v43  ;;  %1688 = vmatpush1.bf16.msra.mxu0 %v4778_v26 }
 0x2a6   :  { %1648 = vmatprep.subr.bf16.mxu1 %v4781_v44  ;;  %1689 = vmatprep.subr.bf16.mxu0 %v4784_v15 }
 0x2a9   :  { %1649 = vmatpush1.bf16.msra.mxu1 %v4787_v3  ;;  %1690 = vmatpush1.bf16.msra.mxu0 %v4790_v48 }
 0x2aa   :  { %1905 = vmatprep.subr.bf16.mxu1 %v4793_v2  ;;  %1946 = vmatprep.subr.bf16.mxu0 %v4796_v61  ;;  %v5415_v2 = vsub.s32 1, %v4499_v7 }
 0x2e7   :  { %v252_v51 = vpop.xlane.xlu0 %251 }
 0x2e8   :  { %v253_v53 = vadd.f32 1e-09, %v252_v51  ;;  %v4018_v51 = vld [vmem:[%s5257_s3] sm:$0xf]  ;;  %s4110_s3 = smov [#allocation5]  }
 0x2e9   :  { %s3104_s12 = sshll.u32 %s4110_s3, 4  ;;  %s3105_s12 = int_to_ptr.vmem [resolvable:$true] %s3104_s12 }
 0x2ea   :  { %3590 = vrcp.f32 %v253_v53  ;;  %v5416_v53 = vld [vmem:[#allocation9_spill] sm:$0xff]  ;;  %s4073_s13 = scalar_lea.vmem %s3105_s12, 16  ;;  %s4077_s14 = scalar_lea.vmem %s3105_s12, 32 }
 0x2eb   :  { %p4074_p8 = scmp.ne.s32.totalorder %s3105_s12, %s4073_s13  ;;  %p4078_p9 = scmp.lt.s32.totalorder %s3105_s12, %s3105_s12 }
 0x2ec   :  { %p4079_p10 = scmp.lt.s32.totalorder %s4077_s14, %s4073_s13 }
 0x2ee   :  { %p4080_p11 = por %p4079_p10, %p4078_p9 }
 0x2f0   :  { %p4081_p12 = pnand %p4080_p11, %p4074_p8 }
 0x2f4   :  { %v3591_v36 = vpop.eup %3590 }
 0x2f5   :  { %v255_v45 = vmul.f32 %v3591_v36, %v4677_v31 }
 0x2f7   :  { %v259_v48 = vrot.slane %v255_v45, %v5414_v34  ;;  %v270_v3 = vrot.slane %v255_v45, %v5415_v2 }
 0x2f9   :  { %265 = vbcast.lane.b32.xlu0 %v259_v48, 264  ;;  %261 = vbcast.lane.b32.xlu1 %v259_v48, 256 }
 0x2fd   :  { %272 = vbcast.lane.b32.xlu1 %v270_v3, 256  ;;  %2979 = vperm.xlu0 %3342, %v4018_v51  }
 0x301   :  { %276 = vbcast.lane.b32.xlu1 %v270_v3, 264 }
 0x305   :  { %2996 = vperm.xlu1 %3343, %v5416_v53  }
 0x35f   :  { %v1397_v40 = vpop.f32.mrb[16].mxu1  ;;  %v1438_v61 = vpop.f32.mrb[20].mxu0 }
 0x360   :  { %v1449_v36 = vrot.slane %v1397_v40, 6  ;;  %v1453_v31 = vrot.slane %v1397_v40, 7  ;;  %v1457_v15 = vrot.slane %v1397_v40, 1  ;;  %v1485_v34 = vadd.f32 %v1397_v40, %v4517_v27  ;;  %v1399_v48 = vpop.f32.mrb[17].mxu1  ;;  %v1440_v44 = vpop.f32.mrb[21].mxu0 }
 0x361   :  { %v1451_v7 = vrot.slane %v1438_v61, 6  ;;  %v1455_v45 = vrot.slane %v1438_v61, 7  ;;  %v1459_v2 = vrot.slane %v1438_v61, 1  ;;  %v1487_v26 = vadd.f32 %v1438_v61, %v4560_v58  ;;  %v1401_v43 = vpop.f32.mrb[18].mxu1  ;;  %v1442_v41 = vpop.f32.mrb[22].mxu0 }
 0x362   :  { %v1477_v3 = vadd.f32 %v1449_v36, %v5390_v22  ;;  %v1481_v51 = vadd.f32 %v1453_v31, %v4523_v35  ;;  %v1489_v53 = vadd.f32 %v1457_v15, %v4519_v28  ;;  %v3217_v20 = vmul.f32 -1.442695, %v1485_v34  ;;  %v1402_v18 = vpop.f32.mrb[19].mxu1  ;;  %v1443_v14 = vpop.f32.mrb[23].mxu0 }
 0x363   :  { %v1479_v40 = vadd.f32 %v1451_v7, %v4550_v52  ;;  %v1483_v27 = vadd.f32 %v1455_v45, %v4556_v57  ;;  %v1491_v11 = vadd.f32 %v1459_v2, %v5391_v63  ;;  %3592 = vtanh.f32 %v1487_v26 }
 0x364   :  { %v3215_v9 = vmul.f32 -1.442695, %v1477_v3  ;;  %v3216_v61 = vmul.f32 -1.442695, %v1481_v51  ;;  %3594 = vpow2.f32 %v3217_v20  ;;  %v3218_v41 = vmul.f32 -1.442695, %v1489_v53 }
 0x365   :  { %3596 = vtanh.f32 %v1479_v40  ;;  %v1450_v43 = vrot.slane %v1399_v48, 6  ;;  %v1454_v36 = vrot.slane %v1399_v48, 7  ;;  %v1458_v31 = vrot.slane %v1399_v48, 1 }
 0x366   :  { %3598 = vpow2.f32 %v3215_v9  ;;  %v1486_v15 = vadd.f32 %v1399_v48, %v5394_v21  ;;  %v1452_v18 = vrot.slane %v1440_v44, 6  ;;  %v1456_v14 = vrot.slane %v1440_v44, 7 }
 0x367   :  { %3600 = vpow2.f32 %v3216_v61  ;;  %v1478_v34 = vadd.f32 %v1450_v43, %v5393_v0  ;;  %v1482_v7 = vadd.f32 %v1454_v36, %v5392_v17  ;;  %v1490_v26 = vadd.f32 %v1458_v31, %v5395_v60  ;;  %v5417_v31 = vld [vmem:[#allocation14_spill] sm:$0xff] }
 0x368   :  { %3602 = vpow2.f32 %v3218_v41  ;;  %v3221_v45 = vmul.f32 -1.442695, %v1486_v15  ;;  %v1480_v20 = vadd.f32 %v1452_v18, %v5396_v16  ;;  %v1460_v51 = vrot.slane %v1440_v44, 1 }
 0x369   :  { %3604 = vtanh.f32 %v1483_v27  ;;  %v3219_v2 = vmul.f32 -1.442695, %v1478_v34  ;;  %v3220_v3 = vmul.f32 -1.442695, %v1482_v7  ;;  %v3222_v9 = vmul.f32 -1.442695, %v1490_v26 }
 0x36a   :  { %3606 = vtanh.f32 %v1491_v11  ;;  %v1484_v48 = vadd.f32 %v1456_v14, %v5397_v24  ;;  %v1488_v53 = vadd.f32 %v1440_v44, %v5398_v62  ;;  %v3223_v40 = vmul.f32 -1.442695, %v1480_v20  ;;  %v5418_v27 = vld [vmem:[#allocation12_spill] sm:$0xff] }
 0x36b   :  { %3608 = vpow2.f32 %v3219_v2  ;;  %v266_v61 = vpop.permute.xlu0 %265  ;;  %v262_v43 = vpop.permute.xlu1 %261  ;;  %v1492_v11 = vadd.f32 %v1460_v51, %v5399_v55 }
 0x36c   :  { %3610 = vpow2.f32 %v3220_v3  ;;  %v3224_v36 = vmul.f32 -1.442695, %v1484_v48  ;;  %v279_v15 = vmul.f32 %v5417_v31, %v266_v61  ;;  %v278_v18 = vmul.f32 %v5418_v27, %v262_v43 }
 0x36d   :  { %v3593_v41 = vpop.eup %3592  ;;  %3612 = vpow2.f32 %v3221_v45  ;;  %v3225_v7 = vmul.f32 -1.442695, %v1488_v53  ;;  %v3226_v43 = vmul.f32 -1.442695, %v1492_v11 }
 0x36e   :  { %v3595_v34 = vpop.eup %3594  ;;  %3614 = vpow2.f32 %v3222_v9  ;;  %v282_v44 = vadd.f32 %v279_v15, %v278_v18  ;;  %v5420_v18 = vld [vmem:[#allocation15_spill] sm:$0xff] }
 0x36f   :  { %v3597_v14 = vpop.eup %3596  ;;  %v1507_v26 = vadd.f32 1.0, %v3595_v34  ;;  %3616 = vpow2.f32 %v3223_v40  ;;  %v273_v20 = vpop.permute.xlu1 %272  ;;  %v5419_v40 = vld [vmem:[#allocation13_spill] sm:$0xff] }
 0x370   :  { %v3599_v2 = vpop.eup %3598  ;;  %3618 = vpow2.f32 %v3224_v36  ;;  %v283_v45 = vrot.slane %v282_v44, 4  ;;  %v280_v15 = vmul.f32 %v5419_v40, %v273_v20  ;;  %v1359_v20 = vmul.f32 %v4689_v50, %v4592_v13 }
 0x371   :  { %v3601_v3 = vpop.eup %3600  ;;  %v1505_v48 = vadd.f32 1.0, %v3599_v2  ;;  %3620 = vrcp.f32 %v1507_v26 }
 0x372   :  { %v3603_v62 = vpop.eup %3602  ;;  %v1506_v61 = vadd.f32 1.0, %v3601_v3  ;;  %3622 = vpow2.f32 %v3225_v7  ;;  %v284_v51 = vadd.f32 %v283_v45, %v282_v44 }
 0x373   :  { %v3605_v31 = vpop.eup %3604  ;;  %v1508_v9 = vadd.f32 1.0, %v3603_v62  ;;  %3624 = vrcp.f32 %v1505_v48  ;;  %v277_v53 = vpop.permute.xlu1 %276 }
 0x374   :  { %v3607_v27 = vpop.eup %3606  ;;  %3626 = vrcp.f32 %v1506_v61  ;;  %v281_v34 = vmul.f32 %v5420_v18, %v277_v53  ;;  %v285_v2 = vrot.slane %v284_v51, 2 }
 0x375   :  { %v3609_v36 = vpop.eup %3608  ;;  %3628 = vrcp.f32 %v1508_v9 }
 0x376   :  { %v3611_v26 = vpop.eup %3610  ;;  %v1529_v55 = vadd.f32 1.0, %v3609_v36  ;;  %3630 = vpow2.f32 %v3226_v43  ;;  %v289_v3 = vadd.f32 %v281_v34, %v280_v15  ;;  %v286_v44 = vadd.f32 %v285_v2, %v284_v51 }
 0x377   :  { %v3613_v7 = vpop.eup %3612  ;;  %v1530_v11 = vadd.f32 1.0, %v3611_v26  ;;  %v1360_v43 = vmul.f32 %v4602_v30, %v4582_v25 }
 0x378   :  { %v3615_v24 = vpop.eup %3614  ;;  %v1531_v62 = vadd.f32 1.0, %v3613_v7  ;;  %3632 = vrcp.f32 %v1529_v55  ;;  %v290_v48 = vrot.slane %v289_v3, 4  ;;  %v287_v34 = vrot.slane %v286_v44, 1 }
 0x379   :  { %v3617_v45 = vpop.eup %3616  ;;  %v1532_v61 = vadd.f32 1.0, %v3615_v24  ;;  %3634 = vrcp.f32 %v1530_v11  ;;  %v4832_v36 = vadd.f32 %v1360_v43, %v1359_v20 }
 0x37a   :  { %v3619_v53 = vpop.eup %3618  ;;  %3636 = vrcp.f32 %v1531_v62  ;;  %v291_v9 = vadd.f32 %v290_v48, %v289_v3  ;;  %v1557_v7 = vadd.f32 1.0, %v3617_v45  ;;  %v4834_v48 = vadd.f32 %v287_v34, %v286_v44 }
 0x37b   :  { %v3621_v40 = vpop.eup %3620  ;;  %3638 = vrcp.f32 %v1532_v61  ;;  %v1558_v62 = vadd.f32 1.0, %v3619_v53  ;;  %v1570_v30 = vrot.slane %v4832_v36, 6 }
 0x37c   :  { %v3623_v15 = vpop.eup %3622  ;;  %v1583_v18 = vmul.f32 %v3621_v40, %v3593_v41  ;;  %v292_v55 = vrot.slane %v291_v9, 2  ;;  %5421 = vst [vmem:[#allocation9_spill] sm:$0xff] %v4834_v48  ;;  %v1571_v40 = vrot.slane %v4832_v36, 7  ;;  %3640 = vrcp.f32 %v1557_v7 }
 0x37d   :  { %v3625_v51 = vpop.eup %3624  ;;  %v1559_v41 = vadd.f32 1.0, %v3623_v15  ;;  %3642 = vrcp.f32 %v1558_v62  ;;  %v3001_v44 = vmul.f32 %v4834_v48, %v4834_v48 }
 0x37e   :  { %v3627_v2 = vpop.eup %3626  ;;  %v1581_v26 = vmul.f32 %v3625_v51, %v3597_v14  ;;  %v293_v13 = vadd.f32 %v292_v55, %v291_v9  ;;  %v1572_v9 = vrot.slane %v4832_v36, 1 }
 0x37f   :  { %v3629_v24 = vpop.eup %3628  ;;  %v1582_v50 = vmul.f32 %v3627_v2, %v3605_v31  ;;  %3644 = vrcp.f32 %v1559_v41 }
 0x380   :  { %v3631_v11 = vpop.eup %3630  ;;  %v1584_v3 = vmul.f32 %v3629_v24, %v3607_v27  ;;  %v294_v25 = vrot.slane %v293_v13, 1 }
 0x381   :  { %v1560_v20 = vadd.f32 1.0, %v3631_v11 }
 0x382   :  { %v3633_v61 = vpop.eup %3632  ;;  %v4838_v43 = vadd.f32 %v294_v25, %v293_v13 }
 0x383   :  { %v3635_v14 = vpop.eup %3634  ;;  %v1577_v31 = vmul.f32 %v3633_v61, %v1570_v30  ;;  %3646 = vrcp.f32 %v1560_v20 }
 0x384   :  { %5422 = vst [vmem:[#allocation14_spill] sm:$0xff] %v4838_v43  ;;  %v3637_v27 = vpop.eup %3636  ;;  %v1578_v45 = vmul.f32 %v3635_v14, %v1571_v40  ;;  %v3002_v53 = vmul.f32 %v4838_v43, %v4838_v43 }
 0x385   :  { %v3639_v15 = vpop.eup %3638  ;;  %v1579_v34 = vmul.f32 %v3637_v27, %v4832_v36  ;;  %v1585_v55 = vadd.f32 %v1581_v26, %v1577_v31 }
 0x386   :  { %v1580_v51 = vmul.f32 %v3639_v15, %v1572_v9  ;;  %v1586_v2 = vadd.f32 %v1582_v50, %v1578_v45  ;;  %v3005_v13 = vsel %vm238_vm0, %v3002_v53, %v3001_v44  ;;  %v3641_v61 = vpop.eup %3640 }
 0x387   :  { %v1587_v24 = vadd.f32 %v1583_v18, %v1579_v34  ;;  %3648 = vtanh.f32 %v1585_v55  ;;  %v1623_v7 = vrot.slane %v1585_v55, 2  ;;  %v3008_v11 = vsel %vm3007_vm6, %v3005_v13, 0.0  ;;  %v3643_v18 = vpop.eup %3642 }
 0x388   :  { %v1588_v62 = vadd.f32 %v1584_v3, %v1580_v51  ;;  %3650 = vtanh.f32 %v1586_v2  ;;  %v1624_v25 = vrot.slane %v1586_v2, 1  ;;  %3009 = vadd.xlane.f32.xlu1 %v3008_v11 }
 0x389   :  { %3652 = vtanh.f32 %v1587_v24  ;;  %v3645_v40 = vpop.eup %3644 }
 0x38a   :  { %3654 = vtanh.f32 %v1588_v62  ;;  %v1625_v30 = vsel %vm238_vm0, %v1624_v25, %v1623_v7  ;;  %v1627_v26 = vrot.slane %v1588_v62, 7  ;;  %v1617_v7 = vmul.f32 %v4608_v32, %v4697_v19  ;;  %v5423_v19 = vld [vmem:[#allocation16_spill] sm:$0xff]  ;;  %v5424_v25 = vld [vmem:[#allocation26_spill] sm:$0xff] }
 0x38b   :  { %v1626_v41 = vsel %vm1063_vm1, %v1587_v24, %v1625_v30  ;;  %v5425_v30 = vld [vmem:[#allocation21_spill] sm:$0xff] }
 0x38c   :  { %v4851_v50 = vsel %vm1066_vm2, %v1627_v26, %v1626_v41  ;;  %v5426_v26 = vld [vmem:[#allocation19_spill] sm:$0xff]  ;;  %v5427_v41 = vld [vmem:[#allocation20_spill] sm:$0xff] }
 0x38d   :  { %v3647_v20 = vpop.eup %3646 }
 0x391   :  { %v3649_v14 = vpop.eup %3648 }
 0x392   :  { %v3651_v9 = vpop.eup %3650  ;;  %v1593_v3 = vmul.f32 %v3649_v14, %v3641_v61  ;;  %v5428_v61 = vld [vmem:[#allocation23_spill] sm:$0xff]  ;;  %v5432_v14 = vld [vmem:[#allocation36_spill] sm:$0xff] }
 0x393   :  { %v3653_v31 = vpop.eup %3652  ;;  %v1594_v27 = vmul.f32 %v3651_v9, %v3643_v18  ;;  %v5429_v18 = vld [vmem:[#allocation33_spill] sm:$0xff] }
 0x394   :  { %v3655_v45 = vpop.eup %3654  ;;  %v1595_v44 = vmul.f32 %v3653_v31, %v3645_v40  ;;  %v1605_v53 = vrot.slane %v1593_v3, 2  ;;  %v5430_v40 = vld [vmem:[#allocation34_spill] sm:$0xff]  ;;  %v5433_v9 = vld [vmem:[#allocation37_spill] sm:$0xff]  ;;  %v5435_v31 = vld [vmem:[#allocation39_spill] sm:$0xff] }
 0x395   :  { %v1596_v15 = vmul.f32 %v3655_v45, %v3647_v20  ;;  %v1606_v34 = vrot.slane %v1594_v27, 1  ;;  %v5431_v20 = vld [vmem:[#allocation35_spill] sm:$0xff]  ;;  %v5434_v3 = vld [vmem:[#allocation38_spill] sm:$0xff]  ;;  %v5436_v27 = vld [vmem:[#allocation40_spill] sm:$0xff] }
 0x397   :  { %v1607_v55 = vsel %vm238_vm0, %v1606_v34, %v1605_v53  ;;  %v1609_v51 = vrot.slane %v1596_v15, 7 }
 0x398   :  { %v1608_v2 = vsel %vm1063_vm1, %v1595_v44, %v1607_v55 }
 0x399   :  { %v1610_v13 = vsel %vm1066_vm2, %v1609_v51, %v1608_v2 }
 0x39a   :  { %v1612_v24 = vmul.f32 %v1610_v13, %v4628_v38 }
 0x39c   :  { %v4859_v11 = vadd.f32 %v1617_v7, %v1612_v24 }
 0x39e   :  { %v1633_v62 = vpack.c.bf16 %v4859_v11, %v4859_v11 }
 0x3a0   :  { %1667 = vmatmul.mubr.bf16.vlgmr.msra.gmra.mrb[20].mxu1 %v1633_v62  ;;  %1708 = vmatmul.mubr.bf16.vlgmr.msra.gmra.mrb[24].mxu0 %v1633_v62 }
 0x3a1   :  { %1906 = vmatpush1.bf16.msra.mxu1 %v4701_v37  ;;  %1947 = vmatpush1.bf16.msra.mxu0 %v4704_v1 }
 0x3a2   :  { %1907 = vmatprep.subr.bf16.mxu1 %v4707_v42  ;;  %1948 = vmatprep.subr.bf16.mxu0 %v4710_v10 }
 0x3a3   :  { %1937 = vmatprep.mubr.bf16.mxu1 %v5377_v39  ;;  %1978 = vmatprep.mubr.bf16.mxu0 %v5377_v39 }
 0x3a5   :  { %1908 = vmatpush1.bf16.msra.mxu1 %v4715_v56  ;;  %1949 = vmatpush1.bf16.msra.mxu0 %v4718_v29 }
 0x3a6   :  { %1909 = vmatprep.subr.bf16.mxu1 %v4721_v46  ;;  %1950 = vmatprep.subr.bf16.mxu0 %v4724_v23 }
 0x3a9   :  { %1910 = vmatpush1.bf16.msra.mxu1 %v4727_v54  ;;  %1951 = vmatpush1.bf16.msra.mxu0 %v4730_v47 }
 0x3aa   :  { %1911 = vmatprep.subr.bf16.mxu1 %v4733_v49  ;;  %1952 = vmatprep.subr.bf16.mxu0 %v4736_v33 }
 0x3ad   :  { %1912 = vmatpush1.bf16.msra.mxu1 %v4739_v4  ;;  %1953 = vmatpush1.bf16.msra.mxu0 %v4742_v59 }
 0x3ae   :  { %1913 = vmatprep.subr.bf16.mxu1 %v4745_v5  ;;  %1954 = vmatprep.subr.bf16.mxu0 %v4748_v12 }
 0x3b1   :  { %1914 = vmatpush1.bf16.msra.mxu1 %v4751_v6  ;;  %1955 = vmatpush1.bf16.msra.mxu0 %v4754_v8 }
 0x3b2   :  { %1915 = vmatprep.subr.bf16.mxu1 %v5423_v19  ;;  %1956 = vmatprep.subr.bf16.mxu0 %v5424_v25 }
 0x3b5   :  { %1916 = vmatpush1.bf16.msra.mxu1 %v5425_v30  ;;  %1957 = vmatpush1.bf16.msra.mxu0 %v5426_v26 }
 0x3b6   :  { %1917 = vmatprep.subr.bf16.mxu1 %v5427_v41  ;;  %1958 = vmatprep.subr.bf16.mxu0 %v5428_v61 }
 0x3b9   :  { %1918 = vmatpush1.bf16.msra.mxu1 %v5429_v18  ;;  %1959 = vmatpush1.bf16.msra.mxu0 %v5430_v40 }
 0x3ba   :  { %1919 = vmatprep.subr.bf16.mxu1 %v5431_v20  ;;  %1960 = vmatprep.subr.bf16.mxu0 %v5432_v14 }
 0x3bd   :  { %1920 = vmatpush1.bf16.msra.mxu1 %v5433_v9  ;;  %1961 = vmatpush1.bf16.msra.mxu0 %v5434_v3  ;;  %v5437_v3 = vld [vmem:[#allocation17_spill] sm:$0xff] }
 0x3be   :  { %2183 = vmatprep.subr.bf16.mxu1 %v5435_v31  ;;  %2224 = vmatprep.subr.bf16.mxu0 %v5436_v27 }
 0x473   :  { %v1668_v45 = vpop.f32.mrb[20].mxu1  ;;  %v1709_v44 = vpop.f32.mrb[24].mxu0 }
 0x474   :  { %v1720_v53 = vrot.slane %v1668_v45, 5  ;;  %v1724_v15 = vrot.slane %v1668_v45, 6  ;;  %v1728_v34 = vrot.slane %v1668_v45, 7  ;;  %v1760_v55 = vadd.f32 %v1668_v45, %v4519_v28  ;;  %v1670_v51 = vpop.f32.mrb[21].mxu1  ;;  %v1711_v2 = vpop.f32.mrb[25].mxu0 }
 0x475   :  { %v1722_v13 = vrot.slane %v1709_v44, 5  ;;  %v1726_v24 = vrot.slane %v1709_v44, 6  ;;  %v1730_v7 = vrot.slane %v1709_v44, 7  ;;  %v1762_v62 = vadd.f32 %v1709_v44, %v5391_v63  ;;  %v1672_v48 = vpop.f32.mrb[22].mxu1  ;;  %v1713_v43 = vpop.f32.mrb[26].mxu0 }
 0x476   :  { %v1748_v31 = vadd.f32 %v1720_v53, %v5390_v22  ;;  %v1752_v27 = vadd.f32 %v1724_v15, %v4523_v35  ;;  %v1756_v9 = vadd.f32 %v1728_v34, %v5437_v3  ;;  %v3230_v14 = vmul.f32 -1.442695, %v1760_v55  ;;  %v1673_v20 = vpop.f32.mrb[23].mxu1  ;;  %v1714_v40 = vpop.f32.mrb[27].mxu0 }
 0x477   :  { %v1750_v45 = vadd.f32 %v1722_v13, %v4550_v52  ;;  %v1754_v28 = vadd.f32 %v1726_v24, %v4556_v57  ;;  %v1758_v18 = vadd.f32 %v1730_v7, %v4560_v58  ;;  %3656 = vtanh.f32 %v1762_v62 }
 0x478   :  { %v3227_v61 = vmul.f32 -1.442695, %v1748_v31  ;;  %v3228_v44 = vmul.f32 -1.442695, %v1752_v27  ;;  %v3229_v48 = vmul.f32 -1.442695, %v1756_v9  ;;  %3658 = vpow2.f32 %v3230_v14 }
 0x479   :  { %3660 = vtanh.f32 %v1750_v45  ;;  %v1721_v43 = vrot.slane %v1670_v51, 5  ;;  %v1725_v53 = vrot.slane %v1670_v51, 6  ;;  %v1729_v15 = vrot.slane %v1670_v51, 7  ;;  %v5439_v45 = vld [vmem:[#allocation25_spill] sm:$0xff] }
 0x47a   :  { %3662 = vpow2.f32 %v3227_v61  ;;  %v1761_v34 = vadd.f32 %v1670_v51, %v5395_v60  ;;  %v1723_v20 = vrot.slane %v1711_v2, 5  ;;  %v1727_v40 = vrot.slane %v1711_v2, 6  ;;  %v5438_v51 = vld [vmem:[#allocation24_spill] sm:$0xff] }
 0x47b   :  { %3664 = vpow2.f32 %v3228_v44  ;;  %v1749_v55 = vadd.f32 %v1721_v43, %v5393_v0  ;;  %v1753_v13 = vadd.f32 %v1725_v53, %v5392_v17  ;;  %v1757_v24 = vadd.f32 %v1729_v15, %v5394_v21  ;;  %v5440_v15 = vld [vmem:[#allocation27_spill] sm:$0xff] }
 0x47c   :  { %3666 = vpow2.f32 %v3229_v48  ;;  %v1731_v31 = vrot.slane %v1711_v2, 7  ;;  %v1751_v14 = vadd.f32 %v1723_v20, %v5396_v16  ;;  %v3234_v61 = vmul.f32 -1.442695, %v1761_v34 }
 0x47d   :  { %3668 = vtanh.f32 %v1754_v28  ;;  %v3231_v9 = vmul.f32 -1.442695, %v1749_v55  ;;  %v3232_v27 = vmul.f32 -1.442695, %v1753_v13  ;;  %v3233_v7 = vmul.f32 -1.442695, %v1757_v24 }
 0x47e   :  { %3670 = vtanh.f32 %v1758_v18  ;;  %v1755_v62 = vadd.f32 %v1727_v40, %v5438_v51  ;;  %v1759_v44 = vadd.f32 %v1731_v31, %v5439_v45  ;;  %v3235_v43 = vmul.f32 -1.442695, %v1751_v14 }
 0x47f   :  { %3672 = vpow2.f32 %v3231_v9  ;;  %v1763_v20 = vadd.f32 %v1711_v2, %v5440_v15 }
 0x480   :  { %3674 = vpow2.f32 %v3232_v27  ;;  %v3236_v53 = vmul.f32 -1.442695, %v1755_v62  ;;  %v3237_v28 = vmul.f32 -1.442695, %v1759_v44 }
 0x481   :  { %v3657_v60 = vpop.eup %3656  ;;  %3676 = vpow2.f32 %v3233_v7  ;;  %v3238_v14 = vmul.f32 -1.442695, %v1763_v20 }
 0x482   :  { %v3659_v48 = vpop.eup %3658  ;;  %3678 = vpow2.f32 %v3234_v61 }
 0x483   :  { %v3661_v55 = vpop.eup %3660  ;;  %v1779_v13 = vadd.f32 1.0, %v3659_v48  ;;  %3680 = vpow2.f32 %v3235_v43 }
 0x484   :  { %v3663_v18 = vpop.eup %3662  ;;  %3682 = vpow2.f32 %v3236_v53 }
 0x485   :  { %v3665_v34 = vpop.eup %3664  ;;  %v1776_v40 = vadd.f32 1.0, %v3663_v18  ;;  %3684 = vrcp.f32 %v1779_v13 }
 0x486   :  { %v3667_v24 = vpop.eup %3666  ;;  %v1777_v31 = vadd.f32 1.0, %v3665_v34  ;;  %3686 = vpow2.f32 %v3237_v28  ;;  %v1630_v28 = vmul.f32 %v4851_v50, %v4628_v38 }
 0x487   :  { %v3669_v9 = vpop.eup %3668  ;;  %v1778_v27 = vadd.f32 1.0, %v3667_v24  ;;  %3688 = vrcp.f32 %v1776_v40  ;;  %v1631_v40 = vmul.f32 %v4608_v32, %v4832_v36 }
 0x488   :  { %v3671_v7 = vpop.eup %3670  ;;  %3690 = vrcp.f32 %v1777_v31 }
 0x489   :  { %v3673_v61 = vpop.eup %3672  ;;  %3692 = vrcp.f32 %v1778_v27  ;;  %v4917_v27 = vadd.f32 %v1631_v40, %v1630_v28 }
 0x48a   :  { %v3675_v2 = vpop.eup %3674  ;;  %v1800_v62 = vadd.f32 1.0, %v3673_v61  ;;  %3694 = vpow2.f32 %v3238_v14 }
 0x48b   :  { %v3677_v44 = vpop.eup %3676  ;;  %v1801_v43 = vadd.f32 1.0, %v3675_v2  ;;  %v1842_v32 = vrot.slane %v4917_v27, 6 }
 0x48c   :  { %v3679_v53 = vpop.eup %3678  ;;  %v1802_v48 = vadd.f32 1.0, %v3677_v44  ;;  %3696 = vrcp.f32 %v1800_v62 }
 0x48d   :  { %v3681_v13 = vpop.eup %3680  ;;  %v1803_v20 = vadd.f32 1.0, %v3679_v53  ;;  %3698 = vrcp.f32 %v1801_v43  ;;  %v1841_v53 = vrot.slane %v4917_v27, 5 }
 0x48e   :  { %v3683_v18 = vpop.eup %3682  ;;  %3700 = vrcp.f32 %v1802_v48  ;;  %v1828_v15 = vadd.f32 1.0, %v3681_v13 }
 0x48f   :  { %v3685_v34 = vpop.eup %3684  ;;  %3702 = vrcp.f32 %v1803_v20  ;;  %v1829_v43 = vadd.f32 1.0, %v3683_v18 }
 0x490   :  { %v3687_v24 = vpop.eup %3686  ;;  %v1855_v31 = vmul.f32 %v3685_v34, %v3657_v60  ;;  %v1843_v60 = vrot.slane %v4917_v27, 7  ;;  %3704 = vrcp.f32 %v1828_v15 }
 0x491   :  { %v3689_v14 = vpop.eup %3688  ;;  %v1830_v48 = vadd.f32 1.0, %v3687_v24  ;;  %3706 = vrcp.f32 %v1829_v43 }
 0x492   :  { %v3691_v61 = vpop.eup %3690  ;;  %v1852_v2 = vmul.f32 %v3689_v14, %v3661_v55 }
 0x493   :  { %v3693_v62 = vpop.eup %3692  ;;  %v1853_v44 = vmul.f32 %v3691_v61, %v3669_v9  ;;  %3708 = vrcp.f32 %v1830_v48 }
 0x494   :  { %v3695_v38 = vpop.eup %3694  ;;  %v1854_v50 = vmul.f32 %v3693_v62, %v3671_v7 }
 0x495   :  { %v1831_v36 = vadd.f32 1.0, %v3695_v38 }
 0x496   :  { %v3697_v45 = vpop.eup %3696 }
 0x497   :  { %v3699_v20 = vpop.eup %3698  ;;  %v1848_v28 = vmul.f32 %v3697_v45, %v1841_v53  ;;  %3710 = vrcp.f32 %v1831_v36 }
 0x498   :  { %v3701_v34 = vpop.eup %3700  ;;  %v1849_v55 = vmul.f32 %v3699_v20, %v1842_v32 }
 0x499   :  { %v3703_v9 = vpop.eup %3702  ;;  %v1850_v13 = vmul.f32 %v3701_v34, %v1843_v60  ;;  %v1856_v40 = vadd.f32 %v1852_v2, %v1848_v28 }
 0x49a   :  { %v1851_v7 = vmul.f32 %v3703_v9, %v4917_v27  ;;  %v1857_v18 = vadd.f32 %v1853_v44, %v1849_v55  ;;  %v3705_v43 = vpop.eup %3704 }
 0x49b   :  { %v1858_v24 = vadd.f32 %v1854_v50, %v1850_v13  ;;  %3712 = vtanh.f32 %v1856_v40  ;;  %v1894_v14 = vrot.slane %v1856_v40, 3  ;;  %v3707_v53 = vpop.eup %3706 }
 0x49c   :  { %v1859_v61 = vadd.f32 %v1855_v31, %v1851_v7  ;;  %3714 = vtanh.f32 %v1857_v18  ;;  %v1895_v62 = vrot.slane %v1857_v18, 2 }
 0x49d   :  { %3716 = vtanh.f32 %v1858_v24  ;;  %v1897_v45 = vrot.slane %v1858_v24, 1  ;;  %v3709_v44 = vpop.eup %3708  ;;  %v5441_v24 = vld [vmem:[#allocation28_spill] sm:$0xff] }
 0x49e   :  { %3718 = vtanh.f32 %v1859_v61  ;;  %v1896_v15 = vsel %vm238_vm0, %v1895_v62, %v1894_v14 }
 0x49f   :  { %v1898_v38 = vsel %vm1063_vm1, %v1897_v45, %v1896_v15 }
 0x4a0   :  { %v4926_v2 = vsel %vm1066_vm2, %v1859_v61, %v1898_v38  ;;  %v5442_v61 = vld [vmem:[#allocation11_spill] sm:$0xff] }
 0x4a1   :  { %v3711_v48 = vpop.eup %3710  ;;  %v1888_v62 = vmul.f32 %v5442_v61, %v4859_v11 }
 0x4a5   :  { %v3713_v50 = vpop.eup %3712 }
 0x4a6   :  { %v3715_v32 = vpop.eup %3714  ;;  %v1864_v36 = vmul.f32 %v3713_v50, %v3705_v43  ;;  %v5452_v43 = vld [vmem:[#allocation18_spill] sm:$0xff] }
 0x4a7   :  { %v3717_v31 = vpop.eup %3716  ;;  %v1865_v20 = vmul.f32 %v3715_v32, %v3707_v53 }
 0x4a8   :  { %v3719_v60 = vpop.eup %3718  ;;  %v1866_v28 = vmul.f32 %v3717_v31, %v3709_v44  ;;  %v1876_v34 = vrot.slane %v1864_v36, 3 }
 0x4a9   :  { %v1867_v55 = vmul.f32 %v3719_v60, %v3711_v48  ;;  %v1877_v9 = vrot.slane %v1865_v20, 2 }
 0x4aa   :  { %v1879_v13 = vrot.slane %v1866_v28, 1 }
 0x4ab   :  { %v1878_v40 = vsel %vm238_vm0, %v1877_v9, %v1876_v34 }
 0x4ac   :  { %v1880_v7 = vsel %vm1063_vm1, %v1879_v13, %v1878_v40 }
 0x4ad   :  { %v1881_v18 = vsel %vm1066_vm2, %v1867_v55, %v1880_v7 }
 0x4ae   :  { %v1883_v14 = vmul.f32 %v1881_v18, %v5441_v24 }
 0x4b0   :  { %v4934_v45 = vadd.f32 %v1888_v62, %v1883_v14 }
 0x4b2   :  { %v1904_v15 = vpack.c.bf16 %v4934_v45, %v4934_v45 }
 0x4b4   :  { %1938 = vmatmul.mubr.bf16.vlgmr.msra.gmra.mrb[24].mxu1 %v1904_v15  ;;  %1979 = vmatmul.mubr.bf16.vlgmr.msra.gmra.mrb[28].mxu0 %v1904_v15 }
 0x4b5   :  { %2184 = vmatpush1.bf16.msra.mxu1 %v4701_v37  ;;  %2225 = vmatpush1.bf16.msra.mxu0 %v4704_v1  ;;  %v5443_v37 = vld [vmem:[#allocation23_spill] sm:$0xff]  ;;  %v5444_v1 = vld [vmem:[#allocation33_spill] sm:$0xff] }
 0x4b6   :  { %2185 = vmatprep.subr.bf16.mxu1 %v4707_v42  ;;  %2226 = vmatprep.subr.bf16.mxu0 %v4710_v10  ;;  %v5445_v42 = vld [vmem:[#allocation34_spill] sm:$0xff]  ;;  %v5446_v10 = vld [vmem:[#allocation35_spill] sm:$0xff] }
 0x4b7   :  { %2215 = vmatprep.mubr.bf16.mxu1 %v5377_v39  ;;  %2256 = vmatprep.mubr.bf16.mxu0 %v5377_v39 }
 0x4b9   :  { %2186 = vmatpush1.bf16.msra.mxu1 %v4715_v56  ;;  %2227 = vmatpush1.bf16.msra.mxu0 %v4718_v29  ;;  %v5447_v56 = vld [vmem:[#allocation36_spill] sm:$0xff]  ;;  %v5448_v29 = vld [vmem:[#allocation37_spill] sm:$0xff] }
 0x4ba   :  { %2187 = vmatprep.subr.bf16.mxu1 %v4721_v46  ;;  %2228 = vmatprep.subr.bf16.mxu0 %v4724_v23  ;;  %v5449_v46 = vld [vmem:[#allocation38_spill] sm:$0xff]  ;;  %v5450_v23 = vld [vmem:[#allocation39_spill] sm:$0xff] }
 0x4bd   :  { %2188 = vmatpush1.bf16.msra.mxu1 %v4727_v54  ;;  %2229 = vmatpush1.bf16.msra.mxu0 %v4730_v47  ;;  %v5451_v54 = vld [vmem:[#allocation40_spill] sm:$0xff] }
 0x4be   :  { %2189 = vmatprep.subr.bf16.mxu1 %v4733_v49  ;;  %2230 = vmatprep.subr.bf16.mxu0 %v4736_v33 }
 0x4c1   :  { %2190 = vmatpush1.bf16.msra.mxu1 %v4739_v4  ;;  %2231 = vmatpush1.bf16.msra.mxu0 %v4742_v59 }
 0x4c2   :  { %2191 = vmatprep.subr.bf16.mxu1 %v4745_v5  ;;  %2232 = vmatprep.subr.bf16.mxu0 %v4748_v12 }
 0x4c5   :  { %2192 = vmatpush1.bf16.msra.mxu1 %v4751_v6  ;;  %2233 = vmatpush1.bf16.msra.mxu0 %v4754_v8 }
 0x4c6   :  { %2193 = vmatprep.subr.bf16.mxu1 %v5423_v19  ;;  %2234 = vmatprep.subr.bf16.mxu0 %v5424_v25 }
 0x4c9   :  { %2194 = vmatpush1.bf16.msra.mxu1 %v5425_v30  ;;  %2235 = vmatpush1.bf16.msra.mxu0 %v5426_v26 }
 0x4ca   :  { %2195 = vmatprep.subr.bf16.mxu1 %v5427_v41  ;;  %2236 = vmatprep.subr.bf16.mxu0 %v5443_v37 }
 0x4cd   :  { %2196 = vmatpush1.bf16.msra.mxu1 %v5444_v1  ;;  %2237 = vmatpush1.bf16.msra.mxu0 %v5445_v42  ;;  %v5453_v1 = vld [vmem:[#allocation22_spill] sm:$0xff] }
 0x4ce   :  { %2197 = vmatprep.subr.bf16.mxu1 %v5446_v10  ;;  %2238 = vmatprep.subr.bf16.mxu0 %v5447_v56 }
 0x4d1   :  { %2198 = vmatpush1.bf16.msra.mxu1 %v5448_v29  ;;  %2239 = vmatpush1.bf16.msra.mxu0 %v5449_v46 }
 0x4d2   :  { %2461 = vmatprep.subr.bf16.mxu1 %v5450_v23  ;;  %2502 = vmatprep.subr.bf16.mxu0 %v5451_v54 }
 0x587   :  { %v1939_v47 = vpop.f32.mrb[24].mxu1  ;;  %v1980_v49 = vpop.f32.mrb[28].mxu0 }
 0x588   :  { %v1991_v33 = vrot.slane %v1939_v47, 4  ;;  %v1995_v4 = vrot.slane %v1939_v47, 5  ;;  %v1999_v59 = vrot.slane %v1939_v47, 6  ;;  %v2003_v5 = vrot.slane %v1939_v47, 7  ;;  %v1941_v12 = vpop.f32.mrb[25].mxu1  ;;  %v1982_v6 = vpop.f32.mrb[29].mxu0 }
 0x589   :  { %v1993_v8 = vrot.slane %v1980_v49, 4  ;;  %v1997_v11 = vrot.slane %v1980_v49, 5  ;;  %v2001_v19 = vrot.slane %v1980_v49, 6  ;;  %v1943_v25 = vpop.f32.mrb[26].mxu1  ;;  %v1984_v30 = vpop.f32.mrb[30].mxu0  ;;  %v2005_v50 = vrot.slane %v1980_v49, 7 }
 0x58a   :  { %v2023_v26 = vadd.f32 %v1991_v33, %v5390_v22  ;;  %v2027_v41 = vadd.f32 %v1995_v4, %v4523_v35  ;;  %v2031_v38 = vadd.f32 %v1999_v59, %v5437_v3  ;;  %v2035_v53 = vadd.f32 %v2003_v5, %v5452_v43  ;;  %v1944_v44 = vpop.f32.mrb[27].mxu1  ;;  %v1985_v48 = vpop.f32.mrb[31].mxu0  ;;  %v5454_v5 = vld [vmem:[#allocation25_spill] sm:$0xff] }
 0x58b   :  { %v2025_v32 = vadd.f32 %v1993_v8, %v4550_v52  ;;  %v2029_v36 = vadd.f32 %v1997_v11, %v4556_v57  ;;  %v2033_v28 = vadd.f32 %v2001_v19, %v4560_v58  ;;  %v1992_v55 = vrot.slane %v1941_v12, 4  ;;  %v5455_v11 = vld [vmem:[#allocation27_spill] sm:$0xff] }
 0x58c   :  { %v3239_v31 = vmul.f32 -1.442695, %v2023_v26  ;;  %v3240_v20 = vmul.f32 -1.442695, %v2027_v41  ;;  %v3241_v60 = vmul.f32 -1.442695, %v2031_v38  ;;  %v2037_v15 = vadd.f32 %v2005_v50, %v5391_v63 }
 0x58d   :  { %v3242_v34 = vmul.f32 -1.442695, %v2035_v53  ;;  %3720 = vtanh.f32 %v2025_v32  ;;  %v1996_v9 = vrot.slane %v1941_v12, 5  ;;  %v2000_v13 = vrot.slane %v1941_v12, 6 }
 0x58e   :  { %3722 = vpow2.f32 %v3239_v31  ;;  %v2004_v40 = vrot.slane %v1941_v12, 7  ;;  %v1994_v7 = vrot.slane %v1982_v6, 4  ;;  %v2024_v18 = vadd.f32 %v1992_v55, %v5393_v0 }
 0x58f   :  { %3724 = vpow2.f32 %v3240_v20  ;;  %v2028_v14 = vadd.f32 %v1996_v9, %v5392_v17  ;;  %v1998_v62 = vrot.slane %v1982_v6, 5  ;;  %v2032_v37 = vadd.f32 %v2000_v13, %v5394_v21 }
 0x590   :  { %3726 = vpow2.f32 %v3241_v60  ;;  %v2036_v42 = vadd.f32 %v2004_v40, %v5453_v1  ;;  %v3243_v10 = vmul.f32 -1.442695, %v2024_v18  ;;  %v2026_v29 = vadd.f32 %v1994_v7, %v5396_v16 }
 0x591   :  { %3728 = vpow2.f32 %v3242_v34  ;;  %v3244_v56 = vmul.f32 -1.442695, %v2028_v14  ;;  %v3245_v46 = vmul.f32 -1.442695, %v2032_v37  ;;  %v2002_v23 = vrot.slane %v1982_v6, 6 }
 0x592   :  { %3730 = vtanh.f32 %v2029_v36  ;;  %v2030_v54 = vadd.f32 %v1998_v62, %v5438_v51  ;;  %v3246_v47 = vmul.f32 -1.442695, %v2036_v42  ;;  %v2006_v49 = vrot.slane %v1982_v6, 7 }
 0x593   :  { %3732 = vtanh.f32 %v2033_v28  ;;  %v3247_v33 = vmul.f32 -1.442695, %v2026_v29  ;;  %v2034_v12 = vadd.f32 %v2002_v23, %v5454_v5  ;;  %v1901_v40 = vmul.f32 %v4926_v2, %v5441_v24 }
 0x594   :  { %3734 = vtanh.f32 %v2037_v15  ;;  %v3248_v4 = vmul.f32 -1.442695, %v2030_v54  ;;  %v2038_v19 = vadd.f32 %v2006_v49, %v5455_v11  ;;  %v1902_v62 = vmul.f32 %v5442_v61, %v4917_v27 }
 0x595   :  { %3736 = vpow2.f32 %v3243_v10  ;;  %v3249_v53 = vmul.f32 -1.442695, %v2034_v12 }
 0x596   :  { %3738 = vpow2.f32 %v3244_v56  ;;  %v3250_v50 = vmul.f32 -1.442695, %v2038_v19  ;;  %v1903_v10 = vadd.f32 %v1902_v62, %v1901_v40 }
 0x597   :  { %v3721_v59 = vpop.eup %3720  ;;  %3740 = vpow2.f32 %v3245_v46 }
 0x598   :  { %v3723_v8 = vpop.eup %3722  ;;  %3742 = vpow2.f32 %v3246_v47  ;;  %v2116_v49 = vrot.slane %v1903_v10, 4  ;;  %v2117_v12 = vrot.slane %v1903_v10, 5  ;;  %v2118_v27 = vrot.slane %v1903_v10, 6 }
 0x599   :  { %v3725_v25 = vpop.eup %3724  ;;  %v2051_v30 = vadd.f32 1.0, %v3723_v8  ;;  %3744 = vpow2.f32 %v3247_v33 }
 0x59a   :  { %v3727_v26 = vpop.eup %3726  ;;  %v2052_v41 = vadd.f32 1.0, %v3725_v25  ;;  %3746 = vpow2.f32 %v3248_v4  ;;  %v2119_v25 = vrot.slane %v1903_v10, 7 }
 0x59b   :  { %v3729_v38 = vpop.eup %3728  ;;  %v2053_v6 = vadd.f32 1.0, %v3727_v26  ;;  %3748 = vrcp.f32 %v2051_v30 }
 0x59c   :  { %v3731_v44 = vpop.eup %3730  ;;  %v2054_v48 = vadd.f32 1.0, %v3729_v38  ;;  %3750 = vrcp.f32 %v2052_v41 }
 0x59d   :  { %v3733_v32 = vpop.eup %3732  ;;  %3752 = vrcp.f32 %v2053_v6 }
 0x59e   :  { %v3735_v36 = vpop.eup %3734  ;;  %3754 = vrcp.f32 %v2054_v48 }
 0x59f   :  { %v3737_v31 = vpop.eup %3736  ;;  %3756 = vpow2.f32 %v3249_v53 }
 0x5a0   :  { %v3739_v20 = vpop.eup %3738  ;;  %v2075_v60 = vadd.f32 1.0, %v3737_v31  ;;  %3758 = vpow2.f32 %v3250_v50 }
 0x5a1   :  { %v3741_v28 = vpop.eup %3740  ;;  %v2076_v34 = vadd.f32 1.0, %v3739_v20 }
 0x5a2   :  { %v3743_v55 = vpop.eup %3742  ;;  %v2077_v9 = vadd.f32 1.0, %v3741_v28  ;;  %3760 = vrcp.f32 %v2075_v60 }
 0x5a3   :  { %v3745_v13 = vpop.eup %3744  ;;  %v2078_v7 = vadd.f32 1.0, %v3743_v55  ;;  %3762 = vrcp.f32 %v2076_v34  ;;  %v5456_v55 = vld [vmem:[#allocation29_spill] sm:$0xff] }
 0x5a4   :  { %v3747_v18 = vpop.eup %3746  ;;  %3764 = vrcp.f32 %v2077_v9  ;;  %v2103_v47 = vadd.f32 1.0, %v3745_v13  ;;  %v5457_v13 = vld [vmem:[#allocation30_spill] sm:$0xff] }
 0x5a5   :  { %v3749_v14 = vpop.eup %3748  ;;  %3766 = vrcp.f32 %v2078_v7  ;;  %v2104_v24 = vadd.f32 1.0, %v3747_v18  ;;  %v2180_v40 = vmul.f32 %v5457_v13, %v1903_v10 }
 0x5a6   :  { %v3751_v15 = vpop.eup %3750  ;;  %v2128_v37 = vmul.f32 %v3749_v14, %v3721_v59  ;;  %3768 = vrcp.f32 %v2103_v47 }
 0x5a7   :  { %v3753_v42 = vpop.eup %3752  ;;  %v2129_v56 = vmul.f32 %v3751_v15, %v3731_v44  ;;  %3770 = vrcp.f32 %v2104_v24 }
 0x5a8   :  { %v3755_v29 = vpop.eup %3754  ;;  %v2130_v46 = vmul.f32 %v3753_v42, %v3733_v32 }
 0x5a9   :  { %v3757_v23 = vpop.eup %3756  ;;  %v2131_v54 = vmul.f32 %v3755_v29, %v3735_v36 }
 0x5aa   :  { %v3759_v2 = vpop.eup %3758  ;;  %v2105_v33 = vadd.f32 1.0, %v3757_v23 }
 0x5ab   :  { %v2106_v8 = vadd.f32 1.0, %v3759_v2 }
 0x5ac   :  { %v3761_v4 = vpop.eup %3760  ;;  %3772 = vrcp.f32 %v2105_v33 }
 0x5ad   :  { %v3763_v19 = vpop.eup %3762  ;;  %v2124_v61 = vmul.f32 %v3761_v4, %v2116_v49  ;;  %3774 = vrcp.f32 %v2106_v8  ;;  %v2165_v8 = vmul.f32 %v5457_v13, %v4934_v45  ;;  %v5018_v45 = vld [vmem:[#allocation2 + $0x2c] ss:$16 sps:$4 sm:$0xff]   ;;  %v5077_v13 = vld [vmem:[#allocation2 + $0xc4] ss:$16 sps:$4 sm:$0xff]  }
 0x5ae   :  { %v3765_v59 = vpop.eup %3764  ;;  %v2125_v30 = vmul.f32 %v3763_v19, %v2117_v12  ;;  %5459 = vst [vmem:[#allocation13_spill] sm:$0xff] %v5077_v13 }
 0x5af   :  { %v3767_v26 = vpop.eup %3766  ;;  %v2126_v41 = vmul.f32 %v3765_v59, %v2118_v27  ;;  %v2132_v38 = vadd.f32 %v2128_v37, %v2124_v61  ;;  %v5009_v61 = vld [vmem:[#allocation2] ss:$16 sps:$4 sm:$0xff]   ;;  %v5012_v59 = vld [vmem:[#allocation2 + $0x8] ss:$16 sps:$4 sm:$0xff]  }
 0x5b0   :  { %v2127_v6 = vmul.f32 %v3767_v26, %v2119_v25  ;;  %v2133_v53 = vadd.f32 %v2129_v56, %v2125_v30  ;;  %v3769_v34 = vpop.eup %3768  ;;  %v5015_v25 = vld [vmem:[#allocation2 + $0x24] ss:$16 sps:$4 sm:$0xff]   ;;  %v5023_v30 = vld [vmem:[#allocation2 + $0x20] ss:$16 sps:$4 sm:$0xff]   ;;  %v5026_v26 = vld [vmem:[#allocation2 + $0x28] ss:$16 sps:$4 sm:$0xff]  }
 0x5b1   :  { %v2134_v44 = vadd.f32 %v2130_v46, %v2126_v41  ;;  %3776 = vtanh.f32 %v2132_v38  ;;  %v2171_v48 = vrot.slane %v2132_v38, 4  ;;  %v3771_v7 = vpop.eup %3770  ;;  %v5029_v41 = vld [vmem:[#allocation2 + $0x44] ss:$16 sps:$4 sm:$0xff]   ;;  %v5032_v38 = vld [vmem:[#allocation2 + $0x4c] ss:$16 sps:$4 sm:$0xff]  }
 0x5b2   :  { %v2135_v50 = vadd.f32 %v2131_v54, %v2127_v6  ;;  %3778 = vtanh.f32 %v2133_v53  ;;  %v2172_v32 = vrot.slane %v2133_v53, 3  ;;  %v5035_v6 = vld [vmem:[#allocation2 + $0x40] ss:$16 sps:$4 sm:$0xff]   ;;  %v5038_v53 = vld [vmem:[#allocation2 + $0x48] ss:$16 sps:$4 sm:$0xff]  }
 0x5b3   :  { %3780 = vtanh.f32 %v2134_v44  ;;  %v2174_v36 = vrot.slane %v2134_v44, 2  ;;  %v5041_v44 = vld [vmem:[#allocation2 + $0x64] ss:$16 sps:$4 sm:$0xff]  }
 0x5b4   :  { %3782 = vtanh.f32 %v2135_v50  ;;  %v2173_v31 = vsel %vm238_vm0, %v2172_v32, %v2171_v48  ;;  %v2176_v20 = vrot.slane %v2135_v50, 1  ;;  %v5044_v48 = vld [vmem:[#allocation2 + $0x6c] ss:$16 sps:$4 sm:$0xff]   ;;  %v5047_v50 = vld [vmem:[#allocation2 + $0x60] ss:$16 sps:$4 sm:$0xff]  }
 0x5b5   :  { %v2175_v60 = vsel %vm1063_vm1, %v2174_v36, %v2173_v31  ;;  %v5050_v32 = vld [vmem:[#allocation2 + $0x68] ss:$16 sps:$4 sm:$0xff]   ;;  %v5053_v36 = vld [vmem:[#allocation2 + $0x84] ss:$16 sps:$4 sm:$0xff]   ;;  %v5056_v31 = vld [vmem:[#allocation2 + $0x8c] ss:$16 sps:$4 sm:$0xff]  }
 0x5b6   :  { %v2177_v28 = vsel %vm1066_vm2, %v2176_v20, %v2175_v60  ;;  %v3773_v18 = vpop.eup %3772  ;;  %v5059_v20 = vld [vmem:[#allocation2 + $0x80] ss:$16 sps:$4 sm:$0xff]   ;;  %v5062_v60 = vld [vmem:[#allocation2 + $0x88] ss:$16 sps:$4 sm:$0xff]  }
 0x5b7   :  { %v2179_v9 = vmul.f32 %v2177_v28, %v5456_v55  ;;  %v3775_v62 = vpop.eup %3774  ;;  %v5065_v28 = vld [vmem:[#allocation2 + $0xa4] ss:$16 sps:$4 sm:$0xff]  }
 0x5b9   :  { %v4997_v14 = vadd.f32 %v2180_v40, %v2179_v9  ;;  %v5074_v9 = vld [vmem:[#allocation2 + $0xa8] ss:$16 sps:$4 sm:$0xff]   ;;  %v5080_v40 = vld [vmem:[#allocation2 + $0xcc] ss:$16 sps:$4 sm:$0xff]  }
 0x5ba   :  { %5458 = vst [vmem:[#allocation12_spill] sm:$0xff] %v5074_v9  ;;  %5460 = vst [vmem:[#allocation15_spill] sm:$0xff] %v5080_v40 }
 0x5bb   :  { %v3777_v15 = vpop.eup %3776 }
 0x5bc   :  { %v3779_v37 = vpop.eup %3778  ;;  %v2140_v42 = vmul.f32 %v3777_v15, %v3769_v34  ;;  %v5068_v34 = vld [vmem:[#allocation2 + $0xac] ss:$16 sps:$4 sm:$0xff]  }
 0x5bd   :  { %v3781_v56 = vpop.eup %3780  ;;  %v2141_v29 = vmul.f32 %v3779_v37, %v3771_v7  ;;  %v5083_v7 = vld [vmem:[#allocation2 + $0xc0] ss:$16 sps:$4 sm:$0xff]   ;;  %v5092_v15 = vld [vmem:[#allocation2 + $0xec] ss:$16 sps:$4 sm:$0xff]  }
 0x5be   :  { %v3783_v46 = vpop.eup %3782  ;;  %v2142_v23 = vmul.f32 %v3781_v56, %v3773_v18  ;;  %v2152_v54 = vrot.slane %v2140_v42, 4  ;;  %5461 = vst [vmem:[#allocation16_spill] sm:$0xff] %v5083_v7  ;;  %v5086_v18 = vld [vmem:[#allocation2 + $0xc8] ss:$16 sps:$4 sm:$0xff]   ;;  %5464 = vst [vmem:[#allocation19_spill] sm:$0xff] %v5092_v15 }
 0x5bf   :  { %v2143_v47 = vmul.f32 %v3783_v46, %v3775_v62  ;;  %v2153_v2 = vrot.slane %v2141_v29, 3  ;;  %5462 = vst [vmem:[#allocation26_spill] sm:$0xff] %v5086_v18  ;;  %v5089_v62 = vld [vmem:[#allocation2 + $0xe4] ss:$16 sps:$4 sm:$0xff]   ;;  %v5095_v37 = vld [vmem:[#allocation2 + $0xe0] ss:$16 sps:$4 sm:$0xff]  }
 0x5c0   :  { %v2155_v24 = vrot.slane %v2142_v23, 2  ;;  %5463 = vst [vmem:[#allocation21_spill] sm:$0xff] %v5089_v62  ;;  %5465 = vst [vmem:[#allocation20_spill] sm:$0xff] %v5095_v37  ;;  %v5098_v42 = vld [vmem:[#allocation2 + $0xe8] ss:$16 sps:$4 sm:$0xff]  }
 0x5c1   :  { %v2154_v49 = vsel %vm238_vm0, %v2153_v2, %v2152_v54  ;;  %v2157_v33 = vrot.slane %v2143_v47, 1  ;;  %5466 = vst [vmem:[#allocation24_spill] sm:$0xff] %v5098_v42  ;;  %v4049_v56 = vld [vmem:[#allocation2 + $0x4] ss:$16 sps:$4 sm:$0xff]   ;;  %v4050_v29 = vld [vmem:[#allocation2 + $0xc] ss:$16 sps:$4 sm:$0xff]  }
 0x5c2   :  { %v2156_v10 = vsel %vm1063_vm1, %v2155_v24, %v2154_v49 }
 0x5c3   :  { %v2158_v4 = vsel %vm1066_vm2, %v2157_v33, %v2156_v10 }
 0x5c4   :  { %v2160_v12 = vmul.f32 %v2158_v4, %v5456_v55  ;;  %v5071_v55 = vld [vmem:[#allocation2 + $0xa0] ss:$16 sps:$4 sm:$0xff]  }
 0x5c6   :  { %v5005_v19 = vadd.f32 %v2165_v8, %v2160_v12 }
 0x5c8   :  { %v2182_v27 = vpack.c.bf16 %v5005_v19, %v5005_v19 }
 0x5ca   :  { %2216 = vmatmul.mubr.bf16.vlgmr.msra.gmra.mrb[28].mxu1 %v2182_v27  ;;  %2257 = vmatmul.mubr.bf16.vlgmr.msra.gmra.mrb[32].mxu0 %v2182_v27 }
 0x5cb   :  { %2462 = vmatpush1.bf16.msra.mxu1 %v5009_v61  ;;  %2503 = vmatpush1.bf16.msra.mxu0 %v5012_v59 }
 0x5cc   :  { %2463 = vmatprep.subr.bf16.mxu1 %v5015_v25  ;;  %2504 = vmatprep.subr.bf16.mxu0 %v5018_v45 }
 0x5cd   :  { %2493 = vmatprep.mubr.bf16.mxu1 %v5377_v39  ;;  %2534 = vmatprep.mubr.bf16.mxu0 %v5377_v39 }
 0x5cf   :  { %2464 = vmatpush1.bf16.msra.mxu1 %v5023_v30  ;;  %2505 = vmatpush1.bf16.msra.mxu0 %v5026_v26 }
 0x5d0   :  { %2465 = vmatprep.subr.bf16.mxu1 %v5029_v41  ;;  %2506 = vmatprep.subr.bf16.mxu0 %v5032_v38 }
 0x5d3   :  { %2466 = vmatpush1.bf16.msra.mxu1 %v5035_v6  ;;  %2507 = vmatpush1.bf16.msra.mxu0 %v5038_v53 }
 0x5d4   :  { %2467 = vmatprep.subr.bf16.mxu1 %v5041_v44  ;;  %2508 = vmatprep.subr.bf16.mxu0 %v5044_v48 }
 0x5d7   :  { %2468 = vmatpush1.bf16.msra.mxu1 %v5047_v50  ;;  %2509 = vmatpush1.bf16.msra.mxu0 %v5050_v32 }
 0x5d8   :  { %2469 = vmatprep.subr.bf16.mxu1 %v5053_v36  ;;  %2510 = vmatprep.subr.bf16.mxu0 %v5056_v31 }
 0x5db   :  { %2470 = vmatpush1.bf16.msra.mxu1 %v5059_v20  ;;  %2511 = vmatpush1.bf16.msra.mxu0 %v5062_v60 }
 0x5dc   :  { %2471 = vmatprep.subr.bf16.mxu1 %v5065_v28  ;;  %2512 = vmatprep.subr.bf16.mxu0 %v5068_v34 }
 0x5df   :  { %2472 = vmatpush1.bf16.msra.mxu1 %v5071_v55  ;;  %2513 = vmatpush1.bf16.msra.mxu0 %v5074_v9 }
 0x5e0   :  { %2473 = vmatprep.subr.bf16.mxu1 %v5077_v13  ;;  %2514 = vmatprep.subr.bf16.mxu0 %v5080_v40 }
 0x5e3   :  { %2474 = vmatpush1.bf16.msra.mxu1 %v5083_v7  ;;  %2515 = vmatpush1.bf16.msra.mxu0 %v5086_v18 }
 0x5e4   :  { %2475 = vmatprep.subr.bf16.mxu1 %v5089_v62  ;;  %2516 = vmatprep.subr.bf16.mxu0 %v5092_v15 }
 0x5e7   :  { %2476 = vmatpush1.bf16.msra.mxu1 %v5095_v37  ;;  %2517 = vmatpush1.bf16.msra.mxu0 %v5098_v42 }
 0x5e8   :  { %2739 = vmatprep.subr.bf16.mxu1 %v4049_v56  ;;  %2780 = vmatprep.subr.bf16.mxu0 %v4050_v29 }
 0x69d   :  { %v2217_v46 = vpop.f32.mrb[28].mxu1  ;;  %v2258_v23 = vpop.f32.mrb[32].mxu0 }
 0x69e   :  { %v2269_v54 = vrot.slane %v2217_v46, 3  ;;  %v2273_v47 = vrot.slane %v2217_v46, 4  ;;  %v2277_v2 = vrot.slane %v2217_v46, 5  ;;  %v2281_v24 = vrot.slane %v2217_v46, 6  ;;  %v2219_v49 = vpop.f32.mrb[29].mxu1  ;;  %v2260_v33 = vpop.f32.mrb[33].mxu0 }
 0x69f   :  { %v2271_v10 = vrot.slane %v2258_v23, 3  ;;  %v2275_v4 = vrot.slane %v2258_v23, 4  ;;  %v2279_v12 = vrot.slane %v2258_v23, 5  ;;  %v2221_v8 = vpop.f32.mrb[30].mxu1  ;;  %v2262_v27 = vpop.f32.mrb[34].mxu0  ;;  %v2283_v18 = vrot.slane %v2258_v23, 6 }
 0x6a0   :  { %v2301_v37 = vadd.f32 %v2269_v54, %v5390_v22  ;;  %v2305_v42 = vadd.f32 %v2273_v47, %v4523_v35  ;;  %v2309_v56 = vadd.f32 %v2277_v2, %v5437_v3  ;;  %v2313_v29 = vadd.f32 %v2281_v24, %v5452_v43  ;;  %v2222_v15 = vpop.f32.mrb[31].mxu1  ;;  %v2263_v62 = vpop.f32.mrb[35].mxu0 }
 0x6a1   :  { %v2303_v46 = vadd.f32 %v2271_v10, %v4550_v52  ;;  %v2307_v7 = vadd.f32 %v2275_v4, %v4556_v57  ;;  %v2311_v8 = vadd.f32 %v2279_v12, %v4560_v58  ;;  %v2270_v54 = vrot.slane %v2219_v49, 3 }
 0x6a2   :  { %v3251_v40 = vmul.f32 -1.442695, %v2301_v37  ;;  %v3252_v13 = vmul.f32 -1.442695, %v2305_v42  ;;  %v3253_v9 = vmul.f32 -1.442695, %v2309_v56  ;;  %v2315_v37 = vadd.f32 %v2283_v18, %v5391_v63 }
 0x6a3   :  { %v3254_v27 = vmul.f32 -1.442695, %v2313_v29  ;;  %3784 = vtanh.f32 %v2303_v46  ;;  %v2274_v47 = vrot.slane %v2219_v49, 4  ;;  %v2278_v2 = vrot.slane %v2219_v49, 5 }
 0x6a4   :  { %3786 = vpow2.f32 %v3251_v40  ;;  %v2282_v3 = vrot.slane %v2219_v49, 6  ;;  %v2272_v24 = vrot.slane %v2260_v33, 3  ;;  %v2302_v62 = vadd.f32 %v2270_v54, %v5393_v0 }
 0x6a5   :  { %3788 = vpow2.f32 %v3252_v13  ;;  %v2306_v15 = vadd.f32 %v2274_v47, %v5392_v17  ;;  %v2276_v23 = vrot.slane %v2260_v33, 4  ;;  %v2310_v42 = vadd.f32 %v2278_v2, %v5394_v21 }
 0x6a6   :  { %3790 = vpow2.f32 %v3253_v9  ;;  %v2314_v10 = vadd.f32 %v2282_v3, %v5453_v1  ;;  %v3255_v4 = vmul.f32 -1.442695, %v2302_v62  ;;  %v2304_v49 = vadd.f32 %v2272_v24, %v5396_v16 }
 0x6a7   :  { %3792 = vpow2.f32 %v3254_v27  ;;  %v3256_v40 = vmul.f32 -1.442695, %v2306_v15  ;;  %v3257_v13 = vmul.f32 -1.442695, %v2310_v42  ;;  %v2280_v12 = vrot.slane %v2260_v33, 5 }
 0x6a8   :  { %3794 = vtanh.f32 %v2307_v7  ;;  %v2308_v56 = vadd.f32 %v2276_v23, %v5438_v51  ;;  %v3258_v29 = vmul.f32 -1.442695, %v2314_v10  ;;  %v2284_v9 = vrot.slane %v2260_v33, 6 }
 0x6a9   :  { %3796 = vtanh.f32 %v2311_v8  ;;  %v3259_v18 = vmul.f32 -1.442695, %v2304_v49  ;;  %v2312_v3 = vadd.f32 %v2280_v12, %v5454_v5 }
 0x6aa   :  { %3798 = vtanh.f32 %v2315_v37  ;;  %v3260_v46 = vmul.f32 -1.442695, %v2308_v56  ;;  %v2316_v27 = vadd.f32 %v2284_v9, %v5455_v11 }
 0x6ab   :  { %3800 = vpow2.f32 %v3255_v4  ;;  %v3261_v15 = vmul.f32 -1.442695, %v2312_v3 }
 0x6ac   :  { %3802 = vpow2.f32 %v3256_v40  ;;  %v3262_v42 = vmul.f32 -1.442695, %v2316_v27 }
 0x6ad   :  { %v3785_v54 = vpop.eup %3784  ;;  %3804 = vpow2.f32 %v3257_v13 }
 0x6ae   :  { %v3787_v7 = vpop.eup %3786  ;;  %3806 = vpow2.f32 %v3258_v29 }
 0x6af   :  { %v3789_v8 = vpop.eup %3788  ;;  %v2329_v47 = vadd.f32 1.0, %v3787_v7  ;;  %3808 = vpow2.f32 %v3259_v18 }
 0x6b0   :  { %v3791_v2 = vpop.eup %3790  ;;  %v2330_v24 = vadd.f32 1.0, %v3789_v8  ;;  %3810 = vpow2.f32 %v3260_v46 }
 0x6b1   :  { %v3793_v62 = vpop.eup %3792  ;;  %v2331_v33 = vadd.f32 1.0, %v3791_v2  ;;  %3812 = vrcp.f32 %v2329_v47 }
 0x6b2   :  { %v3795_v23 = vpop.eup %3794  ;;  %v2332_v37 = vadd.f32 1.0, %v3793_v62  ;;  %3814 = vrcp.f32 %v2330_v24 }
 0x6b3   :  { %v3797_v10 = vpop.eup %3796  ;;  %3816 = vrcp.f32 %v2331_v33 }
 0x6b4   :  { %v3799_v4 = vpop.eup %3798  ;;  %3818 = vrcp.f32 %v2332_v37 }
 0x6b5   :  { %v3801_v40 = vpop.eup %3800  ;;  %3820 = vpow2.f32 %v3261_v15 }
 0x6b6   :  { %v3803_v49 = vpop.eup %3802  ;;  %v2353_v13 = vadd.f32 1.0, %v3801_v40  ;;  %3822 = vpow2.f32 %v3262_v42 }
 0x6b7   :  { %v3805_v12 = vpop.eup %3804  ;;  %v2354_v56 = vadd.f32 1.0, %v3803_v49  ;;  %v2394_v49 = vrot.slane %v4997_v14, 3 }
 0x6b8   :  { %v3807_v29 = vpop.eup %3806  ;;  %v2355_v9 = vadd.f32 1.0, %v3805_v12  ;;  %3824 = vrcp.f32 %v2353_v13 }
 0x6b9   :  { %v3809_v18 = vpop.eup %3808  ;;  %v2356_v46 = vadd.f32 1.0, %v3807_v29  ;;  %3826 = vrcp.f32 %v2354_v56  ;;  %v2395_v56 = vrot.slane %v4997_v14, 4 }
 0x6ba   :  { %v3811_v3 = vpop.eup %3810  ;;  %3828 = vrcp.f32 %v2355_v9  ;;  %v2381_v37 = vadd.f32 1.0, %v3809_v18 }
 0x6bb   :  { %v3813_v7 = vpop.eup %3812  ;;  %3830 = vrcp.f32 %v2356_v46  ;;  %v2382_v40 = vadd.f32 1.0, %v3811_v3  ;;  %v2396_v46 = vrot.slane %v4997_v14, 5 }
 0x6bc   :  { %v3815_v27 = vpop.eup %3814  ;;  %v2406_v8 = vmul.f32 %v3813_v7, %v3785_v54  ;;  %3832 = vrcp.f32 %v2381_v37 }
 0x6bd   :  { %v3817_v47 = vpop.eup %3816  ;;  %v2407_v2 = vmul.f32 %v3815_v27, %v3795_v23  ;;  %3834 = vrcp.f32 %v2382_v40 }
 0x6be   :  { %v3819_v24 = vpop.eup %3818  ;;  %v2408_v62 = vmul.f32 %v3817_v47, %v3797_v10  ;;  %v2397_v10 = vrot.slane %v4997_v14, 6 }
 0x6bf   :  { %v3821_v33 = vpop.eup %3820  ;;  %v2409_v15 = vmul.f32 %v3819_v24, %v3799_v4 }
 0x6c0   :  { %v3823_v42 = vpop.eup %3822  ;;  %v2383_v13 = vadd.f32 1.0, %v3821_v33 }
 0x6c1   :  { %v2384_v29 = vadd.f32 1.0, %v3823_v42 }
 0x6c2   :  { %v3825_v12 = vpop.eup %3824  ;;  %3836 = vrcp.f32 %v2383_v13 }
 0x6c3   :  { %v3827_v9 = vpop.eup %3826  ;;  %v2402_v54 = vmul.f32 %v3825_v12, %v2394_v49  ;;  %3838 = vrcp.f32 %v2384_v29 }
 0x6c4   :  { %v3829_v23 = vpop.eup %3828  ;;  %v2403_v7 = vmul.f32 %v3827_v9, %v2395_v56  ;;  %v5467_v56 = vld [vmem:[#allocation10_spill] sm:$0xff] }
 0x6c5   :  { %v3831_v4 = vpop.eup %3830  ;;  %v2404_v18 = vmul.f32 %v3829_v23, %v2396_v46  ;;  %v2410_v3 = vadd.f32 %v2406_v8, %v2402_v54 }
 0x6c6   :  { %v2405_v27 = vmul.f32 %v3831_v4, %v2397_v10  ;;  %v2411_v47 = vadd.f32 %v2407_v2, %v2403_v7  ;;  %v3833_v13 = vpop.eup %3832 }
 0x6c7   :  { %v2412_v24 = vadd.f32 %v2408_v62, %v2404_v18  ;;  %3840 = vtanh.f32 %v2410_v3  ;;  %v2449_v33 = vrot.slane %v2410_v3, 5  ;;  %v5468_v62 = vld [vmem:[#allocation8_spill] sm:$0xff]  ;;  %v3835_v9 = vpop.eup %3834 }
 0x6c8   :  { %v2413_v42 = vadd.f32 %v2409_v15, %v2405_v27  ;;  %3842 = vtanh.f32 %v2411_v47  ;;  %v2450_v11 = vrot.slane %v2411_v47, 4  ;;  %v2458_v29 = vmul.f32 %v5468_v62, %v4997_v14 }
 0x6c9   :  { %3844 = vtanh.f32 %v2412_v24  ;;  %v2452_v37 = vrot.slane %v2412_v24, 3 }
 0x6ca   :  { %3846 = vtanh.f32 %v2413_v42  ;;  %v2451_v49 = vsel %vm238_vm0, %v2450_v11, %v2449_v33  ;;  %v2454_v12 = vrot.slane %v2413_v42, 2 }
 0x6cb   :  { %v2453_v40 = vsel %vm1063_vm1, %v2452_v37, %v2451_v49 }
 0x6cc   :  { %v2455_v8 = vsel %vm1066_vm2, %v2454_v12, %v2453_v40  ;;  %v3837_v15 = vpop.eup %3836  ;;  %v2443_v40 = vmul.f32 %v5468_v62, %v5005_v19  ;;  %v5470_v19 = vld [vmem:[#allocation13_spill] sm:$0xff] }
 0x6cd   :  { %v2457_v2 = vmul.f32 %v2455_v8, %v5467_v56  ;;  %v3839_v54 = vpop.eup %3838 }
 0x6cf   :  { %v5127_v46 = vadd.f32 %v2458_v29, %v2457_v2  ;;  %v5478_v2 = vld [vmem:[#allocation17_spill] sm:$0xff] }
 0x6d1   :  { %v3841_v23 = vpop.eup %3840 }
 0x6d2   :  { %v3843_v10 = vpop.eup %3842  ;;  %v2418_v7 = vmul.f32 %v3841_v23, %v3833_v13 }
 0x6d3   :  { %v3845_v11 = vpop.eup %3844  ;;  %v2419_v4 = vmul.f32 %v3843_v10, %v3835_v9 }
 0x6d4   :  { %v3847_v18 = vpop.eup %3846  ;;  %v2420_v3 = vmul.f32 %v3845_v11, %v3837_v15  ;;  %v2430_v27 = vrot.slane %v2418_v7, 5 }
 0x6d5   :  { %v2421_v47 = vmul.f32 %v3847_v18, %v3839_v54  ;;  %v2431_v24 = vrot.slane %v2419_v4, 4 }
 0x6d6   :  { %v2433_v33 = vrot.slane %v2420_v3, 3 }
 0x6d7   :  { %v2432_v42 = vsel %vm238_vm0, %v2431_v24, %v2430_v27  ;;  %v2435_v37 = vrot.slane %v2421_v47, 2 }
 0x6d8   :  { %v2434_v14 = vsel %vm1063_vm1, %v2433_v33, %v2432_v42 }
 0x6d9   :  { %v2436_v49 = vsel %vm1066_vm2, %v2435_v37, %v2434_v14 }
 0x6da   :  { %v2438_v12 = vmul.f32 %v2436_v49, %v5467_v56 }
 0x6dc   :  { %v5135_v8 = vadd.f32 %v2443_v40, %v2438_v12 }
 0x6de   :  { %v2460_v13 = vpack.c.bf16 %v5135_v8, %v5135_v8 }
 0x6e0   :  { %2494 = vmatmul.mubr.bf16.vlgmr.msra.gmra.mrb[32].mxu1 %v2460_v13  ;;  %2535 = vmatmul.mubr.bf16.vlgmr.msra.gmra.mrb[36].mxu0 %v2460_v13 }
 0x6e1   :  { %2740 = vmatpush1.bf16.msra.mxu1 %v5009_v61  ;;  %2781 = vmatpush1.bf16.msra.mxu0 %v5012_v59  ;;  %v5471_v61 = vld [vmem:[#allocation15_spill] sm:$0xff]  ;;  %v5472_v59 = vld [vmem:[#allocation16_spill] sm:$0xff] }
 0x6e2   :  { %2741 = vmatprep.subr.bf16.mxu1 %v5015_v25  ;;  %2782 = vmatprep.subr.bf16.mxu0 %v5018_v45  ;;  %v5473_v25 = vld [vmem:[#allocation26_spill] sm:$0xff]  ;;  %v5474_v45 = vld [vmem:[#allocation21_spill] sm:$0xff] }
 0x6e3   :  { %2771 = vmatprep.mubr.bf16.mxu1 %v5377_v39  ;;  %2812 = vmatprep.mubr.bf16.mxu0 %v5377_v39  ;;  %v5469_v39 = vld [vmem:[#allocation12_spill] sm:$0xff] }
 0x6e5   :  { %2742 = vmatpush1.bf16.msra.mxu1 %v5023_v30  ;;  %2783 = vmatpush1.bf16.msra.mxu0 %v5026_v26  ;;  %v5475_v30 = vld [vmem:[#allocation19_spill] sm:$0xff]  ;;  %v5476_v26 = vld [vmem:[#allocation20_spill] sm:$0xff] }
 0x6e6   :  { %2743 = vmatprep.subr.bf16.mxu1 %v5029_v41  ;;  %2784 = vmatprep.subr.bf16.mxu0 %v5032_v38  ;;  %v5477_v41 = vld [vmem:[#allocation24_spill] sm:$0xff] }
 0x6e9   :  { %2744 = vmatpush1.bf16.msra.mxu1 %v5035_v6  ;;  %2785 = vmatpush1.bf16.msra.mxu0 %v5038_v53 }
 0x6ea   :  { %2745 = vmatprep.subr.bf16.mxu1 %v5041_v44  ;;  %2786 = vmatprep.subr.bf16.mxu0 %v5044_v48 }
 0x6ed   :  { %2746 = vmatpush1.bf16.msra.mxu1 %v5047_v50  ;;  %2787 = vmatpush1.bf16.msra.mxu0 %v5050_v32 }
 0x6ee   :  { %2747 = vmatprep.subr.bf16.mxu1 %v5053_v36  ;;  %2788 = vmatprep.subr.bf16.mxu0 %v5056_v31 }
 0x6f1   :  { %2748 = vmatpush1.bf16.msra.mxu1 %v5059_v20  ;;  %2789 = vmatpush1.bf16.msra.mxu0 %v5062_v60 }
 0x6f2   :  { %2749 = vmatprep.subr.bf16.mxu1 %v5065_v28  ;;  %2790 = vmatprep.subr.bf16.mxu0 %v5068_v34 }
 0x6f5   :  { %2750 = vmatpush1.bf16.msra.mxu1 %v5071_v55  ;;  %2791 = vmatpush1.bf16.msra.mxu0 %v5469_v39 }
 0x6f6   :  { %2751 = vmatprep.subr.bf16.mxu1 %v5470_v19  ;;  %2792 = vmatprep.subr.bf16.mxu0 %v5471_v61 }
 0x6f9   :  { %2752 = vmatpush1.bf16.msra.mxu1 %v5472_v59  ;;  %2793 = vmatpush1.bf16.msra.mxu0 %v5473_v25 }
 0x6fa   :  { %2753 = vmatprep.subr.bf16.mxu1 %v5474_v45  ;;  %2794 = vmatprep.subr.bf16.mxu0 %v5475_v30 }
 0x6fd   :  { %2754 = vmatpush1.bf16.msra.mxu1 %v5476_v26  ;;  %2795 = vmatpush1.bf16.msra.mxu0 %v5477_v41 }
 0x7b3   :  { %v2495_v38 = vpop.f32.mrb[32].mxu1  ;;  %v2536_v6 = vpop.f32.mrb[36].mxu0 }
 0x7b4   :  { %v2547_v53 = vrot.slane %v2495_v38, 2  ;;  %v2551_v44 = vrot.slane %v2495_v38, 3  ;;  %v2555_v48 = vrot.slane %v2495_v38, 4  ;;  %v2559_v50 = vrot.slane %v2495_v38, 5  ;;  %v2497_v32 = vpop.f32.mrb[33].mxu1  ;;  %v2538_v36 = vpop.f32.mrb[37].mxu0 }
 0x7b5   :  { %v2549_v31 = vrot.slane %v2536_v6, 2  ;;  %v2553_v20 = vrot.slane %v2536_v6, 3  ;;  %v2557_v60 = vrot.slane %v2536_v6, 4  ;;  %v2499_v28 = vpop.f32.mrb[34].mxu1  ;;  %v2540_v34 = vpop.f32.mrb[38].mxu0  ;;  %v2561_v54 = vrot.slane %v2536_v6, 5 }
 0x7b6   :  { %v2579_v55 = vadd.f32 %v2547_v53, %v5390_v22  ;;  %v2583_v56 = vadd.f32 %v2551_v44, %v4523_v35  ;;  %v2587_v62 = vadd.f32 %v2555_v48, %v5478_v2  ;;  %v2591_v29 = vadd.f32 %v2559_v50, %v5452_v43  ;;  %v2500_v9 = vpop.f32.mrb[35].mxu1  ;;  %v2541_v15 = vpop.f32.mrb[39].mxu0  ;;  %v5479_v48 = vld [vmem:[#allocation27_spill] sm:$0xff] }
 0x7b7   :  { %v2581_v23 = vadd.f32 %v2549_v31, %v4550_v52  ;;  %v2585_v10 = vadd.f32 %v2553_v20, %v4556_v57  ;;  %v2589_v18 = vadd.f32 %v2557_v60, %v4560_v58  ;;  %v2548_v27 = vrot.slane %v2497_v32, 2 }
 0x7b8   :  { %v3263_v7 = vmul.f32 -1.442695, %v2579_v55  ;;  %v3264_v11 = vmul.f32 -1.442695, %v2583_v56  ;;  %v3265_v4 = vmul.f32 -1.442695, %v2587_v62  ;;  %v2593_v12 = vadd.f32 %v2561_v54, %v5391_v63 }
 0x7b9   :  { %v3266_v3 = vmul.f32 -1.442695, %v2591_v29  ;;  %3848 = vtanh.f32 %v2581_v23  ;;  %v2552_v47 = vrot.slane %v2497_v32, 3  ;;  %v2556_v24 = vrot.slane %v2497_v32, 4 }
 0x7ba   :  { %3850 = vpow2.f32 %v3263_v7  ;;  %v2560_v33 = vrot.slane %v2497_v32, 5  ;;  %v2550_v42 = vrot.slane %v2538_v36, 2  ;;  %v2580_v37 = vadd.f32 %v2548_v27, %v5393_v0 }
 0x7bb   :  { %3852 = vpow2.f32 %v3264_v11  ;;  %v2584_v14 = vadd.f32 %v2552_v47, %v5392_v17  ;;  %v2554_v49 = vrot.slane %v2538_v36, 3  ;;  %v2588_v40 = vadd.f32 %v2556_v24, %v5394_v21 }
 0x7bc   :  { %3854 = vpow2.f32 %v3265_v4  ;;  %v2592_v13 = vadd.f32 %v2560_v33, %v5453_v1  ;;  %v3267_v39 = vmul.f32 -1.442695, %v2580_v37  ;;  %v2582_v61 = vadd.f32 %v2550_v42, %v5396_v16 }
 0x7bd   :  { %3856 = vpow2.f32 %v3266_v3  ;;  %v3268_v19 = vmul.f32 -1.442695, %v2584_v14  ;;  %v3269_v59 = vmul.f32 -1.442695, %v2588_v40  ;;  %v2558_v25 = vrot.slane %v2538_v36, 4 }
 0x7be   :  { %3858 = vtanh.f32 %v2585_v10  ;;  %v2586_v45 = vadd.f32 %v2554_v49, %v5438_v51  ;;  %v3270_v30 = vmul.f32 -1.442695, %v2592_v13  ;;  %v2562_v26 = vrot.slane %v2538_v36, 5 }
 0x7bf   :  { %3860 = vtanh.f32 %v2589_v18  ;;  %v3271_v41 = vmul.f32 -1.442695, %v2582_v61  ;;  %v2590_v53 = vadd.f32 %v2558_v25, %v5454_v5  ;;  %v2672_v61 = vrot.slane %v5127_v46, 2 }
 0x7c0   :  { %3862 = vtanh.f32 %v2593_v12  ;;  %v3272_v38 = vmul.f32 -1.442695, %v2586_v45  ;;  %v2594_v50 = vadd.f32 %v2562_v26, %v5479_v48  ;;  %v2673_v45 = vrot.slane %v5127_v46, 3 }
 0x7c1   :  { %3864 = vpow2.f32 %v3267_v39  ;;  %v3273_v34 = vmul.f32 -1.442695, %v2590_v53  ;;  %v2675_v53 = vrot.slane %v5127_v46, 5 }
 0x7c2   :  { %3866 = vpow2.f32 %v3268_v19  ;;  %v3274_v62 = vmul.f32 -1.442695, %v2594_v50 }
 0x7c3   :  { %v3849_v6 = vpop.eup %3848  ;;  %3868 = vpow2.f32 %v3269_v59 }
 0x7c4   :  { %v3851_v44 = vpop.eup %3850  ;;  %3870 = vpow2.f32 %v3270_v30 }
 0x7c5   :  { %v3853_v32 = vpop.eup %3852  ;;  %v2607_v31 = vadd.f32 1.0, %v3851_v44  ;;  %3872 = vpow2.f32 %v3271_v41  ;;  %v2674_v41 = vrot.slane %v5127_v46, 4 }
 0x7c6   :  { %v3855_v20 = vpop.eup %3854  ;;  %v2608_v60 = vadd.f32 1.0, %v3853_v32  ;;  %3874 = vpow2.f32 %v3272_v38 }
 0x7c7   :  { %v3857_v28 = vpop.eup %3856  ;;  %v2609_v36 = vadd.f32 1.0, %v3855_v20  ;;  %3876 = vrcp.f32 %v2607_v31 }
 0x7c8   :  { %v3859_v55 = vpop.eup %3858  ;;  %v2610_v56 = vadd.f32 1.0, %v3857_v28  ;;  %3878 = vrcp.f32 %v2608_v60 }
 0x7c9   :  { %v3861_v29 = vpop.eup %3860  ;;  %3880 = vrcp.f32 %v2609_v36 }
 0x7ca   :  { %v3863_v9 = vpop.eup %3862  ;;  %3882 = vrcp.f32 %v2610_v56 }
 0x7cb   :  { %v3865_v15 = vpop.eup %3864  ;;  %3884 = vpow2.f32 %v3273_v34 }
 0x7cc   :  { %v3867_v54 = vpop.eup %3866  ;;  %v2631_v23 = vadd.f32 1.0, %v3865_v15  ;;  %3886 = vpow2.f32 %v3274_v62 }
 0x7cd   :  { %v3869_v10 = vpop.eup %3868  ;;  %v2632_v7 = vadd.f32 1.0, %v3867_v54 }
 0x7ce   :  { %v3871_v11 = vpop.eup %3870  ;;  %v2633_v4 = vadd.f32 1.0, %v3869_v10  ;;  %3888 = vrcp.f32 %v2631_v23  ;;  %v5480_v23 = vld [vmem:[#allocation31_spill] sm:$0xff] }
 0x7cf   :  { %v3873_v18 = vpop.eup %3872  ;;  %v2634_v3 = vadd.f32 1.0, %v3871_v11  ;;  %3890 = vrcp.f32 %v2632_v7  ;;  %v5481_v7 = vld [vmem:[#allocation32_spill] sm:$0xff] }
 0x7d0   :  { %v3875_v27 = vpop.eup %3874  ;;  %3892 = vrcp.f32 %v2633_v4  ;;  %v2659_v13 = vadd.f32 1.0, %v3873_v18  ;;  %v2736_v11 = vmul.f32 %v5481_v7, %v5127_v46 }
 0x7d1   :  { %v3877_v47 = vpop.eup %3876  ;;  %3894 = vrcp.f32 %v2634_v3  ;;  %v2660_v19 = vadd.f32 1.0, %v3875_v27 }
 0x7d2   :  { %v3879_v24 = vpop.eup %3878  ;;  %v2684_v33 = vmul.f32 %v3877_v47, %v3849_v6  ;;  %3896 = vrcp.f32 %v2659_v13 }
 0x7d3   :  { %v3881_v42 = vpop.eup %3880  ;;  %v2685_v37 = vmul.f32 %v3879_v24, %v3859_v55  ;;  %3898 = vrcp.f32 %v2660_v19 }
 0x7d4   :  { %v3883_v14 = vpop.eup %3882  ;;  %v2686_v49 = vmul.f32 %v3881_v42, %v3861_v29 }
 0x7d5   :  { %v3885_v12 = vpop.eup %3884  ;;  %v2687_v40 = vmul.f32 %v3883_v14, %v3863_v9 }
 0x7d6   :  { %v3887_v39 = vpop.eup %3886  ;;  %v2661_v59 = vadd.f32 1.0, %v3885_v12 }
 0x7d7   :  { %v2662_v30 = vadd.f32 1.0, %v3887_v39 }
 0x7d8   :  { %v3889_v25 = vpop.eup %3888  ;;  %3900 = vrcp.f32 %v2661_v59 }
 0x7d9   :  { %v3891_v26 = vpop.eup %3890  ;;  %v2680_v38 = vmul.f32 %v3889_v25, %v2672_v61  ;;  %3902 = vrcp.f32 %v2662_v30 }
 0x7da   :  { %v3893_v6 = vpop.eup %3892  ;;  %v2681_v44 = vmul.f32 %v3891_v26, %v2673_v45  ;;  %v2721_v45 = vmul.f32 %v5481_v7, %v5135_v8 }
 0x7db   :  { %v3895_v50 = vpop.eup %3894  ;;  %v2682_v32 = vmul.f32 %v3893_v6, %v2674_v41  ;;  %v2688_v31 = vadd.f32 %v2684_v33, %v2680_v38 }
 0x7dc   :  { %v2683_v20 = vmul.f32 %v3895_v50, %v2675_v53  ;;  %v2689_v60 = vadd.f32 %v2685_v37, %v2681_v44  ;;  %v3897_v54 = vpop.eup %3896 }
 0x7dd   :  { %v2690_v28 = vadd.f32 %v2686_v49, %v2682_v32  ;;  %3904 = vtanh.f32 %v2688_v31  ;;  %v2727_v36 = vrot.slane %v2688_v31, 6  ;;  %v3899_v4 = vpop.eup %3898 }
 0x7de   :  { %v2691_v34 = vadd.f32 %v2687_v40, %v2683_v20  ;;  %3906 = vtanh.f32 %v2689_v60  ;;  %v2728_v55 = vrot.slane %v2689_v60, 5 }
 0x7df   :  { %3908 = vtanh.f32 %v2690_v28  ;;  %v2730_v56 = vrot.slane %v2690_v28, 4 }
 0x7e0   :  { %3910 = vtanh.f32 %v2691_v34  ;;  %v2729_v62 = vsel %vm238_vm0, %v2728_v55, %v2727_v36  ;;  %v2732_v29 = vrot.slane %v2691_v34, 3 }
 0x7e1   :  { %v2731_v9 = vsel %vm1063_vm1, %v2730_v56, %v2729_v62 }
 0x7e2   :  { %v2733_v15 = vsel %vm1066_vm2, %v2732_v29, %v2731_v9  ;;  %v3901_v18 = vpop.eup %3900 }
 0x7e3   :  { %v2735_v10 = vmul.f32 %v2733_v15, %v5480_v23  ;;  %v3903_v27 = vpop.eup %3902 }
 0x7e5   :  { %v5197_v3 = vadd.f32 %v2736_v11, %v2735_v10 }
 0x7e7   :  { %v3905_v47 = vpop.eup %3904 }
 0x7e8   :  { %v3907_v24 = vpop.eup %3906  ;;  %v2696_v33 = vmul.f32 %v3905_v47, %v3897_v54 }
 0x7e9   :  { %v3909_v42 = vpop.eup %3908  ;;  %v2697_v37 = vmul.f32 %v3907_v24, %v3899_v4 }
 0x7ea   :  { %v3911_v14 = vpop.eup %3910  ;;  %v2698_v49 = vmul.f32 %v3909_v42, %v3901_v18  ;;  %v2708_v12 = vrot.slane %v2696_v33, 6 }
 0x7eb   :  { %v2699_v40 = vmul.f32 %v3911_v14, %v3903_v27  ;;  %v2709_v13 = vrot.slane %v2697_v37, 5 }
 0x7ec   :  { %v2711_v39 = vrot.slane %v2698_v49, 4 }
 0x7ed   :  { %v2710_v19 = vsel %vm238_vm0, %v2709_v13, %v2708_v12  ;;  %v2713_v61 = vrot.slane %v2699_v40, 3 }
 0x7ee   :  { %v2712_v46 = vsel %vm1063_vm1, %v2711_v39, %v2710_v19 }
 0x7ef   :  { %v2714_v59 = vsel %vm1066_vm2, %v2713_v61, %v2712_v46 }
 0x7f0   :  { %v2716_v25 = vmul.f32 %v2714_v59, %v5480_v23 }
 0x7f2   :  { %v5205_v30 = vadd.f32 %v2721_v45, %v2716_v25 }
 0x7f4   :  { %v2738_v26 = vpack.c.bf16 %v5205_v30, %v5205_v30 }
 0x7f6   :  { %2772 = vmatmul.mubr.bf16.vlgmr.msra.gmra.mrb[36].mxu1 %v2738_v26  ;;  %2813 = vmatmul.mubr.bf16.vlgmr.msra.gmra.mrb[40].mxu0 %v2738_v26 }
 0x8c9   :  { %v2773_v41 = vpop.f32.mrb[36].mxu1  ;;  %v2814_v38 = vpop.f32.mrb[40].mxu0 }
 0x8ca   :  { %v2825_v6 = vrot.slane %v2773_v41, 1  ;;  %v2829_v53 = vrot.slane %v2773_v41, 2  ;;  %v2833_v44 = vrot.slane %v2773_v41, 3  ;;  %v2837_v50 = vrot.slane %v2773_v41, 4  ;;  %v2775_v32 = vpop.f32.mrb[37].mxu1  ;;  %v2816_v31 = vpop.f32.mrb[41].mxu0 }
 0x8cb   :  { %v2827_v20 = vrot.slane %v2814_v38, 1  ;;  %v2831_v60 = vrot.slane %v2814_v38, 2  ;;  %v2835_v28 = vrot.slane %v2814_v38, 3  ;;  %v2777_v36 = vpop.f32.mrb[38].mxu1  ;;  %v2818_v8 = vpop.f32.mrb[42].mxu0  ;;  %v2839_v15 = vrot.slane %v2814_v38, 4 }
 0x8cc   :  { %v2857_v34 = vadd.f32 %v2825_v6, %v5390_v22  ;;  %v2861_v55 = vadd.f32 %v2829_v53, %v4523_v35  ;;  %v2865_v56 = vadd.f32 %v2833_v44, %v5478_v2  ;;  %v2869_v62 = vadd.f32 %v2837_v50, %v5452_v43  ;;  %v2778_v29 = vpop.f32.mrb[39].mxu1  ;;  %v2819_v9 = vpop.f32.mrb[43].mxu0 }
 0x8cd   :  { %v2859_v54 = vadd.f32 %v2827_v20, %v4550_v52  ;;  %v2863_v23 = vadd.f32 %v2831_v60, %v4556_v57  ;;  %v2867_v4 = vadd.f32 %v2835_v28, %v4560_v58  ;;  %v2826_v22 = vrot.slane %v2775_v32, 1 }
 0x8ce   :  { %v3275_v10 = vmul.f32 -1.442695, %v2857_v34  ;;  %v3276_v7 = vmul.f32 -1.442695, %v2861_v55  ;;  %v3277_v11 = vmul.f32 -1.442695, %v2865_v56  ;;  %v2871_v57 = vadd.f32 %v2839_v15, %v5391_v63 }
 0x8cf   :  { %v3278_v18 = vmul.f32 -1.442695, %v2869_v62  ;;  %3912 = vtanh.f32 %v2859_v54  ;;  %v2830_v35 = vrot.slane %v2775_v32, 2  ;;  %v2834_v2 = vrot.slane %v2775_v32, 3 }
 0x8d0   :  { %3914 = vpow2.f32 %v3275_v10  ;;  %v2838_v27 = vrot.slane %v2775_v32, 4  ;;  %v2828_v43 = vrot.slane %v2816_v31, 1  ;;  %v2858_v47 = vadd.f32 %v2826_v22, %v5393_v0 }
 0x8d1   :  { %3916 = vpow2.f32 %v3276_v7  ;;  %v2862_v52 = vadd.f32 %v2830_v35, %v5392_v17  ;;  %v2832_v24 = vrot.slane %v2816_v31, 2  ;;  %v2866_v33 = vadd.f32 %v2834_v2, %v5394_v21 }
 0x8d2   :  { %3918 = vpow2.f32 %v3277_v11  ;;  %v2870_v58 = vadd.f32 %v2838_v27, %v5453_v1  ;;  %v3279_v42 = vmul.f32 -1.442695, %v2858_v47  ;;  %v2860_v14 = vadd.f32 %v2828_v43, %v5396_v16 }
 0x8d3   :  { %3920 = vpow2.f32 %v3278_v18  ;;  %v3280_v37 = vmul.f32 -1.442695, %v2862_v52  ;;  %v3281_v49 = vmul.f32 -1.442695, %v2866_v33  ;;  %v2836_v12 = vrot.slane %v2816_v31, 3 }
 0x8d4   :  { %3922 = vtanh.f32 %v2863_v23  ;;  %v2864_v0 = vadd.f32 %v2832_v24, %v5438_v51  ;;  %v3282_v17 = vmul.f32 -1.442695, %v2870_v58  ;;  %v2840_v40 = vrot.slane %v2816_v31, 4 }
 0x8d5   :  { %3924 = vtanh.f32 %v2867_v4  ;;  %v3283_v63 = vmul.f32 -1.442695, %v2860_v14  ;;  %v2868_v1 = vadd.f32 %v2836_v12, %v5454_v5  ;;  %v2950_v11 = vrot.slane %v5197_v3, 1 }
 0x8d6   :  { %3926 = vtanh.f32 %v2871_v57  ;;  %v3284_v21 = vmul.f32 -1.442695, %v2864_v0  ;;  %v2872_v16 = vadd.f32 %v2840_v40, %v5479_v48  ;;  %v2951_v22 = vrot.slane %v5197_v3, 2 }
 0x8d7   :  { %3928 = vpow2.f32 %v3279_v42  ;;  %v3285_v45 = vmul.f32 -1.442695, %v2868_v1  ;;  %v2952_v43 = vrot.slane %v5197_v3, 3  ;;  %v2953_v24 = vrot.slane %v5197_v3, 4 }
 0x8d8   :  { %3930 = vpow2.f32 %v3280_v37  ;;  %v3286_v38 = vmul.f32 -1.442695, %v2872_v16 }
 0x8d9   :  { %v3913_v13 = vpop.eup %3912  ;;  %3932 = vpow2.f32 %v3281_v49 }
 0x8da   :  { %v3915_v39 = vpop.eup %3914  ;;  %3934 = vpow2.f32 %v3282_v17 }
 0x8db   :  { %v3917_v19 = vpop.eup %3916  ;;  %v2885_v61 = vadd.f32 1.0, %v3915_v39  ;;  %3936 = vpow2.f32 %v3283_v63 }
 0x8dc   :  { %v3919_v46 = vpop.eup %3918  ;;  %v2886_v51 = vadd.f32 1.0, %v3917_v19  ;;  %3938 = vpow2.f32 %v3284_v21 }
 0x8dd   :  { %v3921_v59 = vpop.eup %3920  ;;  %v2887_v25 = vadd.f32 1.0, %v3919_v46  ;;  %3940 = vrcp.f32 %v2885_v61 }
 0x8de   :  { %v3923_v26 = vpop.eup %3922  ;;  %v2888_v41 = vadd.f32 1.0, %v3921_v59  ;;  %3942 = vrcp.f32 %v2886_v51 }
 0x8df   :  { %v3925_v6 = vpop.eup %3924  ;;  %3944 = vrcp.f32 %v2887_v25 }
 0x8e0   :  { %v3927_v5 = vpop.eup %3926  ;;  %3946 = vrcp.f32 %v2888_v41  ;;  %v2997_v41 = vpop.permute.xlu1 %2996 }
 0x8e1   :  { %v3929_v53 = vpop.eup %3928  ;;  %3948 = vpow2.f32 %v3285_v45  ;;  %v2980_v45 = vpop.permute.xlu0 %2979 }
 0x8e2   :  { %v3931_v48 = vpop.eup %3930  ;;  %v2909_v44 = vadd.f32 1.0, %v3929_v53  ;;  %3950 = vpow2.f32 %v3286_v38 }
 0x8e3   :  { %v3933_v50 = vpop.eup %3932  ;;  %v2910_v32 = vadd.f32 1.0, %v3931_v48 }
 0x8e4   :  { %v3935_v31 = vpop.eup %3934  ;;  %v2911_v20 = vadd.f32 1.0, %v3933_v50  ;;  %3952 = vrcp.f32 %v2909_v44 }
 0x8e5   :  { %v3937_v60 = vpop.eup %3936  ;;  %v2912_v28 = vadd.f32 1.0, %v3935_v31  ;;  %3954 = vrcp.f32 %v2910_v32 }
 0x8e6   :  { %v3939_v36 = vpop.eup %3938  ;;  %3956 = vrcp.f32 %v2911_v20  ;;  %v2937_v23 = vadd.f32 1.0, %v3937_v60  ;;  %v5482_v20 = vld [vmem:[#allocation14_spill] sm:$0xff] }
 0x8e7   :  { %v3941_v8 = vpop.eup %3940  ;;  %3958 = vrcp.f32 %v2912_v28  ;;  %v2938_v7 = vadd.f32 1.0, %v3939_v36  ;;  %v5483_v36 = vld [vmem:[#allocation9_spill] sm:$0xff] }
 0x8e8   :  { %v3943_v34 = vpop.eup %3942  ;;  %v2962_v55 = vmul.f32 %v3941_v8, %v3913_v13  ;;  %3960 = vrcp.f32 %v2937_v23 }
 0x8e9   :  { %v3945_v56 = vpop.eup %3944  ;;  %v2963_v62 = vmul.f32 %v3943_v34, %v3923_v26  ;;  %3962 = vrcp.f32 %v2938_v7 }
 0x8ea   :  { %v3947_v29 = vpop.eup %3946  ;;  %v2964_v9 = vmul.f32 %v3945_v56, %v3925_v6 }
 0x8eb   :  { %v3949_v15 = vpop.eup %3948  ;;  %v2965_v54 = vmul.f32 %v3947_v29, %v3927_v5  ;;  %v2999_v5 = vmul.f32 %v2997_v41, %v5205_v30 }
 0x8ec   :  { %v3951_v10 = vpop.eup %3950  ;;  %v2939_v4 = vadd.f32 1.0, %v3949_v15 }
 0x8ed   :  { %v2940_v35 = vadd.f32 1.0, %v3951_v10 }
 0x8ee   :  { %v3953_v18 = vpop.eup %3952  ;;  %3964 = vrcp.f32 %v2939_v4 }
 0x8ef   :  { %v3955_v2 = vpop.eup %3954  ;;  %v2958_v27 = vmul.f32 %v3953_v18, %v2950_v11  ;;  %3966 = vrcp.f32 %v2940_v35 }
 0x8f0   :  { %v3957_v47 = vpop.eup %3956  ;;  %v2959_v52 = vmul.f32 %v3955_v2, %v2951_v22 }
 0x8f1   :  { %v3959_v57 = vpop.eup %3958  ;;  %v2960_v33 = vmul.f32 %v3957_v47, %v2952_v43  ;;  %v2966_v58 = vadd.f32 %v2962_v55, %v2958_v27 }
 0x8f2   :  { %v2961_v42 = vmul.f32 %v3959_v57, %v2953_v24  ;;  %v2967_v37 = vadd.f32 %v2963_v62, %v2959_v52  ;;  %v3961_v12 = vpop.eup %3960 }
 0x8f3   :  { %v2968_v14 = vadd.f32 %v2964_v9, %v2960_v33  ;;  %3968 = vtanh.f32 %v2966_v58  ;;  %v3963_v0 = vpop.eup %3962 }
 0x8f4   :  { %v2969_v49 = vadd.f32 %v2965_v54, %v2961_v42  ;;  %3970 = vtanh.f32 %v2967_v37  ;;  %v3010_v54 = vpop.xlane.xlu1 %3009 }
 0x8f5   :  { %3972 = vtanh.f32 %v2968_v14  ;;  %vm3013_vm8 = vcmp.eq.f32.partialorder %v3010_v54, inf  ;;  %v3016_v22 = vand.u32 2147483648, %v3010_v54  ;;  %vm3015_vm9 = vcmp.eq.f32.partialorder %v3010_v54, 0.0 }
 0x8f6   :  { %3974 = vtanh.f32 %v2969_v49 }
 0x8f7   :  { %3976 = vrsqrt.f32 %v3010_v54 }
 0x8f8   :  { %v3965_v17 = vpop.eup %3964 }
 0x8f9   :  { %v3967_v40 = vpop.eup %3966 }
 0x8fd   :  { %v3969_v63 = vpop.eup %3968 }
 0x8fe   :  { %v3971_v21 = vpop.eup %3970  ;;  %v2974_v3 = vmul.f32 %v3969_v63, %v3961_v12 }
 0x8ff   :  { %v3973_v13 = vpop.eup %3972  ;;  %v2975_v1 = vmul.f32 %v3971_v21, %v3963_v0 }
 0x900   :  { %v3975_v39 = vpop.eup %3974  ;;  %v2976_v16 = vmul.f32 %v3973_v13, %v3965_v17  ;;  %v2986_v19 = vrot.slane %v2974_v3, 7 }
 0x901   :  { %v2977_v61 = vmul.f32 %v3975_v39, %v3967_v40  ;;  %v2987_v46 = vrot.slane %v2975_v1, 6  ;;  %v3977_v10 = vpop.eup %3976 }
 0x902   :  { %v2989_v51 = vrot.slane %v2976_v16, 5  ;;  %v3012_v11 = vmul.f32 %v3977_v10, %v3010_v54 }
 0x903   :  { %v2988_v59 = vsel %vm238_vm0, %v2987_v46, %v2986_v19  ;;  %v2991_v25 = vrot.slane %v2977_v61, 4 }
 0x904   :  { %v2990_v26 = vsel %vm1063_vm1, %v2989_v51, %v2988_v59  ;;  %v3014_v4 = vsel %vm3013_vm8, %v3010_v54, %v3012_v11 }
 0x905   :  { %v2992_v38 = vsel %vm1066_vm2, %v2991_v25, %v2990_v26  ;;  %v3017_v2 = vsel %vm3015_vm9, %v3016_v22, %v3014_v4 }
 0x906   :  { %v2994_v6 = vmul.f32 %v2992_v38, %v2980_v45  ;;  %v3018_v57 = vmax.f32 %v3017_v2, 1e-08 }
 0x908   :  { %v3000_v53 = vadd.f32 %v2999_v5, %v2994_v6 }
 0x90a   :  { %v3019_v48 = vmul.f32 %v3000_v53, %v3000_v53  ;;  %v3044_v44 = vrot.slane %v3000_v53, 1  ;;  %v3060_v50 = vrot.slane %v3000_v53, 2  ;;  %v3061_v32 = vrot.slane %v3000_v53, 3 }
 0x90b   :  { %v3047_v8 = vmul.f32 %v3000_v53, %v5483_v36 }
 0x90c   :  { %v3020_v31 = vsel %vm3007_vm6, %v3019_v48, 0.0  ;;  %v3048_v60 = vmul.f32 %v3044_v44, %v5482_v20  ;;  %v3065_v28 = vmul.f32 %v3061_v32, %v5482_v20  ;;  %v3064_v55 = vmul.f32 %v3060_v50, %v5483_v36 }
 0x90d   :  { %3021 = vadd.xlane.f32.xlu0 %v3020_v31  ;;  %v3032_v30 = vsel %vm3031_vm7, %v3019_v48, 0.0 }
 0x90e   :  { %v3051_v34 = vrot.slane %v3048_v60, 7  ;;  %v3068_v56 = vrot.slane %v3065_v28, 7 }
 0x910   :  { %v3052_v62 = vsel %vm238_vm0, %v3051_v34, %v3047_v8  ;;  %v3069_v9 = vsel %vm238_vm0, %v3068_v56, %v3064_v55 }
 0x911   :  { %3033 = vadd.xlane.f32.xlu0 %v3032_v30  ;;  %v3054_v29 = vsel %vm3007_vm6, %v3052_v62, 0.0  ;;  %v3071_v15 = vsel %vm3007_vm6, %v3069_v9, 0.0 }
 0x912   :  { %3055 = vadd.xlane.f32.xlu1 %v3054_v29 }
 0x915   :  { %3072 = vadd.xlane.f32.xlu0 %v3071_v15 }
 0x99a   :  { %v3022_v23 = vpop.xlane.xlu0 %3021 }
 0x99b   :  { %3978 = vrsqrt.f32 %v3022_v23  ;;  %vm3025_vm10 = vcmp.eq.f32.partialorder %v3022_v23, inf  ;;  %v3028_v27 = vand.u32 2147483648, %v3022_v23  ;;  %vm3027_vm11 = vcmp.eq.f32.partialorder %v3022_v23, 0.0 }
 0x99e   :  { %v3034_v7 = vpop.xlane.xlu0 %3033 }
 0x99f   :  { %3980 = vrsqrt.f32 %v3034_v7  ;;  %vm3037_vm12 = vcmp.eq.f32.partialorder %v3034_v7, inf  ;;  %v3040_v58 = vand.u32 2147483648, %v3034_v7  ;;  %vm3039_vm13 = vcmp.eq.f32.partialorder %v3034_v7, 0.0  ;;  %v3056_v40 = vpop.xlane.xlu1 %3055 }
 0x9a2   :  { %v3073_v3 = vpop.xlane.xlu0 %3072 }
 0x9a5   :  { %v3979_v18 = vpop.eup %3978 }
 0x9a6   :  { %v3024_v35 = vmul.f32 %v3979_v18, %v3022_v23 }
 0x9a8   :  { %v3026_v43 = vsel %vm3025_vm10, %v3022_v23, %v3024_v35 }
 0x9a9   :  { %v3981_v47 = vpop.eup %3980  ;;  %v3029_v52 = vsel %vm3027_vm11, %v3028_v27, %v3026_v43 }
 0x9aa   :  { %v3036_v24 = vmul.f32 %v3981_v47, %v3034_v7  ;;  %v3030_v33 = vmax.f32 %v3029_v52, 1e-08 }
 0x9ac   :  { %v3038_v42 = vsel %vm3037_vm12, %v3034_v7, %v3036_v24  ;;  %v3057_v37 = vmul.f32 %v3030_v33, %v3018_v57 }
 0x9ad   :  { %v3041_v14 = vsel %vm3039_vm13, %v3040_v58, %v3038_v42 }
 0x9ae   :  { %v3042_v49 = vmax.f32 %v3041_v14, 1e-08  ;;  %3982 = vrcp.f32 %v3057_v37 }
 0x9b0   :  { %v3075_v12 = vrot.slane %v3042_v49, 2 }
 0x9b2   :  { %v3077_v0 = vmul.f32 %v3075_v12, %v3018_v57 }
 0x9b4   :  { %3984 = vrcp.f32 %v3077_v0 }
 0x9b8   :  { %v3983_v17 = vpop.eup %3982 }
 0x9b9   :  { %v3059_v63 = vmul.f32 %v3983_v17, %v3056_v40 }
 0x9bb   :  { %v3080_v13 = vsub.f32 0.6, %v3059_v63 }
 0x9be   :  { %v3985_v21 = vpop.eup %3984 }
 0x9bf   :  { %v3079_v1 = vmul.f32 %v3985_v21, %v3073_v3 }
 0x9c1   :  { %v3081_v39 = vadd.f32 %v3080_v13, %v3079_v1 }
 0x9c3   :  { %v3082_v16 = vmax.f32 %v3081_v39, 1e-06 }
 0x9c5   :  { %v3084_v19 = vsel %vm3083_vm14, %v3082_v16, 0.0 }
 0x9c6   :  { %3085 = vadd.xlane.f32.xlu1 %v3084_v19 }
 0xa53   :  { %v3086_v61 = vpop.xlane.xlu1 %3085 }
 0xa54   :  { %v3087_v46 = vrot.slane %v3086_v61, 4 }
 0xa56   :  { %v3088_v51 = vadd.f32 %v3087_v46, %v3086_v61 }
 0xa58   :  { %v3089_v59 = vrot.slane %v3088_v51, 2 }
 0xa5a   :  { %v3090_v25 = vadd.f32 %v3089_v59, %v3088_v51 }
 0xa5c   :  { %v3091_v45 = vrot.slane %v3090_v25, 1 }
 0xa5e   :  { %v3092_v26 = vadd.f32 %v3091_v45, %v3090_v25 }
 0xa60   :  { %3317 = vpush %v3092_v26 }
 0xa91   :  { %s3318_s2 = spop %3317 }
 0xa92   :  { %v3094_v41 = vstv %s3318_s2 }
 0xa93   :  { %v3095_v38 = vmul.f32 0.5, %v3094_v41 }
 0xa95   :  { %3097 = vst.msk [vmem:[#allocation5] sm:$0x1] %vm3096_vm15, %v3095_v38 }
 0xa96   :  { %4084 = shalt.err (!%p4081_p12)
}
 0xa97   :  { %s4085_s17 = scalar_lea.hbm %s5264_s10, 16 }
 0xa98   :  { %p4086_p13 = scmp.ne.s32.totalorder %s5264_s10, %s4085_s17  ;;  %p4089_p0 = scmp.lt.u32.totalorder %s4085_s17, %s5264_s10 }
 0xa9a   :  { %p4091_p1 = pnand %p4089_p0, %p4086_p13 }
 0xa9c   :  { %4094 = shalt.err (!%p4091_p1)
}
 0xa9d   :  { %3107 = dma.vmem_to_hbm [thread:$0]  %s3105_s12, 16, %s5264_s10, [#allocation4]  }
 0xa9e   :  { %4097 = dma.done.wait [#allocation4], 16  }
 0xa9f   :  { %4098 = vsyncadd [#allocation4], 4294967280 }
 0xaa0   :  { %3111 = vsyncpa [#allocation3], 1 }
 0xaa1   :  { %3112 = vsyncpa [#allocation4], 1 }

</bundles_post_ra>
